<compile_context>
chip_gen: v7x
topology: tpu7x:2x2x1
jax: 0.10.0
libtpu: 0.0.40
codegen_flags: <defaults>
</compile_context>

<pallas_src>
import functools

import jax
import jax.numpy as jnp
from jax import lax
from jax.experimental import pallas as pl
from jax.experimental.pallas import tpu as pltpu


# ----------------------------- helpers -----------------------------

def _round_up(a, b):
    return (a + b - 1) // b * b


@functools.lru_cache(maxsize=None)
def _vmem_limit_bytes():
    cap = 128 * 1024 * 1024
    try:
        cap = int(getattr(pltpu.get_tpu_info(), "vmem_capacity_bytes", cap))
    except Exception:
        pass
    # 3/4 of physical: 48 MiB on v7x (64 MiB phys), 96 MiB on v5e/v6e (128 MiB phys).
    return int(min(cap * 3 // 4, 100 * 1024 * 1024))


def _pick_token_tile(n):
    if n <= 1024:
        return _round_up(n, 8)
    for t in (1024, 512, 256):
        if n % t == 0:
            return t
    return 512


def _compiler_params(sem):
    return pltpu.CompilerParams(dimension_semantics=sem,
                                vmem_limit_bytes=_vmem_limit_bytes())


# ------------------- kernel 1: LayerNorm + input projection -------------------

def _ln_proj_kernel(x_ref, g_ref, b_ref, w_ref, o_ref):
    x = x_ref[0].astype(jnp.float32)                       # (tm, C)
    mean = jnp.mean(x, axis=-1, keepdims=True)
    var = jnp.mean(jnp.square(x - mean), axis=-1, keepdims=True)
    xn = (x - mean) * lax.rsqrt(var + 1e-5)                # PyTorch LayerNorm eps
    xn = xn * g_ref[...] + b_ref[...]
    o_ref[0] = jnp.dot(xn.astype(jnp.bfloat16), w_ref[...],
                       preferred_element_type=jnp.float32).astype(o_ref.dtype)


def ln_input_proj(x_tok, gamma, beta, w_in, tm):
    """x_tok: (B, Np, C) f32  ->  xz = LN(x) @ w_in : (B, Np, 2*d_inner) bf16."""
    B, Np, C = x_tok.shape
    K2 = w_in.shape[1]
    return pl.pallas_call(
        _ln_proj_kernel,
        out_shape=jax.ShapeDtypeStruct((B, Np, K2), jnp.bfloat16),
        grid=(B, Np // tm),
        in_specs=[pl.BlockSpec((1, tm, C), lambda b, i: (b, i, 0)),
                  pl.BlockSpec((1, C), lambda b, i: (0, 0)),
                  pl.BlockSpec((1, C), lambda b, i: (0, 0)),
                  pl.BlockSpec((C, K2), lambda b, i: (0, 0))],
        out_specs=pl.BlockSpec((1, tm, K2), lambda b, i: (b, i, 0)),
        compiler_params=_compiler_params(("parallel", "parallel")),
    )(x_tok, gamma.reshape(1, C).astype(jnp.float32),
      beta.reshape(1, C).astype(jnp.float32), w_in.astype(jnp.bfloat16))


# --- kernel 2: Mamba surrogate (causal dwconv) + SiLU gating + out-proj + q^T k ---

def _mamba_gate_kernel(xz_ref, halo_ref, cw_ref, cb_ref, wout_ref,
                       v_ref, o_ref, a_ref, s_ref, *, d_inner, n_valid, tm):
    i = pl.program_id(1)

    @pl.when(i == 0)
    def _():
        s_ref[...] = jnp.zeros_like(s_ref)

    xz = xz_ref[0].astype(jnp.float32)                     # (tm, 2D)
    if n_valid % tm != 0:                                  # compiled in only when padded
        row = i * tm + lax.broadcasted_iota(jnp.int32, (tm, 1), 0)
        xz = jnp.where(row < n_valid, xz, 0.0)
    x_in = xz[:, :d_inner]
    z = xz[:, d_inner:]

    # causal depthwise conv over tokens (K = 4); halo = last 3 rows of previous tile.
    halo = halo_ref[0].astype(jnp.float32)                 # (8, 2D)
    prev3 = jnp.where(i > 0, halo[5:8, :d_inner], 0.0)     # (3, D), zeros for first tile
    x_ext = jnp.concatenate([prev3, x_in], axis=0)         # (tm+3, D)
    cw = cw_ref[...]                                       # (4, D) f32
    xc = cb_ref[...]                                       # (1, D) -> broadcasts
    for j in range(4):
        xc = xc + x_ext[j:j + tm, :] * cw[j:j + 1, :]

    # SiLU gating (kept in f32: no bf16 VPU/EUP on v5e)
    q = xc * jax.nn.sigmoid(xc)
    k = z * jax.nn.sigmoid(z)
    v = q * k
    qb = q.astype(jnp.bfloat16)
    kb = k.astype(jnp.bfloat16)
    vb = v.astype(jnp.bfloat16)

    v_ref[0] = vb
    o_ref[0] = jnp.dot(vb, wout_ref[...],
                       preferred_element_type=jnp.float32).astype(o_ref.dtype)

    # channel-channel logits: S += q^T @ k   (contraction over the token axis)
    s_ref[...] += lax.dot_general(qb, kb, (((0,), (0,)), ((), ())),
                                  preferred_element_type=jnp.float32)

    @pl.when(i == pl.num_programs(1) - 1)
    def _():
        s = s_ref[...]
        m = jnp.max(s, axis=-1, keepdims=True)
        p = jnp.exp(s - m)
        a = p * pl.reciprocal(jnp.sum(p, axis=-1, keepdims=True), approx=True)
        a_ref[0] = a.astype(a_ref.dtype)


def mamba_gate(xz, conv_w, conv_b, w_out, d_inner, n_valid, tm):
    """Returns v (B,Np,D) bf16, out_seq (B,Np,C) bf16, attn=softmax(q^T k) (B,D,D) bf16.

    TODO(synk): the reference Mamba(d_model=dim, bimamba_type='v3', nslices=...) (selective
    scan + dt_proj forward hooks) is an external module whose source is not provided; this
    surrogate reproduces only its interface — out:(B,N,C), q/k/v:(B,N,2C) — via a gated
    causal depthwise conv, not the SSM recurrence.
    """
    B, Np, K2 = xz.shape
    D = d_inner
    C = w_out.shape[1]
    hb = tm // 8
    kernel = functools.partial(_mamba_gate_kernel, d_inner=D, n_valid=n_valid, tm=tm)
    return pl.pallas_call(
        kernel,
        out_shape=(jax.ShapeDtypeStruct((B, Np, D), jnp.bfloat16),
                   jax.ShapeDtypeStruct((B, Np, C), jnp.bfloat16),
                   jax.ShapeDtypeStruct((B, D, D), jnp.bfloat16)),
        grid=(B, Np // tm),
        in_specs=[pl.BlockSpec((1, tm, K2), lambda b, i: (b, i, 0)),
                  pl.BlockSpec((1, 8, K2),
                               lambda b, i: (b, jnp.maximum(i * hb - 1, 0), 0)),
                  pl.BlockSpec((4, D), lambda b, i: (0, 0)),
                  pl.BlockSpec((1, D), lambda b, i: (0, 0)),
                  pl.BlockSpec((D, C), lambda b, i: (0, 0))],
        out_specs=(pl.BlockSpec((1, tm, D), lambda b, i: (b, i, 0)),
                   pl.BlockSpec((1, tm, C), lambda b, i: (b, i, 0)),
                   pl.BlockSpec((1, D, D), lambda b, i: (b, 0, 0))),
        scratch_shapes=[pltpu.VMEM((D, D), jnp.float32)],
        compiler_params=_compiler_params(("parallel", "arbitrary")),
    )(xz, xz, conv_w.T.astype(jnp.float32),
      conv_b.reshape(1, D).astype(jnp.float32), w_out.astype(jnp.bfloat16))


# ------------------- kernel 3: apply channel attention: out_a = v @ attn^T -------------------

def _attn_apply_kernel(v_ref, a_ref, o_ref):
    o_ref[0] = lax.dot_general(v_ref[0], a_ref[0], (((1,), (1,)), ((), ())),
                               preferred_element_type=jnp.float32).astype(o_ref.dtype)


def attn_apply(v, attn, tm):
    B, Np, D = v.shape
    return pl.pallas_call(
        _attn_apply_kernel,
        out_shape=jax.ShapeDtypeStruct((B, Np, D), jnp.bfloat16),
        grid=(B, Np // tm),
        in_specs=[pl.BlockSpec((1, tm, D), lambda b, i: (b, i, 0)),
                  pl.BlockSpec((1, D, D), lambda b, i: (b, 0, 0))],
        out_specs=pl.BlockSpec((1, tm, D), lambda b, i: (b, i, 0)),
        compiler_params=_compiler_params(("parallel", "parallel")),
    )(v, attn)


# ------------------- kernel 4: 3x3x3 conv via in-kernel 27-tap accumulation -------------------

def _conv3d_tap_kernel(p0_ref, p1_ref, p2_ref, w_ref, b_ref, o_ref, *, n_w, zp):
    pout = n_w * zp
    planes = (p0_ref[0, 0], p1_ref[0, 0], p2_ref[0, 0])    # three (Cin, P) bf16 h-planes
    cout = w_ref.shape[1]
    acc = jnp.zeros((cout, pout), jnp.float32)
    for dh in range(3):
        plane = planes[dh]
        for dw in range(3):
            for dz in range(3):
                s = dw * zp + dz
                t = dh * 9 + dw * 3 + dz
                acc = acc + jnp.dot(w_ref[t], plane[:, s:s + pout],
                                    preferred_element_type=jnp.float32)
    o_ref[0, 0] = (acc + b_ref[...]).astype(o_ref.dtype)


def fusion_conv3d(x_hm, w, b, out_dtype=jnp.bfloat16):
    """3x3x3 / stride 1 / padding 1 Conv3d (PyTorch semantics), no HBM im2col.

    x_hm: (B, H, Cin, W, Z)  ->  (B, H, Cout, W, Z).
    Grid (B, H); each step reads the 3 halo'd padded h-planes (3 shifted BlockSpecs on the
    same array) and accumulates all 27 taps in f32 before one lane-dense plane store.
    """
    B, H, Cin, W, Z = x_hm.shape
    Cout = w.shape[0]
    Hp, Wp, Zp = H + 2, W + 3, Z + 3        # extra right pad gives slack for shifted slices
    P = Wp * Zp
    Pout = W * Zp

    xp = jnp.pad(x_hm.astype(jnp.bfloat16),
                 ((0, 0), (1, 1), (0, 0), (1, 2), (1, 2))).reshape(B, Hp, Cin, P)
    w27 = w.transpose(2, 3, 4, 0, 1).reshape(27, Cout, Cin).astype(jnp.bfloat16)
    b2d = b.reshape(Cout, 1).astype(jnp.float32)

    def plane_spec(dh):
        return pl.BlockSpec((1, 1, Cin, P), lambda bi, h, _dh=dh: (bi, h + _dh, 0, 0))

    out = pl.pallas_call(
        functools.partial(_conv3d_tap_kernel, n_w=W, zp=Zp),
        out_shape=jax.ShapeDtypeStruct((B, H, Cout, Pout), out_dtype),
        grid=(B, H),
        in_specs=[plane_spec(0), plane_spec(1), plane_spec(2),
                  pl.BlockSpec((27, Cout, Cin), lambda bi, h: (0, 0, 0)),
                  pl.BlockSpec((Cout, 1), lambda bi, h: (0, 0))],
        out_specs=pl.BlockSpec((1, 1, Cout, Pout), lambda bi, h: (bi, h, 0, 0)),
        compiler_params=_compiler_params(("parallel", "parallel")),
    )(xp, xp, xp, w27, b2d)
    return out.reshape(B, H, Cout, W, Zp)[..., :Z]


# ----------------------------- parameters & forward -----------------------------

def init_params(key, dim, d_conv=4, expand=2):
    d_inner = expand * dim
    ks = jax.random.split(key, 8)
    return {
        "ln_gamma": jnp.ones((dim,), jnp.float32),
        "ln_beta": jnp.zeros((dim,), jnp.float32),
        "w_in": 0.10 * jax.random.normal(ks[0], (dim, 2 * d_inner), jnp.float32),
        "conv_w": 0.10 * jax.random.normal(ks[1], (d_inner, d_conv), jnp.float32),
        "conv_b": 0.05 * jax.random.normal(ks[2], (d_inner,), jnp.float32),
        "w_out": 0.10 * jax.random.normal(ks[3], (d_inner, dim), jnp.float32),
        "fus1_w": 0.05 * jax.random.normal(ks[4], (dim, 2 * dim, 3, 3, 3), jnp.float32),
        "fus1_b": 0.05 * jax.random.normal(ks[5], (dim,), jnp.float32),
        "fus2_w": 0.05 * jax.random.normal(ks[6], (dim, 2 * dim, 3, 3, 3), jnp.float32),
        "fus2_b": 0.05 * jax.random.normal(ks[7], (dim,), jnp.float32),
    }


def mfa_block_forward(x, params, dim, expand=2):
    # x: (B, C=dim, H, W, Z) f32, channel-first at the module boundary.
    B, C, H, W, Z = x.shape
    assert C == dim
    N = H * W * Z
    D = expand * dim                 # d_inner == 2*dim == attention channel width
    tm = _pick_token_tile(N)
    Np = _round_up(N, tm)

    # single layout change to token-major (B, Np, C)
    x_tok = x.reshape(B, C, N).transpose(0, 2, 1)
    if Np != N:
        x_tok = jnp.pad(x_tok, ((0, 0), (0, Np - N), (0, 0)))

    # fused LayerNorm + input projection  -> xz = [x_in | z]
    xz = ln_input_proj(x_tok, params["ln_gamma"], params["ln_beta"],
                       params["w_in"], tm)                               # (B, Np, 2D) bf16

    # Mamba surrogate + SiLU gating + out-projection + channel-attention softmax
    v, out_seq, attn = mamba_gate(xz, params["conv_w"], params["conv_b"],
                                  params["w_out"], D, N, tm)

    # out_a = v @ attn^T  (channel attention applied to every token)
    out_a = attn_apply(v, attn, tm)                                      # (B, Np, D) bf16

    if Np != N:
        out_a = out_a[:, :N, :]
        out_seq = out_seq[:, :N, :]

    # reference: out_a.view(B, -1, H, W, Z) == raw row-major reinterpretation
    out_a_cf = out_a.reshape(B, D, H, W, Z)                              # (B, 2C, H, W, Z)
    conv1_in = out_a_cf.transpose(0, 2, 1, 3, 4)                         # (B, H, 2C, W, Z)
    o1 = fusion_conv3d(conv1_in, params["fus1_w"], params["fus1_b"],
                       out_dtype=jnp.bfloat16)                           # (B, H, C, W, Z)

    # out_m = out.transpose(-1, -2).reshape(B, C, H, W, Z), kept in H-major layout here
    om = out_seq.reshape(B, H, W, Z, C).transpose(0, 1, 4, 2, 3)         # (B, H, C, W, Z)

    cat = jnp.concatenate([o1, om.astype(jnp.bfloat16)], axis=2)         # (B, H, 2C, W, Z)
    o2 = fusion_conv3d(cat, params["fus2_w"], params["fus2_b"],
                       out_dtype=jnp.float32)                            # (B, H, C, W, Z)

    return o2.transpose(0, 2, 1, 3, 4) + x                               # + residual


if __name__ == "__main__":
    dim = 8
    B, H, W, Z = 2, 4, 4, 4

    key = jax.random.PRNGKey(0)
    kx, kp = jax.random.split(key)
    x = jax.random.normal(kx, (B, dim, H, W, Z), jnp.float32)
    params = init_params(kp, dim)

    fwd = jax.jit(lambda xx: mfa_block_forward(xx, params, dim))
    out = jax.block_until_ready(fwd(x))
    assert out.shape == (B, dim, H, W, Z)
    assert bool(jnp.all(jnp.isfinite(out)))
    print("KERNEL_OK")
</pallas_src>

<mosaic_0001>
module attributes {stable_mosaic.version = 11 : i64} {
  func.func @_attn_apply_kernel(%arg0: i32, %arg1: i32, %arg2: memref<1x64x16xbf16, #tpu.memory_space<vmem>>, %arg3: memref<1x16x16xbf16, #tpu.memory_space<vmem>>, %arg4: memref<1x64x16xbf16, #tpu.memory_space<vmem>>) attributes {dimension_semantics = [#tpu.dimension_semantics<parallel>, #tpu.dimension_semantics<parallel>], iteration_bounds = array<i64: 2, 1>, scalar_prefetch = 0 : i64, scratch_operands = 0 : i64, tpu.core_type = #tpu.core_type<tc>, window_params = [{transform_indices = @transform_0, window_bounds = array<i64: 1, 64, 16>}, {transform_indices = @transform_1, window_bounds = array<i64: 1, 16, 16>}, {transform_indices = @transform_2, window_bounds = array<i64: 1, 64, 16>}]} {
    %c0 = arith.constant 0 : index
    %c0_0 = arith.constant 0 : index
    %c0_1 = arith.constant 0 : index
    %0 = vector.load %arg2[%c0, %c0_0, %c0_1] : memref<1x64x16xbf16, #tpu.memory_space<vmem>>, vector<1x64x16xbf16>
    %1 = vector.shape_cast %0 : vector<1x64x16xbf16> to vector<64x16xbf16>
    %c0_2 = arith.constant 0 : index
    %c0_3 = arith.constant 0 : index
    %c0_4 = arith.constant 0 : index
    %2 = vector.load %arg3[%c0_2, %c0_3, %c0_4] : memref<1x16x16xbf16, #tpu.memory_space<vmem>>, vector<1x16x16xbf16>
    %3 = vector.shape_cast %2 : vector<1x16x16xbf16> to vector<16x16xbf16>
    %cst = arith.constant dense<0.000000e+00> : vector<64x16xf32>
    %4 = tpu.matmul %1, %3, %cst {dimension_numbers = #tpu.dot_dimension_numbers<[1], [1], [0], [0], [0, 0, 1, 0], [], []>} : vector<64x16xbf16>, vector<16x16xbf16>, vector<64x16xf32> -> vector<64x16xf32>
    %5 = arith.truncf %4 : vector<64x16xf32> to vector<64x16xbf16>
    %c0_5 = arith.constant 0 : index
    %c0_6 = arith.constant 0 : index
    %c0_7 = arith.constant 0 : index
    %6 = vector.load %arg4[%c0_5, %c0_6, %c0_7] : memref<1x64x16xbf16, #tpu.memory_space<vmem>>, vector<1x64x16xbf16>
    %7 = vector.shape_cast %6 : vector<1x64x16xbf16> to vector<64x16xbf16>
    %8 = vector.shape_cast %5 : vector<64x16xbf16> to vector<1x64x16xbf16>
    tpu.vector_store %arg4[%c0_5, %c0_6, %c0_7], %8 {strides = array<i32>} : memref<1x64x16xbf16, #tpu.memory_space<vmem>>, vector<1x64x16xbf16>,
    return
  }
  func.func @transform_0(%arg0: i32, %arg1: i32) -> (i32, i32, i32) {
    %c0_i32 = arith.constant 0 : i32
    %c0_i32_0 = arith.constant 0 : i32
    return %arg0, %arg1, %c0_i32 : i32, i32, i32
  }
  func.func @transform_1(%arg0: i32, %arg1: i32) -> (i32, i32, i32) {
    %c0_i32 = arith.constant 0 : i32
    %c0_i32_0 = arith.constant 0 : i32
    %c0_i32_1 = arith.constant 0 : i32
    return %arg0, %c0_i32, %c0_i32_0 : i32, i32, i32
  }
  func.func @transform_2(%arg0: i32, %arg1: i32) -> (i32, i32, i32) {
    %c0_i32 = arith.constant 0 : i32
    %c0_i32_0 = arith.constant 0 : i32
    return %arg0, %arg1, %c0_i32 : i32, i32, i32
  }
}

module attributes {stable_mosaic.version = 11 : i64} {
  func.func @_ln_proj_kernel(%arg0: i32, %arg1: i32, %arg2: memref<1x64x8xf32, #tpu.memory_space<vmem>>, %arg3: memref<1x8xf32, #tpu.memory_space<vmem>>, %arg4: memref<1x8xf32, #tpu.memory_space<vmem>>, %arg5: memref<8x32xbf16, #tpu.memory_space<vmem>>, %arg6: memref<1x64x32xbf16, #tpu.memory_space<vmem>>) attributes {dimension_semantics = [#tpu.dimension_semantics<parallel>, #tpu.dimension_semantics<parallel>], iteration_bounds = array<i64: 2, 1>, scalar_prefetch = 0 : i64, scratch_operands = 0 : i64, tpu.core_type = #tpu.core_type<tc>, window_params = [{transform_indices = @transform_0, window_bounds = array<i64: 1, 64, 8>}, {pipeline_mode = #tpu.pipeline_mode<synchronous>, transform_indices = @transform_1, window_bounds = array<i64: 1, 8>}, {pipeline_mode = #tpu.pipeline_mode<synchronous>, transform_indices = @transform_2, window_bounds = array<i64: 1, 8>}, {pipeline_mode = #tpu.pipeline_mode<synchronous>, transform_indices = @transform_3, window_bounds = array<i64: 8, 32>}, {transform_indices = @transform_4, window_bounds = array<i64: 1, 64, 32>}]} {
    %c0 = arith.constant 0 : index
    %c0_0 = arith.constant 0 : index
    %c0_1 = arith.constant 0 : index
    %0 = vector.load %arg2[%c0, %c0_0, %c0_1] : memref<1x64x8xf32, #tpu.memory_space<vmem>>, vector<1x64x8xf32>
    %1 = vector.shape_cast %0 : vector<1x64x8xf32> to vector<64x8xf32>
    %cst = arith.constant dense<0.000000e+00> : vector<64xf32>
    %2 = vector.multi_reduction <add>, %1, %cst [1] : vector<64x8xf32> to vector<64xf32>
    %3 = vector.shape_cast %2 : vector<64xf32> to vector<64x1xf32>
    %cst_2 = arith.constant 8.000000e+00 : f32
    %4 = vector.broadcast %cst_2 : f32 to vector<64x1xf32>
    %5 = arith.divf %3, %4 : vector<64x1xf32>
    %6 = vector.broadcast %5 : vector<64x1xf32> to vector<64x8xf32>
    %7 = arith.subf %1, %6 : vector<64x8xf32>
    %8 = arith.mulf %7, %7 : vector<64x8xf32>
    %cst_3 = arith.constant dense<0.000000e+00> : vector<64xf32>
    %9 = vector.multi_reduction <add>, %8, %cst_3 [1] : vector<64x8xf32> to vector<64xf32>
    %10 = vector.shape_cast %9 : vector<64xf32> to vector<64x1xf32>
    %cst_4 = arith.constant 8.000000e+00 : f32
    %11 = vector.broadcast %cst_4 : f32 to vector<64x1xf32>
    %12 = arith.divf %10, %11 : vector<64x1xf32>
    %13 = vector.broadcast %5 : vector<64x1xf32> to vector<64x8xf32>
    %14 = arith.subf %1, %13 : vector<64x8xf32>
    %cst_5 = arith.constant 9.99999974E-6 : f32
    %15 = vector.broadcast %cst_5 : f32 to vector<64x1xf32>
    %16 = arith.addf %12, %15 : vector<64x1xf32>
    %17 = math.rsqrt %16 : vector<64x1xf32>
    %18 = vector.broadcast %17 : vector<64x1xf32> to vector<64x8xf32>
    %19 = arith.mulf %14, %18 : vector<64x8xf32>
    %c0_6 = arith.constant 0 : index
    %c0_7 = arith.constant 0 : index
    %20 = vector.load %arg3[%c0_6, %c0_7] : memref<1x8xf32, #tpu.memory_space<vmem>>, vector<1x8xf32>
    %21 = vector.broadcast %20 : vector<1x8xf32> to vector<64x8xf32>
    %22 = arith.mulf %19, %21 : vector<64x8xf32>
    %c0_8 = arith.constant 0 : index
    %c0_9 = arith.constant 0 : index
    %23 = vector.load %arg4[%c0_8, %c0_9] : memref<1x8xf32, #tpu.memory_space<vmem>>, vector<1x8xf32>
    %24 = vector.broadcast %23 : vector<1x8xf32> to vector<64x8xf32>
    %25 = arith.addf %22, %24 : vector<64x8xf32>
    %26 = arith.truncf %25 : vector<64x8xf32> to vector<64x8xbf16>
    %c0_10 = arith.constant 0 : index
    %c0_11 = arith.constant 0 : index
    %27 = vector.load %arg5[%c0_10, %c0_11] : memref<8x32xbf16, #tpu.memory_space<vmem>>, vector<8x32xbf16>
    %cst_12 = arith.constant dense<0.000000e+00> : vector<64x32xf32>
    %28 = tpu.matmul %26, %27, %cst_12 {dimension_numbers = #tpu.dot_dimension_numbers<[1], [0], [0], [1], [0, 0, 1, 1], [], []>} : vector<64x8xbf16>, vector<8x32xbf16>, vector<64x32xf32> -> vector<64x32xf32>
    %29 = arith.truncf %28 : vector<64x32xf32> to vector<64x32xbf16>
    %c0_13 = arith.constant 0 : index
    %c0_14 = arith.constant 0 : index
    %c0_15 = arith.constant 0 : index
    %30 = vector.load %arg6[%c0_13, %c0_14, %c0_15] : memref<1x64x32xbf16, #tpu.memory_space<vmem>>, vector<1x64x32xbf16>
    %31 = vector.shape_cast %30 : vector<1x64x32xbf16> to vector<64x32xbf16>
    %32 = vector.shape_cast %29 : vector<64x32xbf16> to vector<1x64x32xbf16>
    tpu.vector_store %arg6[%c0_13, %c0_14, %c0_15], %32 {strides = array<i32>} : memref<1x64x32xbf16, #tpu.memory_space<vmem>>, vector<1x64x32xbf16>,
    return
  }
  func.func @transform_0(%arg0: i32, %arg1: i32) -> (i32, i32, i32) {
    %c0_i32 = arith.constant 0 : i32
    %c0_i32_0 = arith.constant 0 : i32
    return %arg0, %arg1, %c0_i32 : i32, i32, i32
  }
  func.func @transform_1(%arg0: i32, %arg1: i32) -> (i32, i32) {
    %c0_i32 = arith.constant 0 : i32
    %c0_i32_0 = arith.constant 0 : i32
    %c0_i32_1 = arith.constant 0 : i32
    return %c0_i32, %c0_i32_0 : i32, i32
  }
  func.func @transform_2(%arg0: i32, %arg1: i32) -> (i32, i32) {
    %c0_i32 = arith.constant 0 : i32
    %c0_i32_0 = arith.constant 0 : i32
    %c0_i32_1 = arith.constant 0 : i32
    return %c0_i32, %c0_i32_0 : i32, i32
  }
  func.func @transform_3(%arg0: i32, %arg1: i32) -> (i32, i32) {
    %c0_i32 = arith.constant 0 : i32
    %c0_i32_0 = arith.constant 0 : i32
    %c0_i32_1 = arith.constant 0 : i32
    return %c0_i32, %c0_i32_0 : i32, i32
  }
  func.func @transform_4(%arg0: i32, %arg1: i32) -> (i32, i32, i32) {
    %c0_i32 = arith.constant 0 : i32
    %c0_i32_0 = arith.constant 0 : i32
    return %arg0, %arg1, %c0_i32 : i32, i32, i32
  }
}

module attributes {stable_mosaic.version = 11 : i64} {
  func.func @_mamba_gate_kernel(%arg0: i32, %arg1: i32, %arg2: memref<1x64x32xbf16, #tpu.memory_space<vmem>>, %arg3: memref<1x8x32xbf16, #tpu.memory_space<vmem>>, %arg4: memref<4x16xf32, #tpu.memory_space<vmem>>, %arg5: memref<1x16xf32, #tpu.memory_space<vmem>>, %arg6: memref<16x8xbf16, #tpu.memory_space<vmem>>, %arg7: memref<1x64x16xbf16, #tpu.memory_space<vmem>>, %arg8: memref<1x64x8xbf16, #tpu.memory_space<vmem>>, %arg9: memref<1x16x16xbf16, #tpu.memory_space<vmem>>, %arg10: memref<16x16xf32, #tpu.memory_space<vmem>>) attributes {dimension_semantics = [#tpu.dimension_semantics<parallel>, #tpu.dimension_semantics<arbitrary>], iteration_bounds = array<i64: 2, 1>, scalar_prefetch = 0 : i64, scratch_operands = 1 : i64, tpu.core_type = #tpu.core_type<tc>, window_params = [{transform_indices = @transform_0, window_bounds = array<i64: 1, 64, 32>}, {transform_indices = @transform_1, window_bounds = array<i64: 1, 8, 32>}, {pipeline_mode = #tpu.pipeline_mode<synchronous>, transform_indices = @transform_2, window_bounds = array<i64: 4, 16>}, {pipeline_mode = #tpu.pipeline_mode<synchronous>, transform_indices = @transform_3, window_bounds = array<i64: 1, 16>}, {pipeline_mode = #tpu.pipeline_mode<synchronous>, transform_indices = @transform_4, window_bounds = array<i64: 16, 8>}, {transform_indices = @transform_5, window_bounds = array<i64: 1, 64, 16>}, {transform_indices = @transform_6, window_bounds = array<i64: 1, 64, 8>}, {transform_indices = @transform_7, window_bounds = array<i64: 1, 16, 16>}]} {
    %c0_i32 = arith.constant 0 : i32
    %0 = arith.cmpi eq, %arg1, %c0_i32 : i32
    %1 = arith.extui %0 : i1 to i32
    %c0_i32_0 = arith.constant 0 : i32
    %2 = arith.cmpi ne, %1, %c0_i32_0 : i32
    scf.if %2 {
      %cst_29 = arith.constant 0.000000e+00 : f32
      %71 = vector.broadcast %cst_29 : f32 to vector<16x16xf32>
      %c0_30 = arith.constant 0 : index
      %c0_31 = arith.constant 0 : index
      %72 = vector.load %arg10[%c0_30, %c0_31] : memref<16x16xf32, #tpu.memory_space<vmem>>, vector<16x16xf32>
      tpu.vector_store %arg10[%c0_30, %c0_31], %71 {strides = array<i32>} : memref<16x16xf32, #tpu.memory_space<vmem>>, vector<16x16xf32>,
    } else {
    }
    %c0 = arith.constant 0 : index
    %c0_1 = arith.constant 0 : index
    %c0_2 = arith.constant 0 : index
    %3 = vector.load %arg2[%c0, %c0_1, %c0_2] : memref<1x64x32xbf16, #tpu.memory_space<vmem>>, vector<1x64x32xbf16>
    %4 = vector.shape_cast %3 : vector<1x64x32xbf16> to vector<64x32xbf16>
    %5 = arith.extf %4 : vector<64x32xbf16> to vector<64x32xf32>
    %6 = vector.extract_strided_slice %5 {offsets = [0, 0], sizes = [64, 16], strides = [1, 1]} : vector<64x32xf32> to vector<64x16xf32>
    %7 = vector.extract_strided_slice %5 {offsets = [0, 16], sizes = [64, 16], strides = [1, 1]} : vector<64x32xf32> to vector<64x16xf32>
    %c0_3 = arith.constant 0 : index
    %c0_4 = arith.constant 0 : index
    %c0_5 = arith.constant 0 : index
    %8 = vector.load %arg3[%c0_3, %c0_4, %c0_5] : memref<1x8x32xbf16, #tpu.memory_space<vmem>>, vector<1x8x32xbf16>
    %9 = vector.shape_cast %8 : vector<1x8x32xbf16> to vector<8x32xbf16>
    %10 = arith.extf %9 : vector<8x32xbf16> to vector<8x32xf32>
    %c0_i32_6 = arith.constant 0 : i32
    %11 = arith.cmpi sgt, %arg1, %c0_i32_6 : i32
    %12 = vector.extract_strided_slice %10 {offsets = [5, 0], sizes = [3, 16], strides = [1, 1]} : vector<8x32xf32> to vector<3x16xf32>
    %cst = arith.constant 0.000000e+00 : f32
    %13 = vector.broadcast %cst : f32 to vector<3x16xf32>
    %14 = arith.select %11, %12, %13 : vector<3x16xf32>
    %15 = tpu.concatenate %14, %6 in 0 : vector<3x16xf32>, vector<64x16xf32> -> vector<67x16xf32>
    %c0_7 = arith.constant 0 : index
    %c0_8 = arith.constant 0 : index
    %16 = vector.load %arg4[%c0_7, %c0_8] : memref<4x16xf32, #tpu.memory_space<vmem>>, vector<4x16xf32>
    %c0_9 = arith.constant 0 : index
    %c0_10 = arith.constant 0 : index
    %17 = vector.load %arg5[%c0_9, %c0_10] : memref<1x16xf32, #tpu.memory_space<vmem>>, vector<1x16xf32>
    %18 = vector.extract_strided_slice %15 {offsets = [0, 0], sizes = [64, 16], strides = [1, 1]} : vector<67x16xf32> to vector<64x16xf32>
    %19 = vector.extract_strided_slice %16 {offsets = [0, 0], sizes = [1, 16], strides = [1, 1]} : vector<4x16xf32> to vector<1x16xf32>
    %20 = vector.broadcast %19 : vector<1x16xf32> to vector<64x16xf32>
    %21 = arith.mulf %18, %20 : vector<64x16xf32>
    %22 = vector.broadcast %17 : vector<1x16xf32> to vector<64x16xf32>
    %23 = arith.addf %22, %21 : vector<64x16xf32>
    %24 = vector.extract_strided_slice %15 {offsets = [1, 0], sizes = [64, 16], strides = [1, 1]} : vector<67x16xf32> to vector<64x16xf32>
    %25 = vector.extract_strided_slice %16 {offsets = [1, 0], sizes = [1, 16], strides = [1, 1]} : vector<4x16xf32> to vector<1x16xf32>
    %26 = vector.broadcast %25 : vector<1x16xf32> to vector<64x16xf32>
    %27 = arith.mulf %24, %26 : vector<64x16xf32>
    %28 = arith.addf %23, %27 : vector<64x16xf32>
    %29 = vector.extract_strided_slice %15 {offsets = [2, 0], sizes = [64, 16], strides = [1, 1]} : vector<67x16xf32> to vector<64x16xf32>
    %30 = vector.extract_strided_slice %16 {offsets = [2, 0], sizes = [1, 16], strides = [1, 1]} : vector<4x16xf32> to vector<1x16xf32>
    %31 = vector.broadcast %30 : vector<1x16xf32> to vector<64x16xf32>
    %32 = arith.mulf %29, %31 : vector<64x16xf32>
    %33 = arith.addf %28, %32 : vector<64x16xf32>
    %34 = vector.extract_strided_slice %15 {offsets = [3, 0], sizes = [64, 16], strides = [1, 1]} : vector<67x16xf32> to vector<64x16xf32>
    %35 = vector.extract_strided_slice %16 {offsets = [3, 0], sizes = [1, 16], strides = [1, 1]} : vector<4x16xf32> to vector<1x16xf32>
    %36 = vector.broadcast %35 : vector<1x16xf32> to vector<64x16xf32>
    %37 = arith.mulf %34, %36 : vector<64x16xf32>
    %38 = arith.addf %33, %37 : vector<64x16xf32>
    %39 = arith.negf %38 : vector<64x16xf32>
    %40 = math.exp %39 : vector<64x16xf32>
    %cst_11 = arith.constant 1.000000e+00 : f32
    %41 = vector.broadcast %cst_11 : f32 to vector<64x16xf32>
    %42 = arith.addf %41, %40 : vector<64x16xf32>
    %43 = arith.divf %41, %42 : vector<64x16xf32>
    %44 = arith.mulf %38, %43 : vector<64x16xf32>
    %45 = arith.negf %7 : vector<64x16xf32>
    %46 = math.exp %45 : vector<64x16xf32>
    %cst_12 = arith.constant 1.000000e+00 : f32
    %47 = vector.broadcast %cst_12 : f32 to vector<64x16xf32>
    %48 = arith.addf %47, %46 : vector<64x16xf32>
    %49 = arith.divf %47, %48 : vector<64x16xf32>
    %50 = arith.mulf %7, %49 : vector<64x16xf32>
    %51 = arith.mulf %44, %50 : vector<64x16xf32>
    %52 = arith.truncf %44 : vector<64x16xf32> to vector<64x16xbf16>
    %53 = arith.truncf %50 : vector<64x16xf32> to vector<64x16xbf16>
    %54 = arith.truncf %51 : vector<64x16xf32> to vector<64x16xbf16>
    %c0_13 = arith.constant 0 : index
    %c0_14 = arith.constant 0 : index
    %c0_15 = arith.constant 0 : index
    %55 = vector.load %arg7[%c0_13, %c0_14, %c0_15] : memref<1x64x16xbf16, #tpu.memory_space<vmem>>, vector<1x64x16xbf16>
    %56 = vector.shape_cast %55 : vector<1x64x16xbf16> to vector<64x16xbf16>
    %57 = vector.shape_cast %54 : vector<64x16xbf16> to vector<1x64x16xbf16>
    tpu.vector_store %arg7[%c0_13, %c0_14, %c0_15], %57 {strides = array<i32>} : memref<1x64x16xbf16, #tpu.memory_space<vmem>>, vector<1x64x16xbf16>,
    %c0_16 = arith.constant 0 : index
    %c0_17 = arith.constant 0 : index
    %58 = vector.load %arg6[%c0_16, %c0_17] : memref<16x8xbf16, #tpu.memory_space<vmem>>, vector<16x8xbf16>
    %cst_18 = arith.constant dense<0.000000e+00> : vector<64x8xf32>
    %59 = tpu.matmul %54, %58, %cst_18 {dimension_numbers = #tpu.dot_dimension_numbers<[1], [0], [0], [1], [0, 0, 1, 1], [], []>} : vector<64x16xbf16>, vector<16x8xbf16>, vector<64x8xf32> -> vector<64x8xf32>
    %60 = arith.truncf %59 : vector<64x8xf32> to vector<64x8xbf16>
    %c0_19 = arith.constant 0 : index
    %c0_20 = arith.constant 0 : index
    %c0_21 = arith.constant 0 : index
    %61 = vector.load %arg8[%c0_19, %c0_20, %c0_21] : memref<1x64x8xbf16, #tpu.memory_space<vmem>>, vector<1x64x8xbf16>
    %62 = vector.shape_cast %61 : vector<1x64x8xbf16> to vector<64x8xbf16>
    %63 = vector.shape_cast %60 : vector<64x8xbf16> to vector<1x64x8xbf16>
    tpu.vector_store %arg8[%c0_19, %c0_20, %c0_21], %63 {strides = array<i32>} : memref<1x64x8xbf16, #tpu.memory_space<vmem>>, vector<1x64x8xbf16>,
    %c0_22 = arith.constant 0 : index
    %c0_23 = arith.constant 0 : index
    %64 = vector.load %arg10[%c0_22, %c0_23] : memref<16x16xf32, #tpu.memory_space<vmem>>, vector<16x16xf32>
    %cst_24 = arith.constant dense<0.000000e+00> : vector<16x16xf32>
    %65 = tpu.matmul %52, %53, %cst_24 {dimension_numbers = #tpu.dot_dimension_numbers<[0], [0], [1], [1], [0, 1, 1, 1], [], []>} : vector<64x16xbf16>, vector<64x16xbf16>, vector<16x16xf32> -> vector<16x16xf32>
    %66 = arith.addf %64, %65 : vector<16x16xf32>
    %c0_25 = arith.constant 0 : index
    %c0_26 = arith.constant 0 : index
    %67 = vector.load %arg10[%c0_25, %c0_26] : memref<16x16xf32, #tpu.memory_space<vmem>>, vector<16x16xf32>
    tpu.vector_store %arg10[%c0_25, %c0_26], %66 {strides = array<i32>} : memref<16x16xf32, #tpu.memory_space<vmem>>, vector<16x16xf32>,
    %c0_i32_27 = arith.constant 0 : i32
    %68 = arith.cmpi eq, %arg1, %c0_i32_27 : i32
    %69 = arith.extui %68 : i1 to i32
    %c0_i32_28 = arith.constant 0 : i32
    %70 = arith.cmpi ne, %69, %c0_i32_28 : i32
    scf.if %70 {
      %c0_29 = arith.constant 0 : index
      %c0_30 = arith.constant 0 : index
      %71 = vector.load %arg10[%c0_29, %c0_30] : memref<16x16xf32, #tpu.memory_space<vmem>>, vector<16x16xf32>
      %cst_31 = arith.constant dense<0xFF800000> : vector<16xf32>
      %72 = vector.multi_reduction <maximumf>, %71, %cst_31 [1] : vector<16x16xf32> to vector<16xf32>
      %73 = vector.shape_cast %72 : vector<16xf32> to vector<16x1xf32>
      %74 = vector.broadcast %73 : vector<16x1xf32> to vector<16x16xf32>
      %75 = arith.subf %71, %74 : vector<16x16xf32>
      %76 = math.exp %75 : vector<16x16xf32>
      %cst_32 = arith.constant dense<0.000000e+00> : vector<16xf32>
      %77 = vector.multi_reduction <add>, %76, %cst_32 [1] : vector<16x16xf32> to vector<16xf32>
      %78 = vector.shape_cast %77 : vector<16xf32> to vector<16x1xf32>
      %79 = tpu.reciprocal %78 {approx = true} : vector<16x1xf32> -> vector<16x1xf32>
      %80 = vector.broadcast %79 : vector<16x1xf32> to vector<16x16xf32>
      %81 = arith.mulf %76, %80 : vector<16x16xf32>
      %82 = arith.truncf %81 : vector<16x16xf32> to vector<16x16xbf16>
      %c0_33 = arith.constant 0 : index
      %c0_34 = arith.constant 0 : index
      %c0_35 = arith.constant 0 : index
      %83 = vector.load %arg9[%c0_33, %c0_34, %c0_35] : memref<1x16x16xbf16, #tpu.memory_space<vmem>>, vector<1x16x16xbf16>
      %84 = vector.shape_cast %83 : vector<1x16x16xbf16> to vector<16x16xbf16>
      %85 = vector.shape_cast %82 : vector<16x16xbf16> to vector<1x16x16xbf16>
      tpu.vector_store %arg9[%c0_33, %c0_34, %c0_35], %85 {strides = array<i32>} : memref<1x16x16xbf16, #tpu.memory_space<vmem>>, vector<1x16x16xbf16>,
    } else {
    }
    return
  }
  func.func @transform_0(%arg0: i32, %arg1: i32) -> (i32, i32, i32) {
    %c0_i32 = arith.constant 0 : i32
    %c0_i32_0 = arith.constant 0 : i32
    return %arg0, %arg1, %c0_i32 : i32, i32, i32
  }
  func.func @transform_1(%arg0: i32, %arg1: i32) -> (i32, i32, i32) {
    %c8_i32 = arith.constant 8 : i32
    %0 = arith.muli %arg1, %c8_i32 : i32
    %c1_i32 = arith.constant 1 : i32
    %1 = arith.subi %0, %c1_i32 : i32
    %c0_i32 = arith.constant 0 : i32
    %2 = arith.maxsi %1, %c0_i32 : i32
    %c0_i32_0 = arith.constant 0 : i32
    %c0_i32_1 = arith.constant 0 : i32
    return %arg0, %2, %c0_i32_0 : i32, i32, i32
  }
  func.func @transform_2(%arg0: i32, %arg1: i32) -> (i32, i32) {
    %c0_i32 = arith.constant 0 : i32
    %c0_i32_0 = arith.constant 0 : i32
    %c0_i32_1 = arith.constant 0 : i32
    return %c0_i32, %c0_i32_0 : i32, i32
  }
  func.func @transform_3(%arg0: i32, %arg1: i32) -> (i32, i32) {
    %c0_i32 = arith.constant 0 : i32
    %c0_i32_0 = arith.constant 0 : i32
    %c0_i32_1 = arith.constant 0 : i32
    return %c0_i32, %c0_i32_0 : i32, i32
  }
  func.func @transform_4(%arg0: i32, %arg1: i32) -> (i32, i32) {
    %c0_i32 = arith.constant 0 : i32
    %c0_i32_0 = arith.constant 0 : i32
    %c0_i32_1 = arith.constant 0 : i32
    return %c0_i32, %c0_i32_0 : i32, i32
  }
  func.func @transform_5(%arg0: i32, %arg1: i32) -> (i32, i32, i32) {
    %c0_i32 = arith.constant 0 : i32
    %c0_i32_0 = arith.constant 0 : i32
    return %arg0, %arg1, %c0_i32 : i32, i32, i32
  }
  func.func @transform_6(%arg0: i32, %arg1: i32) -> (i32, i32, i32) {
    %c0_i32 = arith.constant 0 : i32
    %c0_i32_0 = arith.constant 0 : i32
    return %arg0, %arg1, %c0_i32 : i32, i32, i32
  }
  func.func @transform_7(%arg0: i32, %arg1: i32) -> (i32, i32, i32) {
    %c0_i32 = arith.constant 0 : i32
    %c0_i32_0 = arith.constant 0 : i32
    %c0_i32_1 = arith.constant 0 : i32
    return %arg0, %c0_i32, %c0_i32_0 : i32, i32, i32
  }
}

module attributes {stable_mosaic.version = 11 : i64} {
  func.func @_conv3d_tap_kernel(%arg0: i32, %arg1: i32, %arg2: memref<1x1x16x49xbf16, #tpu.memory_space<vmem>>, %arg3: memref<1x1x16x49xbf16, #tpu.memory_space<vmem>>, %arg4: memref<1x1x16x49xbf16, #tpu.memory_space<vmem>>, %arg5: memref<27x8x16xbf16, #tpu.memory_space<vmem>>, %arg6: memref<8x1xf32, #tpu.memory_space<vmem>>, %arg7: memref<1x1x8x28xbf16, #tpu.memory_space<vmem>>) attributes {dimension_semantics = [#tpu.dimension_semantics<parallel>, #tpu.dimension_semantics<parallel>], iteration_bounds = array<i64: 2, 4>, scalar_prefetch = 0 : i64, scratch_operands = 0 : i64, tpu.core_type = #tpu.core_type<tc>, window_params = [{transform_indices = @transform_0, window_bounds = array<i64: 1, 1, 16, 49>}, {transform_indices = @transform_1, window_bounds = array<i64: 1, 1, 16, 49>}, {transform_indices = @transform_2, window_bounds = array<i64: 1, 1, 16, 49>}, {pipeline_mode = #tpu.pipeline_mode<synchronous>, transform_indices = @transform_3, window_bounds = array<i64: 27, 8, 16>}, {pipeline_mode = #tpu.pipeline_mode<synchronous>, transform_indices = @transform_4, window_bounds = array<i64: 8, 1>}, {transform_indices = @transform_5, window_bounds = array<i64: 1, 1, 8, 28>}]} {
    %c0 = arith.constant 0 : index
    %c0_0 = arith.constant 0 : index
    %c0_1 = arith.constant 0 : index
    %c0_2 = arith.constant 0 : index
    %0 = vector.load %arg2[%c0, %c0_0, %c0_1, %c0_2] : memref<1x1x16x49xbf16, #tpu.memory_space<vmem>>, vector<1x1x16x49xbf16>
    %1 = vector.shape_cast %0 : vector<1x1x16x49xbf16> to vector<16x49xbf16>
    %c0_3 = arith.constant 0 : index
    %c0_4 = arith.constant 0 : index
    %c0_5 = arith.constant 0 : index
    %c0_6 = arith.constant 0 : index
    %2 = vector.load %arg3[%c0_3, %c0_4, %c0_5, %c0_6] : memref<1x1x16x49xbf16, #tpu.memory_space<vmem>>, vector<1x1x16x49xbf16>
    %3 = vector.shape_cast %2 : vector<1x1x16x49xbf16> to vector<16x49xbf16>
    %c0_7 = arith.constant 0 : index
    %c0_8 = arith.constant 0 : index
    %c0_9 = arith.constant 0 : index
    %c0_10 = arith.constant 0 : index
    %4 = vector.load %arg4[%c0_7, %c0_8, %c0_9, %c0_10] : memref<1x1x16x49xbf16, #tpu.memory_space<vmem>>, vector<1x1x16x49xbf16>
    %5 = vector.shape_cast %4 : vector<1x1x16x49xbf16> to vector<16x49xbf16>
    %cst = arith.constant 0.000000e+00 : f32
    %6 = vector.broadcast %cst : f32 to vector<8x28xf32>
    %c0_11 = arith.constant 0 : index
    %c0_12 = arith.constant 0 : index
    %c0_13 = arith.constant 0 : index
    %7 = vector.load %arg5[%c0_11, %c0_12, %c0_13] : memref<27x8x16xbf16, #tpu.memory_space<vmem>>, vector<1x8x16xbf16>
    %8 = vector.shape_cast %7 : vector<1x8x16xbf16> to vector<8x16xbf16>
    %9 = vector.extract_strided_slice %1 {offsets = [0, 0], sizes = [16, 28], strides = [1, 1]} : vector<16x49xbf16> to vector<16x28xbf16>
    %cst_14 = arith.constant dense<0.000000e+00> : vector<8x28xf32>
    %10 = tpu.matmul %8, %9, %cst_14 {dimension_numbers = #tpu.dot_dimension_numbers<[1], [0], [0], [1], [0, 0, 1, 1], [], []>} : vector<8x16xbf16>, vector<16x28xbf16>, vector<8x28xf32> -> vector<8x28xf32>
    %11 = arith.addf %6, %10 : vector<8x28xf32>
    %c1 = arith.constant 1 : index
    %c0_15 = arith.constant 0 : index
    %c0_16 = arith.constant 0 : index
    %12 = vector.load %arg5[%c1, %c0_15, %c0_16] : memref<27x8x16xbf16, #tpu.memory_space<vmem>>, vector<1x8x16xbf16>
    %13 = vector.shape_cast %12 : vector<1x8x16xbf16> to vector<8x16xbf16>
    %14 = vector.extract_strided_slice %1 {offsets = [0, 1], sizes = [16, 28], strides = [1, 1]} : vector<16x49xbf16> to vector<16x28xbf16>
    %cst_17 = arith.constant dense<0.000000e+00> : vector<8x28xf32>
    %15 = tpu.matmul %13, %14, %cst_17 {dimension_numbers = #tpu.dot_dimension_numbers<[1], [0], [0], [1], [0, 0, 1, 1], [], []>} : vector<8x16xbf16>, vector<16x28xbf16>, vector<8x28xf32> -> vector<8x28xf32>
    %16 = arith.addf %11, %15 : vector<8x28xf32>
    %c2 = arith.constant 2 : index
    %c0_18 = arith.constant 0 : index
    %c0_19 = arith.constant 0 : index
    %17 = vector.load %arg5[%c2, %c0_18, %c0_19] : memref<27x8x16xbf16, #tpu.memory_space<vmem>>, vector<1x8x16xbf16>
    %18 = vector.shape_cast %17 : vector<1x8x16xbf16> to vector<8x16xbf16>
    %19 = vector.extract_strided_slice %1 {offsets = [0, 2], sizes = [16, 28], strides = [1, 1]} : vector<16x49xbf16> to vector<16x28xbf16>
    %cst_20 = arith.constant dense<0.000000e+00> : vector<8x28xf32>
    %20 = tpu.matmul %18, %19, %cst_20 {dimension_numbers = #tpu.dot_dimension_numbers<[1], [0], [0], [1], [0, 0, 1, 1], [], []>} : vector<8x16xbf16>, vector<16x28xbf16>, vector<8x28xf32> -> vector<8x28xf32>
    %21 = arith.addf %16, %20 : vector<8x28xf32>
    %c3 = arith.constant 3 : index
    %c0_21 = arith.constant 0 : index
    %c0_22 = arith.constant 0 : index
    %22 = vector.load %arg5[%c3, %c0_21, %c0_22] : memref<27x8x16xbf16, #tpu.memory_space<vmem>>, vector<1x8x16xbf16>
    %23 = vector.shape_cast %22 : vector<1x8x16xbf16> to vector<8x16xbf16>
    %24 = vector.extract_strided_slice %1 {offsets = [0, 7], sizes = [16, 28], strides = [1, 1]} : vector<16x49xbf16> to vector<16x28xbf16>
    %cst_23 = arith.constant dense<0.000000e+00> : vector<8x28xf32>
    %25 = tpu.matmul %23, %24, %cst_23 {dimension_numbers = #tpu.dot_dimension_numbers<[1], [0], [0], [1], [0, 0, 1, 1], [], []>} : vector<8x16xbf16>, vector<16x28xbf16>, vector<8x28xf32> -> vector<8x28xf32>
    %26 = arith.addf %21, %25 : vector<8x28xf32>
    %c4 = arith.constant 4 : index
    %c0_24 = arith.constant 0 : index
    %c0_25 = arith.constant 0 : index
    %27 = vector.load %arg5[%c4, %c0_24, %c0_25] : memref<27x8x16xbf16, #tpu.memory_space<vmem>>, vector<1x8x16xbf16>
    %28 = vector.shape_cast %27 : vector<1x8x16xbf16> to vector<8x16xbf16>
    %29 = vector.extract_strided_slice %1 {offsets = [0, 8], sizes = [16, 28], strides = [1, 1]} : vector<16x49xbf16> to vector<16x28xbf16>
    %cst_26 = arith.constant dense<0.000000e+00> : vector<8x28xf32>
    %30 = tpu.matmul %28, %29, %cst_26 {dimension_numbers = #tpu.dot_dimension_numbers<[1], [0], [0], [1], [0, 0, 1, 1], [], []>} : vector<8x16xbf16>, vector<16x28xbf16>, vector<8x28xf32> -> vector<8x28xf32>
    %31 = arith.addf %26, %30 : vector<8x28xf32>
    %c5 = arith.constant 5 : index
    %c0_27 = arith.constant 0 : index
    %c0_28 = arith.constant 0 : index
    %32 = vector.load %arg5[%c5, %c0_27, %c0_28] : memref<27x8x16xbf16, #tpu.memory_space<vmem>>, vector<1x8x16xbf16>
    %33 = vector.shape_cast %32 : vector<1x8x16xbf16> to vector<8x16xbf16>
    %34 = vector.extract_strided_slice %1 {offsets = [0, 9], sizes = [16, 28], strides = [1, 1]} : vector<16x49xbf16> to vector<16x28xbf16>
    %cst_29 = arith.constant dense<0.000000e+00> : vector<8x28xf32>
    %35 = tpu.matmul %33, %34, %cst_29 {dimension_numbers = #tpu.dot_dimension_numbers<[1], [0], [0], [1], [0, 0, 1, 1], [], []>} : vector<8x16xbf16>, vector<16x28xbf16>, vector<8x28xf32> -> vector<8x28xf32>
    %36 = arith.addf %31, %35 : vector<8x28xf32>
    %c6 = arith.constant 6 : index
    %c0_30 = arith.constant 0 : index
    %c0_31 = arith.constant 0 : index
    %37 = vector.load %arg5[%c6, %c0_30, %c0_31] : memref<27x8x16xbf16, #tpu.memory_space<vmem>>, vector<1x8x16xbf16>
    %38 = vector.shape_cast %37 : vector<1x8x16xbf16> to vector<8x16xbf16>
    %39 = vector.extract_strided_slice %1 {offsets = [0, 14], sizes = [16, 28], strides = [1, 1]} : vector<16x49xbf16> to vector<16x28xbf16>
    %cst_32 = arith.constant dense<0.000000e+00> : vector<8x28xf32>
    %40 = tpu.matmul %38, %39, %cst_32 {dimension_numbers = #tpu.dot_dimension_numbers<[1], [0], [0], [1], [0, 0, 1, 1], [], []>} : vector<8x16xbf16>, vector<16x28xbf16>, vector<8x28xf32> -> vector<8x28xf32>
    %41 = arith.addf %36, %40 : vector<8x28xf32>
    %c7 = arith.constant 7 : index
    %c0_33 = arith.constant 0 : index
    %c0_34 = arith.constant 0 : index
    %42 = vector.load %arg5[%c7, %c0_33, %c0_34] : memref<27x8x16xbf16, #tpu.memory_space<vmem>>, vector<1x8x16xbf16>
    %43 = vector.shape_cast %42 : vector<1x8x16xbf16> to vector<8x16xbf16>
    %44 = vector.extract_strided_slice %1 {offsets = [0, 15], sizes = [16, 28], strides = [1, 1]} : vector<16x49xbf16> to vector<16x28xbf16>
    %cst_35 = arith.constant dense<0.000000e+00> : vector<8x28xf32>
    %45 = tpu.matmul %43, %44, %cst_35 {dimension_numbers = #tpu.dot_dimension_numbers<[1], [0], [0], [1], [0, 0, 1, 1], [], []>} : vector<8x16xbf16>, vector<16x28xbf16>, vector<8x28xf32> -> vector<8x28xf32>
    %46 = arith.addf %41, %45 : vector<8x28xf32>
    %c8 = arith.constant 8 : index
    %c0_36 = arith.constant 0 : index
    %c0_37 = arith.constant 0 : index
    %47 = vector.load %arg5[%c8, %c0_36, %c0_37] : memref<27x8x16xbf16, #tpu.memory_space<vmem>>, vector<1x8x16xbf16>
    %48 = vector.shape_cast %47 : vector<1x8x16xbf16> to vector<8x16xbf16>
    %49 = vector.extract_strided_slice %1 {offsets = [0, 16], sizes = [16, 28], strides = [1, 1]} : vector<16x49xbf16> to vector<16x28xbf16>
    %cst_38 = arith.constant dense<0.000000e+00> : vector<8x28xf32>
    %50 = tpu.matmul %48, %49, %cst_38 {dimension_numbers = #tpu.dot_dimension_numbers<[1], [0], [0], [1], [0, 0, 1, 1], [], []>} : vector<8x16xbf16>, vector<16x28xbf16>, vector<8x28xf32> -> vector<8x28xf32>
    %51 = arith.addf %46, %50 : vector<8x28xf32>
    %c9 = arith.constant 9 : index
    %c0_39 = arith.constant 0 : index
    %c0_40 = arith.constant 0 : index
    %52 = vector.load %arg5[%c9, %c0_39, %c0_40] : memref<27x8x16xbf16, #tpu.memory_space<vmem>>, vector<1x8x16xbf16>
    %53 = vector.shape_cast %52 : vector<1x8x16xbf16> to vector<8x16xbf16>
    %54 = vector.extract_strided_slice %3 {offsets = [0, 0], sizes = [16, 28], strides = [1, 1]} : vector<16x49xbf16> to vector<16x28xbf16>
    %cst_41 = arith.constant dense<0.000000e+00> : vector<8x28xf32>
    %55 = tpu.matmul %53, %54, %cst_41 {dimension_numbers = #tpu.dot_dimension_numbers<[1], [0], [0], [1], [0, 0, 1, 1], [], []>} : vector<8x16xbf16>, vector<16x28xbf16>, vector<8x28xf32> -> vector<8x28xf32>
    %56 = arith.addf %51, %55 : vector<8x28xf32>
    %c10 = arith.constant 10 : index
    %c0_42 = arith.constant 0 : index
    %c0_43 = arith.constant 0 : index
    %57 = vector.load %arg5[%c10, %c0_42, %c0_43] : memref<27x8x16xbf16, #tpu.memory_space<vmem>>, vector<1x8x16xbf16>
    %58 = vector.shape_cast %57 : vector<1x8x16xbf16> to vector<8x16xbf16>
    %59 = vector.extract_strided_slice %3 {offsets = [0, 1], sizes = [16, 28], strides = [1, 1]} : vector<16x49xbf16> to vector<16x28xbf16>
    %cst_44 = arith.constant dense<0.000000e+00> : vector<8x28xf32>
    %60 = tpu.matmul %58, %59, %cst_44 {dimension_numbers = #tpu.dot_dimension_numbers<[1], [0], [0], [1], [0, 0, 1, 1], [], []>} : vector<8x16xbf16>, vector<16x28xbf16>, vector<8x28xf32> -> vector<8x28xf32>
    %61 = arith.addf %56, %60 : vector<8x28xf32>
    %c11 = arith.constant 11 : index
    %c0_45 = arith.constant 0 : index
    %c0_46 = arith.constant 0 : index
    %62 = vector.load %arg5[%c11, %c0_45, %c0_46] : memref<27x8x16xbf16, #tpu.memory_space<vmem>>, vector<1x8x16xbf16>
    %63 = vector.shape_cast %62 : vector<1x8x16xbf16> to vector<8x16xbf16>
    %64 = vector.extract_strided_slice %3 {offsets = [0, 2], sizes = [16, 28], strides = [1, 1]} : vector<16x49xbf16> to vector<16x28xbf16>
    %cst_47 = arith.constant dense<0.000000e+00> : vector<8x28xf32>
    %65 = tpu.matmul %63, %64, %cst_47 {dimension_numbers = #tpu.dot_dimension_numbers<[1], [0], [0], [1], [0, 0, 1, 1], [], []>} : vector<8x16xbf16>, vector<16x28xbf16>, vector<8x28xf32> -> vector<8x28xf32>
    %66 = arith.addf %61, %65 : vector<8x28xf32>
    %c12 = arith.constant 12 : index
    %c0_48 = arith.constant 0 : index
    %c0_49 = arith.constant 0 : index
    %67 = vector.load %arg5[%c12, %c0_48, %c0_49] : memref<27x8x16xbf16, #tpu.memory_space<vmem>>, vector<1x8x16xbf16>
    %68 = vector.shape_cast %67 : vector<1x8x16xbf16> to vector<8x16xbf16>
    %69 = vector.extract_strided_slice %3 {offsets = [0, 7], sizes = [16, 28], strides = [1, 1]} : vector<16x49xbf16> to vector<16x28xbf16>
    %cst_50 = arith.constant dense<0.000000e+00> : vector<8x28xf32>
    %70 = tpu.matmul %68, %69, %cst_50 {dimension_numbers = #tpu.dot_dimension_numbers<[1], [0], [0], [1], [0, 0, 1, 1], [], []>} : vector<8x16xbf16>, vector<16x28xbf16>, vector<8x28xf32> -> vector<8x28xf32>
    %71 = arith.addf %66, %70 : vector<8x28xf32>
    %c13 = arith.constant 13 : index
    %c0_51 = arith.constant 0 : index
    %c0_52 = arith.constant 0 : index
    %72 = vector.load %arg5[%c13, %c0_51, %c0_52] : memref<27x8x16xbf16, #tpu.memory_space<vmem>>, vector<1x8x16xbf16>
    %73 = vector.shape_cast %72 : vector<1x8x16xbf16> to vector<8x16xbf16>
    %74 = vector.extract_strided_slice %3 {offsets = [0, 8], sizes = [16, 28], strides = [1, 1]} : vector<16x49xbf16> to vector<16x28xbf16>
    %cst_53 = arith.constant dense<0.000000e+00> : vector<8x28xf32>
    %75 = tpu.matmul %73, %74, %cst_53 {dimension_numbers = #tpu.dot_dimension_numbers<[1], [0], [0], [1], [0, 0, 1, 1], [], []>} : vector<8x16xbf16>, vector<16x28xbf16>, vector<8x28xf32> -> vector<8x28xf32>
    %76 = arith.addf %71, %75 : vector<8x28xf32>
    %c14 = arith.constant 14 : index
    %c0_54 = arith.constant 0 : index
    %c0_55 = arith.constant 0 : index
    %77 = vector.load %arg5[%c14, %c0_54, %c0_55] : memref<27x8x16xbf16, #tpu.memory_space<vmem>>, vector<1x8x16xbf16>
    %78 = vector.shape_cast %77 : vector<1x8x16xbf16> to vector<8x16xbf16>
    %79 = vector.extract_strided_slice %3 {offsets = [0, 9], sizes = [16, 28], strides = [1, 1]} : vector<16x49xbf16> to vector<16x28xbf16>
    %cst_56 = arith.constant dense<0.000000e+00> : vector<8x28xf32>
    %80 = tpu.matmul %78, %79, %cst_56 {dimension_numbers = #tpu.dot_dimension_numbers<[1], [0], [0], [1], [0, 0, 1, 1], [], []>} : vector<8x16xbf16>, vector<16x28xbf16>, vector<8x28xf32> -> vector<8x28xf32>
    %81 = arith.addf %76, %80 : vector<8x28xf32>
    %c15 = arith.constant 15 : index
    %c0_57 = arith.constant 0 : index
    %c0_58 = arith.constant 0 : index
    %82 = vector.load %arg5[%c15, %c0_57, %c0_58] : memref<27x8x16xbf16, #tpu.memory_space<vmem>>, vector<1x8x16xbf16>
    %83 = vector.shape_cast %82 : vector<1x8x16xbf16> to vector<8x16xbf16>
    %84 = vector.extract_strided_slice %3 {offsets = [0, 14], sizes = [16, 28], strides = [1, 1]} : vector<16x49xbf16> to vector<16x28xbf16>
    %cst_59 = arith.constant dense<0.000000e+00> : vector<8x28xf32>
    %85 = tpu.matmul %83, %84, %cst_59 {dimension_numbers = #tpu.dot_dimension_numbers<[1], [0], [0], [1], [0, 0, 1, 1], [], []>} : vector<8x16xbf16>, vector<16x28xbf16>, vector<8x28xf32> -> vector<8x28xf32>
    %86 = arith.addf %81, %85 : vector<8x28xf32>
    %c16 = arith.constant 16 : index
    %c0_60 = arith.constant 0 : index
    %c0_61 = arith.constant 0 : index
    %87 = vector.load %arg5[%c16, %c0_60, %c0_61] : memref<27x8x16xbf16, #tpu.memory_space<vmem>>, vector<1x8x16xbf16>
    %88 = vector.shape_cast %87 : vector<1x8x16xbf16> to vector<8x16xbf16>
    %89 = vector.extract_strided_slice %3 {offsets = [0, 15], sizes = [16, 28], strides = [1, 1]} : vector<16x49xbf16> to vector<16x28xbf16>
    %cst_62 = arith.constant dense<0.000000e+00> : vector<8x28xf32>
    %90 = tpu.matmul %88, %89, %cst_62 {dimension_numbers = #tpu.dot_dimension_numbers<[1], [0], [0], [1], [0, 0, 1, 1], [], []>} : vector<8x16xbf16>, vector<16x28xbf16>, vector<8x28xf32> -> vector<8x28xf32>
    %91 = arith.addf %86, %90 : vector<8x28xf32>
    %c17 = arith.constant 17 : index
    %c0_63 = arith.constant 0 : index
    %c0_64 = arith.constant 0 : index
    %92 = vector.load %arg5[%c17, %c0_63, %c0_64] : memref<27x8x16xbf16, #tpu.memory_space<vmem>>, vector<1x8x16xbf16>
    %93 = vector.shape_cast %92 : vector<1x8x16xbf16> to vector<8x16xbf16>
    %94 = vector.extract_strided_slice %3 {offsets = [0, 16], sizes = [16, 28], strides = [1, 1]} : vector<16x49xbf16> to vector<16x28xbf16>
    %cst_65 = arith.constant dense<0.000000e+00> : vector<8x28xf32>
    %95 = tpu.matmul %93, %94, %cst_65 {dimension_numbers = #tpu.dot_dimension_numbers<[1], [0], [0], [1], [0, 0, 1, 1], [], []>} : vector<8x16xbf16>, vector<16x28xbf16>, vector<8x28xf32> -> vector<8x28xf32>
    %96 = arith.addf %91, %95 : vector<8x28xf32>
    %c18 = arith.constant 18 : index
    %c0_66 = arith.constant 0 : index
    %c0_67 = arith.constant 0 : index
    %97 = vector.load %arg5[%c18, %c0_66, %c0_67] : memref<27x8x16xbf16, #tpu.memory_space<vmem>>, vector<1x8x16xbf16>
    %98 = vector.shape_cast %97 : vector<1x8x16xbf16> to vector<8x16xbf16>
    %99 = vector.extract_strided_slice %5 {offsets = [0, 0], sizes = [16, 28], strides = [1, 1]} : vector<16x49xbf16> to vector<16x28xbf16>
    %cst_68 = arith.constant dense<0.000000e+00> : vector<8x28xf32>
    %100 = tpu.matmul %98, %99, %cst_68 {dimension_numbers = #tpu.dot_dimension_numbers<[1], [0], [0], [1], [0, 0, 1, 1], [], []>} : vector<8x16xbf16>, vector<16x28xbf16>, vector<8x28xf32> -> vector<8x28xf32>
    %101 = arith.addf %96, %100 : vector<8x28xf32>
    %c19 = arith.constant 19 : index
    %c0_69 = arith.constant 0 : index
    %c0_70 = arith.constant 0 : index
    %102 = vector.load %arg5[%c19, %c0_69, %c0_70] : memref<27x8x16xbf16, #tpu.memory_space<vmem>>, vector<1x8x16xbf16>
    %103 = vector.shape_cast %102 : vector<1x8x16xbf16> to vector<8x16xbf16>
    %104 = vector.extract_strided_slice %5 {offsets = [0, 1], sizes = [16, 28], strides = [1, 1]} : vector<16x49xbf16> to vector<16x28xbf16>
    %cst_71 = arith.constant dense<0.000000e+00> : vector<8x28xf32>
    %105 = tpu.matmul %103, %104, %cst_71 {dimension_numbers = #tpu.dot_dimension_numbers<[1], [0], [0], [1], [0, 0, 1, 1], [], []>} : vector<8x16xbf16>, vector<16x28xbf16>, vector<8x28xf32> -> vector<8x28xf32>
    %106 = arith.addf %101, %105 : vector<8x28xf32>
    %c20 = arith.constant 20 : index
    %c0_72 = arith.constant 0 : index
    %c0_73 = arith.constant 0 : index
    %107 = vector.load %arg5[%c20, %c0_72, %c0_73] : memref<27x8x16xbf16, #tpu.memory_space<vmem>>, vector<1x8x16xbf16>
    %108 = vector.shape_cast %107 : vector<1x8x16xbf16> to vector<8x16xbf16>
    %109 = vector.extract_strided_slice %5 {offsets = [0, 2], sizes = [16, 28], strides = [1, 1]} : vector<16x49xbf16> to vector<16x28xbf16>
    %cst_74 = arith.constant dense<0.000000e+00> : vector<8x28xf32>
    %110 = tpu.matmul %108, %109, %cst_74 {dimension_numbers = #tpu.dot_dimension_numbers<[1], [0], [0], [1], [0, 0, 1, 1], [], []>} : vector<8x16xbf16>, vector<16x28xbf16>, vector<8x28xf32> -> vector<8x28xf32>
    %111 = arith.addf %106, %110 : vector<8x28xf32>
    %c21 = arith.constant 21 : index
    %c0_75 = arith.constant 0 : index
    %c0_76 = arith.constant 0 : index
    %112 = vector.load %arg5[%c21, %c0_75, %c0_76] : memref<27x8x16xbf16, #tpu.memory_space<vmem>>, vector<1x8x16xbf16>
    %113 = vector.shape_cast %112 : vector<1x8x16xbf16> to vector<8x16xbf16>
    %114 = vector.extract_strided_slice %5 {offsets = [0, 7], sizes = [16, 28], strides = [1, 1]} : vector<16x49xbf16> to vector<16x28xbf16>
    %cst_77 = arith.constant dense<0.000000e+00> : vector<8x28xf32>
    %115 = tpu.matmul %113, %114, %cst_77 {dimension_numbers = #tpu.dot_dimension_numbers<[1], [0], [0], [1], [0, 0, 1, 1], [], []>} : vector<8x16xbf16>, vector<16x28xbf16>, vector<8x28xf32> -> vector<8x28xf32>
    %116 = arith.addf %111, %115 : vector<8x28xf32>
    %c22 = arith.constant 22 : index
    %c0_78 = arith.constant 0 : index
    %c0_79 = arith.constant 0 : index
    %117 = vector.load %arg5[%c22, %c0_78, %c0_79] : memref<27x8x16xbf16, #tpu.memory_space<vmem>>, vector<1x8x16xbf16>
    %118 = vector.shape_cast %117 : vector<1x8x16xbf16> to vector<8x16xbf16>
    %119 = vector.extract_strided_slice %5 {offsets = [0, 8], sizes = [16, 28], strides = [1, 1]} : vector<16x49xbf16> to vector<16x28xbf16>
    %cst_80 = arith.constant dense<0.000000e+00> : vector<8x28xf32>
    %120 = tpu.matmul %118, %119, %cst_80 {dimension_numbers = #tpu.dot_dimension_numbers<[1], [0], [0], [1], [0, 0, 1, 1], [], []>} : vector<8x16xbf16>, vector<16x28xbf16>, vector<8x28xf32> -> vector<8x28xf32>
    %121 = arith.addf %116, %120 : vector<8x28xf32>
    %c23 = arith.constant 23 : index
    %c0_81 = arith.constant 0 : index
    %c0_82 = arith.constant 0 : index
    %122 = vector.load %arg5[%c23, %c0_81, %c0_82] : memref<27x8x16xbf16, #tpu.memory_space<vmem>>, vector<1x8x16xbf16>
    %123 = vector.shape_cast %122 : vector<1x8x16xbf16> to vector<8x16xbf16>
    %124 = vector.extract_strided_slice %5 {offsets = [0, 9], sizes = [16, 28], strides = [1, 1]} : vector<16x49xbf16> to vector<16x28xbf16>
    %cst_83 = arith.constant dense<0.000000e+00> : vector<8x28xf32>
    %125 = tpu.matmul %123, %124, %cst_83 {dimension_numbers = #tpu.dot_dimension_numbers<[1], [0], [0], [1], [0, 0, 1, 1], [], []>} : vector<8x16xbf16>, vector<16x28xbf16>, vector<8x28xf32> -> vector<8x28xf32>
    %126 = arith.addf %121, %125 : vector<8x28xf32>
    %c24 = arith.constant 24 : index
    %c0_84 = arith.constant 0 : index
    %c0_85 = arith.constant 0 : index
    %127 = vector.load %arg5[%c24, %c0_84, %c0_85] : memref<27x8x16xbf16, #tpu.memory_space<vmem>>, vector<1x8x16xbf16>
    %128 = vector.shape_cast %127 : vector<1x8x16xbf16> to vector<8x16xbf16>
    %129 = vector.extract_strided_slice %5 {offsets = [0, 14], sizes = [16, 28], strides = [1, 1]} : vector<16x49xbf16> to vector<16x28xbf16>
    %cst_86 = arith.constant dense<0.000000e+00> : vector<8x28xf32>
    %130 = tpu.matmul %128, %129, %cst_86 {dimension_numbers = #tpu.dot_dimension_numbers<[1], [0], [0], [1], [0, 0, 1, 1], [], []>} : vector<8x16xbf16>, vector<16x28xbf16>, vector<8x28xf32> -> vector<8x28xf32>
    %131 = arith.addf %126, %130 : vector<8x28xf32>
    %c25 = arith.constant 25 : index
    %c0_87 = arith.constant 0 : index
    %c0_88 = arith.constant 0 : index
    %132 = vector.load %arg5[%c25, %c0_87, %c0_88] : memref<27x8x16xbf16, #tpu.memory_space<vmem>>, vector<1x8x16xbf16>
    %133 = vector.shape_cast %132 : vector<1x8x16xbf16> to vector<8x16xbf16>
    %134 = vector.extract_strided_slice %5 {offsets = [0, 15], sizes = [16, 28], strides = [1, 1]} : vector<16x49xbf16> to vector<16x28xbf16>
    %cst_89 = arith.constant dense<0.000000e+00> : vector<8x28xf32>
    %135 = tpu.matmul %133, %134, %cst_89 {dimension_numbers = #tpu.dot_dimension_numbers<[1], [0], [0], [1], [0, 0, 1, 1], [], []>} : vector<8x16xbf16>, vector<16x28xbf16>, vector<8x28xf32> -> vector<8x28xf32>
    %136 = arith.addf %131, %135 : vector<8x28xf32>
    %c26 = arith.constant 26 : index
    %c0_90 = arith.constant 0 : index
    %c0_91 = arith.constant 0 : index
    %137 = vector.load %arg5[%c26, %c0_90, %c0_91] : memref<27x8x16xbf16, #tpu.memory_space<vmem>>, vector<1x8x16xbf16>
    %138 = vector.shape_cast %137 : vector<1x8x16xbf16> to vector<8x16xbf16>
    %139 = vector.extract_strided_slice %5 {offsets = [0, 16], sizes = [16, 28], strides = [1, 1]} : vector<16x49xbf16> to vector<16x28xbf16>
    %cst_92 = arith.constant dense<0.000000e+00> : vector<8x28xf32>
    %140 = tpu.matmul %138, %139, %cst_92 {dimension_numbers = #tpu.dot_dimension_numbers<[1], [0], [0], [1], [0, 0, 1, 1], [], []>} : vector<8x16xbf16>, vector<16x28xbf16>, vector<8x28xf32> -> vector<8x28xf32>
    %141 = arith.addf %136, %140 : vector<8x28xf32>
    %c0_93 = arith.constant 0 : index
    %c0_94 = arith.constant 0 : index
    %142 = vector.load %arg6[%c0_93, %c0_94] : memref<8x1xf32, #tpu.memory_space<vmem>>, vector<8x1xf32>
    %143 = vector.broadcast %142 : vector<8x1xf32> to vector<8x28xf32>
    %144 = arith.addf %141, %143 : vector<8x28xf32>
    %145 = arith.truncf %144 : vector<8x28xf32> to vector<8x28xbf16>
    %c0_95 = arith.constant 0 : index
    %c0_96 = arith.constant 0 : index
    %c0_97 = arith.constant 0 : index
    %c0_98 = arith.constant 0 : index
    %146 = vector.load %arg7[%c0_95, %c0_96, %c0_97, %c0_98] : memref<1x1x8x28xbf16, #tpu.memory_space<vmem>>, vector<1x1x8x28xbf16>
    %147 = vector.shape_cast %146 : vector<1x1x8x28xbf16> to vector<8x28xbf16>
    %148 = vector.shape_cast %145 : vector<8x28xbf16> to vector<1x1x8x28xbf16>
    tpu.vector_store %arg7[%c0_95, %c0_96, %c0_97, %c0_98], %148 {strides = array<i32>} : memref<1x1x8x28xbf16, #tpu.memory_space<vmem>>, vector<1x1x8x28xbf16>,
    return
  }
  func.func @transform_0(%arg0: i32, %arg1: i32) -> (i32, i32, i32, i32) {
    %c0_i32 = arith.constant 0 : i32
    %0 = arith.addi %arg1, %c0_i32 : i32
    %c0_i32_0 = arith.constant 0 : i32
    %c0_i32_1 = arith.constant 0 : i32
    %c0_i32_2 = arith.constant 0 : i32
    return %arg0, %0, %c0_i32_0, %c0_i32_1 : i32, i32, i32, i32
  }
  func.func @transform_1(%arg0: i32, %arg1: i32) -> (i32, i32, i32, i32) {
    %c1_i32 = arith.constant 1 : i32
    %0 = arith.addi %arg1, %c1_i32 : i32
    %c0_i32 = arith.constant 0 : i32
    %c0_i32_0 = arith.constant 0 : i32
    %c0_i32_1 = arith.constant 0 : i32
    return %arg0, %0, %c0_i32, %c0_i32_0 : i32, i32, i32, i32
  }
  func.func @transform_2(%arg0: i32, %arg1: i32) -> (i32, i32, i32, i32) {
    %c2_i32 = arith.constant 2 : i32
    %0 = arith.addi %arg1, %c2_i32 : i32
    %c0_i32 = arith.constant 0 : i32
    %c0_i32_0 = arith.constant 0 : i32
    %c0_i32_1 = arith.constant 0 : i32
    return %arg0, %0, %c0_i32, %c0_i32_0 : i32, i32, i32, i32
  }
  func.func @transform_3(%arg0: i32, %arg1: i32) -> (i32, i32, i32) {
    %c0_i32 = arith.constant 0 : i32
    %c0_i32_0 = arith.constant 0 : i32
    %c0_i32_1 = arith.constant 0 : i32
    %c0_i32_2 = arith.constant 0 : i32
    return %c0_i32, %c0_i32_0, %c0_i32_1 : i32, i32, i32
  }
  func.func @transform_4(%arg0: i32, %arg1: i32) -> (i32, i32) {
    %c0_i32 = arith.constant 0 : i32
    %c0_i32_0 = arith.constant 0 : i32
    %c0_i32_1 = arith.constant 0 : i32
    return %c0_i32, %c0_i32_0 : i32, i32
  }
  func.func @transform_5(%arg0: i32, %arg1: i32) -> (i32, i32, i32, i32) {
    %c0_i32 = arith.constant 0 : i32
    %c0_i32_0 = arith.constant 0 : i32
    %c0_i32_1 = arith.constant 0 : i32
    return %arg0, %arg1, %c0_i32, %c0_i32_0 : i32, i32, i32, i32
  }
}

module attributes {stable_mosaic.version = 11 : i64} {
  func.func @_conv3d_tap_kernel(%arg0: i32, %arg1: i32, %arg2: memref<1x1x16x49xbf16, #tpu.memory_space<vmem>>, %arg3: memref<1x1x16x49xbf16, #tpu.memory_space<vmem>>, %arg4: memref<1x1x16x49xbf16, #tpu.memory_space<vmem>>, %arg5: memref<27x8x16xbf16, #tpu.memory_space<vmem>>, %arg6: memref<8x1xf32, #tpu.memory_space<vmem>>, %arg7: memref<1x1x8x28xf32, #tpu.memory_space<vmem>>) attributes {dimension_semantics = [#tpu.dimension_semantics<parallel>, #tpu.dimension_semantics<parallel>], iteration_bounds = array<i64: 2, 4>, scalar_prefetch = 0 : i64, scratch_operands = 0 : i64, tpu.core_type = #tpu.core_type<tc>, window_params = [{transform_indices = @transform_0, window_bounds = array<i64: 1, 1, 16, 49>}, {transform_indices = @transform_1, window_bounds = array<i64: 1, 1, 16, 49>}, {transform_indices = @transform_2, window_bounds = array<i64: 1, 1, 16, 49>}, {pipeline_mode = #tpu.pipeline_mode<synchronous>, transform_indices = @transform_3, window_bounds = array<i64: 27, 8, 16>}, {pipeline_mode = #tpu.pipeline_mode<synchronous>, transform_indices = @transform_4, window_bounds = array<i64: 8, 1>}, {transform_indices = @transform_5, window_bounds = array<i64: 1, 1, 8, 28>}]} {
    %c0 = arith.constant 0 : index
    %c0_0 = arith.constant 0 : index
    %c0_1 = arith.constant 0 : index
    %c0_2 = arith.constant 0 : index
    %0 = vector.load %arg2[%c0, %c0_0, %c0_1, %c0_2] : memref<1x1x16x49xbf16, #tpu.memory_space<vmem>>, vector<1x1x16x49xbf16>
    %1 = vector.shape_cast %0 : vector<1x1x16x49xbf16> to vector<16x49xbf16>
    %c0_3 = arith.constant 0 : index
    %c0_4 = arith.constant 0 : index
    %c0_5 = arith.constant 0 : index
    %c0_6 = arith.constant 0 : index
    %2 = vector.load %arg3[%c0_3, %c0_4, %c0_5, %c0_6] : memref<1x1x16x49xbf16, #tpu.memory_space<vmem>>, vector<1x1x16x49xbf16>
    %3 = vector.shape_cast %2 : vector<1x1x16x49xbf16> to vector<16x49xbf16>
    %c0_7 = arith.constant 0 : index
    %c0_8 = arith.constant 0 : index
    %c0_9 = arith.constant 0 : index
    %c0_10 = arith.constant 0 : index
    %4 = vector.load %arg4[%c0_7, %c0_8, %c0_9, %c0_10] : memref<1x1x16x49xbf16, #tpu.memory_space<vmem>>, vector<1x1x16x49xbf16>
    %5 = vector.shape_cast %4 : vector<1x1x16x49xbf16> to vector<16x49xbf16>
    %cst = arith.constant 0.000000e+00 : f32
    %6 = vector.broadcast %cst : f32 to vector<8x28xf32>
    %c0_11 = arith.constant 0 : index
    %c0_12 = arith.constant 0 : index
    %c0_13 = arith.constant 0 : index
    %7 = vector.load %arg5[%c0_11, %c0_12, %c0_13] : memref<27x8x16xbf16, #tpu.memory_space<vmem>>, vector<1x8x16xbf16>
    %8 = vector.shape_cast %7 : vector<1x8x16xbf16> to vector<8x16xbf16>
    %9 = vector.extract_strided_slice %1 {offsets = [0, 0], sizes = [16, 28], strides = [1, 1]} : vector<16x49xbf16> to vector<16x28xbf16>
    %cst_14 = arith.constant dense<0.000000e+00> : vector<8x28xf32>
    %10 = tpu.matmul %8, %9, %cst_14 {dimension_numbers = #tpu.dot_dimension_numbers<[1], [0], [0], [1], [0, 0, 1, 1], [], []>} : vector<8x16xbf16>, vector<16x28xbf16>, vector<8x28xf32> -> vector<8x28xf32>
    %11 = arith.addf %6, %10 : vector<8x28xf32>
    %c1 = arith.constant 1 : index
    %c0_15 = arith.constant 0 : index
    %c0_16 = arith.constant 0 : index
    %12 = vector.load %arg5[%c1, %c0_15, %c0_16] : memref<27x8x16xbf16, #tpu.memory_space<vmem>>, vector<1x8x16xbf16>
    %13 = vector.shape_cast %12 : vector<1x8x16xbf16> to vector<8x16xbf16>
    %14 = vector.extract_strided_slice %1 {offsets = [0, 1], sizes = [16, 28], strides = [1, 1]} : vector<16x49xbf16> to vector<16x28xbf16>
    %cst_17 = arith.constant dense<0.000000e+00> : vector<8x28xf32>
    %15 = tpu.matmul %13, %14, %cst_17 {dimension_numbers = #tpu.dot_dimension_numbers<[1], [0], [0], [1], [0, 0, 1, 1], [], []>} : vector<8x16xbf16>, vector<16x28xbf16>, vector<8x28xf32> -> vector<8x28xf32>
    %16 = arith.addf %11, %15 : vector<8x28xf32>
    %c2 = arith.constant 2 : index
    %c0_18 = arith.constant 0 : index
    %c0_19 = arith.constant 0 : index
    %17 = vector.load %arg5[%c2, %c0_18, %c0_19] : memref<27x8x16xbf16, #tpu.memory_space<vmem>>, vector<1x8x16xbf16>
    %18 = vector.shape_cast %17 : vector<1x8x16xbf16> to vector<8x16xbf16>
    %19 = vector.extract_strided_slice %1 {offsets = [0, 2], sizes = [16, 28], strides = [1, 1]} : vector<16x49xbf16> to vector<16x28xbf16>
    %cst_20 = arith.constant dense<0.000000e+00> : vector<8x28xf32>
    %20 = tpu.matmul %18, %19, %cst_20 {dimension_numbers = #tpu.dot_dimension_numbers<[1], [0], [0], [1], [0, 0, 1, 1], [], []>} : vector<8x16xbf16>, vector<16x28xbf16>, vector<8x28xf32> -> vector<8x28xf32>
    %21 = arith.addf %16, %20 : vector<8x28xf32>
    %c3 = arith.constant 3 : index
    %c0_21 = arith.constant 0 : index
    %c0_22 = arith.constant 0 : index
    %22 = vector.load %arg5[%c3, %c0_21, %c0_22] : memref<27x8x16xbf16, #tpu.memory_space<vmem>>, vector<1x8x16xbf16>
    %23 = vector.shape_cast %22 : vector<1x8x16xbf16> to vector<8x16xbf16>
    %24 = vector.extract_strided_slice %1 {offsets = [0, 7], sizes = [16, 28], strides = [1, 1]} : vector<16x49xbf16> to vector<16x28xbf16>
    %cst_23 = arith.constant dense<0.000000e+00> : vector<8x28xf32>
    %25 = tpu.matmul %23, %24, %cst_23 {dimension_numbers = #tpu.dot_dimension_numbers<[1], [0], [0], [1], [0, 0, 1, 1], [], []>} : vector<8x16xbf16>, vector<16x28xbf16>, vector<8x28xf32> -> vector<8x28xf32>
    %26 = arith.addf %21, %25 : vector<8x28xf32>
    %c4 = arith.constant 4 : index
    %c0_24 = arith.constant 0 : index
    %c0_25 = arith.constant 0 : index
    %27 = vector.load %arg5[%c4, %c0_24, %c0_25] : memref<27x8x16xbf16, #tpu.memory_space<vmem>>, vector<1x8x16xbf16>
    %28 = vector.shape_cast %27 : vector<1x8x16xbf16> to vector<8x16xbf16>
    %29 = vector.extract_strided_slice %1 {offsets = [0, 8], sizes = [16, 28], strides = [1, 1]} : vector<16x49xbf16> to vector<16x28xbf16>
    %cst_26 = arith.constant dense<0.000000e+00> : vector<8x28xf32>
    %30 = tpu.matmul %28, %29, %cst_26 {dimension_numbers = #tpu.dot_dimension_numbers<[1], [0], [0], [1], [0, 0, 1, 1], [], []>} : vector<8x16xbf16>, vector<16x28xbf16>, vector<8x28xf32> -> vector<8x28xf32>
    %31 = arith.addf %26, %30 : vector<8x28xf32>
    %c5 = arith.constant 5 : index
    %c0_27 = arith.constant 0 : index
    %c0_28 = arith.constant 0 : index
    %32 = vector.load %arg5[%c5, %c0_27, %c0_28] : memref<27x8x16xbf16, #tpu.memory_space<vmem>>, vector<1x8x16xbf16>
    %33 = vector.shape_cast %32 : vector<1x8x16xbf16> to vector<8x16xbf16>
    %34 = vector.extract_strided_slice %1 {offsets = [0, 9], sizes = [16, 28], strides = [1, 1]} : vector<16x49xbf16> to vector<16x28xbf16>
    %cst_29 = arith.constant dense<0.000000e+00> : vector<8x28xf32>
    %35 = tpu.matmul %33, %34, %cst_29 {dimension_numbers = #tpu.dot_dimension_numbers<[1], [0], [0], [1], [0, 0, 1, 1], [], []>} : vector<8x16xbf16>, vector<16x28xbf16>, vector<8x28xf32> -> vector<8x28xf32>
    %36 = arith.addf %31, %35 : vector<8x28xf32>
    %c6 = arith.constant 6 : index
    %c0_30 = arith.constant 0 : index
    %c0_31 = arith.constant 0 : index
    %37 = vector.load %arg5[%c6, %c0_30, %c0_31] : memref<27x8x16xbf16, #tpu.memory_space<vmem>>, vector<1x8x16xbf16>
    %38 = vector.shape_cast %37 : vector<1x8x16xbf16> to vector<8x16xbf16>
    %39 = vector.extract_strided_slice %1 {offsets = [0, 14], sizes = [16, 28], strides = [1, 1]} : vector<16x49xbf16> to vector<16x28xbf16>
    %cst_32 = arith.constant dense<0.000000e+00> : vector<8x28xf32>
    %40 = tpu.matmul %38, %39, %cst_32 {dimension_numbers = #tpu.dot_dimension_numbers<[1], [0], [0], [1], [0, 0, 1, 1], [], []>} : vector<8x16xbf16>, vector<16x28xbf16>, vector<8x28xf32> -> vector<8x28xf32>
    %41 = arith.addf %36, %40 : vector<8x28xf32>
    %c7 = arith.constant 7 : index
    %c0_33 = arith.constant 0 : index
    %c0_34 = arith.constant 0 : index
    %42 = vector.load %arg5[%c7, %c0_33, %c0_34] : memref<27x8x16xbf16, #tpu.memory_space<vmem>>, vector<1x8x16xbf16>
    %43 = vector.shape_cast %42 : vector<1x8x16xbf16> to vector<8x16xbf16>
    %44 = vector.extract_strided_slice %1 {offsets = [0, 15], sizes = [16, 28], strides = [1, 1]} : vector<16x49xbf16> to vector<16x28xbf16>
    %cst_35 = arith.constant dense<0.000000e+00> : vector<8x28xf32>
    %45 = tpu.matmul %43, %44, %cst_35 {dimension_numbers = #tpu.dot_dimension_numbers<[1], [0], [0], [1], [0, 0, 1, 1], [], []>} : vector<8x16xbf16>, vector<16x28xbf16>, vector<8x28xf32> -> vector<8x28xf32>
    %46 = arith.addf %41, %45 : vector<8x28xf32>
    %c8 = arith.constant 8 : index
    %c0_36 = arith.constant 0 : index
    %c0_37 = arith.constant 0 : index
    %47 = vector.load %arg5[%c8, %c0_36, %c0_37] : memref<27x8x16xbf16, #tpu.memory_space<vmem>>, vector<1x8x16xbf16>
    %48 = vector.shape_cast %47 : vector<1x8x16xbf16> to vector<8x16xbf16>
    %49 = vector.extract_strided_slice %1 {offsets = [0, 16], sizes = [16, 28], strides = [1, 1]} : vector<16x49xbf16> to vector<16x28xbf16>
    %cst_38 = arith.constant dense<0.000000e+00> : vector<8x28xf32>
    %50 = tpu.matmul %48, %49, %cst_38 {dimension_numbers = #tpu.dot_dimension_numbers<[1], [0], [0], [1], [0, 0, 1, 1], [], []>} : vector<8x16xbf16>, vector<16x28xbf16>, vector<8x28xf32> -> vector<8x28xf32>
    %51 = arith.addf %46, %50 : vector<8x28xf32>
    %c9 = arith.constant 9 : index
    %c0_39 = arith.constant 0 : index
    %c0_40 = arith.constant 0 : index
    %52 = vector.load %arg5[%c9, %c0_39, %c0_40] : memref<27x8x16xbf16, #tpu.memory_space<vmem>>, vector<1x8x16xbf16>
    %53 = vector.shape_cast %52 : vector<1x8x16xbf16> to vector<8x16xbf16>
    %54 = vector.extract_strided_slice %3 {offsets = [0, 0], sizes = [16, 28], strides = [1, 1]} : vector<16x49xbf16> to vector<16x28xbf16>
    %cst_41 = arith.constant dense<0.000000e+00> : vector<8x28xf32>
    %55 = tpu.matmul %53, %54, %cst_41 {dimension_numbers = #tpu.dot_dimension_numbers<[1], [0], [0], [1], [0, 0, 1, 1], [], []>} : vector<8x16xbf16>, vector<16x28xbf16>, vector<8x28xf32> -> vector<8x28xf32>
    %56 = arith.addf %51, %55 : vector<8x28xf32>
    %c10 = arith.constant 10 : index
    %c0_42 = arith.constant 0 : index
    %c0_43 = arith.constant 0 : index
    %57 = vector.load %arg5[%c10, %c0_42, %c0_43] : memref<27x8x16xbf16, #tpu.memory_space<vmem>>, vector<1x8x16xbf16>
    %58 = vector.shape_cast %57 : vector<1x8x16xbf16> to vector<8x16xbf16>
    %59 = vector.extract_strided_slice %3 {offsets = [0, 1], sizes = [16, 28], strides = [1, 1]} : vector<16x49xbf16> to vector<16x28xbf16>
    %cst_44 = arith.constant dense<0.000000e+00> : vector<8x28xf32>
    %60 = tpu.matmul %58, %59, %cst_44 {dimension_numbers = #tpu.dot_dimension_numbers<[1], [0], [0], [1], [0, 0, 1, 1], [], []>} : vector<8x16xbf16>, vector<16x28xbf16>, vector<8x28xf32> -> vector<8x28xf32>
    %61 = arith.addf %56, %60 : vector<8x28xf32>
    %c11 = arith.constant 11 : index
    %c0_45 = arith.constant 0 : index
    %c0_46 = arith.constant 0 : index
    %62 = vector.load %arg5[%c11, %c0_45, %c0_46] : memref<27x8x16xbf16, #tpu.memory_space<vmem>>, vector<1x8x16xbf16>
    %63 = vector.shape_cast %62 : vector<1x8x16xbf16> to vector<8x16xbf16>
    %64 = vector.extract_strided_slice %3 {offsets = [0, 2], sizes = [16, 28], strides = [1, 1]} : vector<16x49xbf16> to vector<16x28xbf16>
    %cst_47 = arith.constant dense<0.000000e+00> : vector<8x28xf32>
    %65 = tpu.matmul %63, %64, %cst_47 {dimension_numbers = #tpu.dot_dimension_numbers<[1], [0], [0], [1], [0, 0, 1, 1], [], []>} : vector<8x16xbf16>, vector<16x28xbf16>, vector<8x28xf32> -> vector<8x28xf32>
    %66 = arith.addf %61, %65 : vector<8x28xf32>
    %c12 = arith.constant 12 : index
    %c0_48 = arith.constant 0 : index
    %c0_49 = arith.constant 0 : index
    %67 = vector.load %arg5[%c12, %c0_48, %c0_49] : memref<27x8x16xbf16, #tpu.memory_space<vmem>>, vector<1x8x16xbf16>
    %68 = vector.shape_cast %67 : vector<1x8x16xbf16> to vector<8x16xbf16>
    %69 = vector.extract_strided_slice %3 {offsets = [0, 7], sizes = [16, 28], strides = [1, 1]} : vector<16x49xbf16> to vector<16x28xbf16>
    %cst_50 = arith.constant dense<0.000000e+00> : vector<8x28xf32>
    %70 = tpu.matmul %68, %69, %cst_50 {dimension_numbers = #tpu.dot_dimension_numbers<[1], [0], [0], [1], [0, 0, 1, 1], [], []>} : vector<8x16xbf16>, vector<16x28xbf16>, vector<8x28xf32> -> vector<8x28xf32>
    %71 = arith.addf %66, %70 : vector<8x28xf32>
    %c13 = arith.constant 13 : index
    %c0_51 = arith.constant 0 : index
    %c0_52 = arith.constant 0 : index
    %72 = vector.load %arg5[%c13, %c0_51, %c0_52] : memref<27x8x16xbf16, #tpu.memory_space<vmem>>, vector<1x8x16xbf16>
    %73 = vector.shape_cast %72 : vector<1x8x16xbf16> to vector<8x16xbf16>
    %74 = vector.extract_strided_slice %3 {offsets = [0, 8], sizes = [16, 28], strides = [1, 1]} : vector<16x49xbf16> to vector<16x28xbf16>
    %cst_53 = arith.constant dense<0.000000e+00> : vector<8x28xf32>
    %75 = tpu.matmul %73, %74, %cst_53 {dimension_numbers = #tpu.dot_dimension_numbers<[1], [0], [0], [1], [0, 0, 1, 1], [], []>} : vector<8x16xbf16>, vector<16x28xbf16>, vector<8x28xf32> -> vector<8x28xf32>
    %76 = arith.addf %71, %75 : vector<8x28xf32>
    %c14 = arith.constant 14 : index
    %c0_54 = arith.constant 0 : index
    %c0_55 = arith.constant 0 : index
    %77 = vector.load %arg5[%c14, %c0_54, %c0_55] : memref<27x8x16xbf16, #tpu.memory_space<vmem>>, vector<1x8x16xbf16>
    %78 = vector.shape_cast %77 : vector<1x8x16xbf16> to vector<8x16xbf16>
    %79 = vector.extract_strided_slice %3 {offsets = [0, 9], sizes = [16, 28], strides = [1, 1]} : vector<16x49xbf16> to vector<16x28xbf16>
    %cst_56 = arith.constant dense<0.000000e+00> : vector<8x28xf32>
    %80 = tpu.matmul %78, %79, %cst_56 {dimension_numbers = #tpu.dot_dimension_numbers<[1], [0], [0], [1], [0, 0, 1, 1], [], []>} : vector<8x16xbf16>, vector<16x28xbf16>, vector<8x28xf32> -> vector<8x28xf32>
    %81 = arith.addf %76, %80 : vector<8x28xf32>
    %c15 = arith.constant 15 : index
    %c0_57 = arith.constant 0 : index
    %c0_58 = arith.constant 0 : index
    %82 = vector.load %arg5[%c15, %c0_57, %c0_58] : memref<27x8x16xbf16, #tpu.memory_space<vmem>>, vector<1x8x16xbf16>
    %83 = vector.shape_cast %82 : vector<1x8x16xbf16> to vector<8x16xbf16>
    %84 = vector.extract_strided_slice %3 {offsets = [0, 14], sizes = [16, 28], strides = [1, 1]} : vector<16x49xbf16> to vector<16x28xbf16>
    %cst_59 = arith.constant dense<0.000000e+00> : vector<8x28xf32>
    %85 = tpu.matmul %83, %84, %cst_59 {dimension_numbers = #tpu.dot_dimension_numbers<[1], [0], [0], [1], [0, 0, 1, 1], [], []>} : vector<8x16xbf16>, vector<16x28xbf16>, vector<8x28xf32> -> vector<8x28xf32>
    %86 = arith.addf %81, %85 : vector<8x28xf32>
    %c16 = arith.constant 16 : index
    %c0_60 = arith.constant 0 : index
    %c0_61 = arith.constant 0 : index
    %87 = vector.load %arg5[%c16, %c0_60, %c0_61] : memref<27x8x16xbf16, #tpu.memory_space<vmem>>, vector<1x8x16xbf16>
    %88 = vector.shape_cast %87 : vector<1x8x16xbf16> to vector<8x16xbf16>
    %89 = vector.extract_strided_slice %3 {offsets = [0, 15], sizes = [16, 28], strides = [1, 1]} : vector<16x49xbf16> to vector<16x28xbf16>
    %cst_62 = arith.constant dense<0.000000e+00> : vector<8x28xf32>
    %90 = tpu.matmul %88, %89, %cst_62 {dimension_numbers = #tpu.dot_dimension_numbers<[1], [0], [0], [1], [0, 0, 1, 1], [], []>} : vector<8x16xbf16>, vector<16x28xbf16>, vector<8x28xf32> -> vector<8x28xf32>
    %91 = arith.addf %86, %90 : vector<8x28xf32>
    %c17 = arith.constant 17 : index
    %c0_63 = arith.constant 0 : index
    %c0_64 = arith.constant 0 : index
    %92 = vector.load %arg5[%c17, %c0_63, %c0_64] : memref<27x8x16xbf16, #tpu.memory_space<vmem>>, vector<1x8x16xbf16>
    %93 = vector.shape_cast %92 : vector<1x8x16xbf16> to vector<8x16xbf16>
    %94 = vector.extract_strided_slice %3 {offsets = [0, 16], sizes = [16, 28], strides = [1, 1]} : vector<16x49xbf16> to vector<16x28xbf16>
    %cst_65 = arith.constant dense<0.000000e+00> : vector<8x28xf32>
    %95 = tpu.matmul %93, %94, %cst_65 {dimension_numbers = #tpu.dot_dimension_numbers<[1], [0], [0], [1], [0, 0, 1, 1], [], []>} : vector<8x16xbf16>, vector<16x28xbf16>, vector<8x28xf32> -> vector<8x28xf32>
    %96 = arith.addf %91, %95 : vector<8x28xf32>
    %c18 = arith.constant 18 : index
    %c0_66 = arith.constant 0 : index
    %c0_67 = arith.constant 0 : index
    %97 = vector.load %arg5[%c18, %c0_66, %c0_67] : memref<27x8x16xbf16, #tpu.memory_space<vmem>>, vector<1x8x16xbf16>
    %98 = vector.shape_cast %97 : vector<1x8x16xbf16> to vector<8x16xbf16>
    %99 = vector.extract_strided_slice %5 {offsets = [0, 0], sizes = [16, 28], strides = [1, 1]} : vector<16x49xbf16> to vector<16x28xbf16>
    %cst_68 = arith.constant dense<0.000000e+00> : vector<8x28xf32>
    %100 = tpu.matmul %98, %99, %cst_68 {dimension_numbers = #tpu.dot_dimension_numbers<[1], [0], [0], [1], [0, 0, 1, 1], [], []>} : vector<8x16xbf16>, vector<16x28xbf16>, vector<8x28xf32> -> vector<8x28xf32>
    %101 = arith.addf %96, %100 : vector<8x28xf32>
    %c19 = arith.constant 19 : index
    %c0_69 = arith.constant 0 : index
    %c0_70 = arith.constant 0 : index
    %102 = vector.load %arg5[%c19, %c0_69, %c0_70] : memref<27x8x16xbf16, #tpu.memory_space<vmem>>, vector<1x8x16xbf16>
    %103 = vector.shape_cast %102 : vector<1x8x16xbf16> to vector<8x16xbf16>
    %104 = vector.extract_strided_slice %5 {offsets = [0, 1], sizes = [16, 28], strides = [1, 1]} : vector<16x49xbf16> to vector<16x28xbf16>
    %cst_71 = arith.constant dense<0.000000e+00> : vector<8x28xf32>
    %105 = tpu.matmul %103, %104, %cst_71 {dimension_numbers = #tpu.dot_dimension_numbers<[1], [0], [0], [1], [0, 0, 1, 1], [], []>} : vector<8x16xbf16>, vector<16x28xbf16>, vector<8x28xf32> -> vector<8x28xf32>
    %106 = arith.addf %101, %105 : vector<8x28xf32>
    %c20 = arith.constant 20 : index
    %c0_72 = arith.constant 0 : index
    %c0_73 = arith.constant 0 : index
    %107 = vector.load %arg5[%c20, %c0_72, %c0_73] : memref<27x8x16xbf16, #tpu.memory_space<vmem>>, vector<1x8x16xbf16>
    %108 = vector.shape_cast %107 : vector<1x8x16xbf16> to vector<8x16xbf16>
    %109 = vector.extract_strided_slice %5 {offsets = [0, 2], sizes = [16, 28], strides = [1, 1]} : vector<16x49xbf16> to vector<16x28xbf16>
    %cst_74 = arith.constant dense<0.000000e+00> : vector<8x28xf32>
    %110 = tpu.matmul %108, %109, %cst_74 {dimension_numbers = #tpu.dot_dimension_numbers<[1], [0], [0], [1], [0, 0, 1, 1], [], []>} : vector<8x16xbf16>, vector<16x28xbf16>, vector<8x28xf32> -> vector<8x28xf32>
    %111 = arith.addf %106, %110 : vector<8x28xf32>
    %c21 = arith.constant 21 : index
    %c0_75 = arith.constant 0 : index
    %c0_76 = arith.constant 0 : index
    %112 = vector.load %arg5[%c21, %c0_75, %c0_76] : memref<27x8x16xbf16, #tpu.memory_space<vmem>>, vector<1x8x16xbf16>
    %113 = vector.shape_cast %112 : vector<1x8x16xbf16> to vector<8x16xbf16>
    %114 = vector.extract_strided_slice %5 {offsets = [0, 7], sizes = [16, 28], strides = [1, 1]} : vector<16x49xbf16> to vector<16x28xbf16>
    %cst_77 = arith.constant dense<0.000000e+00> : vector<8x28xf32>
    %115 = tpu.matmul %113, %114, %cst_77 {dimension_numbers = #tpu.dot_dimension_numbers<[1], [0], [0], [1], [0, 0, 1, 1], [], []>} : vector<8x16xbf16>, vector<16x28xbf16>, vector<8x28xf32> -> vector<8x28xf32>
    %116 = arith.addf %111, %115 : vector<8x28xf32>
    %c22 = arith.constant 22 : index
    %c0_78 = arith.constant 0 : index
    %c0_79 = arith.constant 0 : index
    %117 = vector.load %arg5[%c22, %c0_78, %c0_79] : memref<27x8x16xbf16, #tpu.memory_space<vmem>>, vector<1x8x16xbf16>
    %118 = vector.shape_cast %117 : vector<1x8x16xbf16> to vector<8x16xbf16>
    %119 = vector.extract_strided_slice %5 {offsets = [0, 8], sizes = [16, 28], strides = [1, 1]} : vector<16x49xbf16> to vector<16x28xbf16>
    %cst_80 = arith.constant dense<0.000000e+00> : vector<8x28xf32>
    %120 = tpu.matmul %118, %119, %cst_80 {dimension_numbers = #tpu.dot_dimension_numbers<[1], [0], [0], [1], [0, 0, 1, 1], [], []>} : vector<8x16xbf16>, vector<16x28xbf16>, vector<8x28xf32> -> vector<8x28xf32>
    %121 = arith.addf %116, %120 : vector<8x28xf32>
    %c23 = arith.constant 23 : index
    %c0_81 = arith.constant 0 : index
    %c0_82 = arith.constant 0 : index
    %122 = vector.load %arg5[%c23, %c0_81, %c0_82] : memref<27x8x16xbf16, #tpu.memory_space<vmem>>, vector<1x8x16xbf16>
    %123 = vector.shape_cast %122 : vector<1x8x16xbf16> to vector<8x16xbf16>
    %124 = vector.extract_strided_slice %5 {offsets = [0, 9], sizes = [16, 28], strides = [1, 1]} : vector<16x49xbf16> to vector<16x28xbf16>
    %cst_83 = arith.constant dense<0.000000e+00> : vector<8x28xf32>
    %125 = tpu.matmul %123, %124, %cst_83 {dimension_numbers = #tpu.dot_dimension_numbers<[1], [0], [0], [1], [0, 0, 1, 1], [], []>} : vector<8x16xbf16>, vector<16x28xbf16>, vector<8x28xf32> -> vector<8x28xf32>
    %126 = arith.addf %121, %125 : vector<8x28xf32>
    %c24 = arith.constant 24 : index
    %c0_84 = arith.constant 0 : index
    %c0_85 = arith.constant 0 : index
    %127 = vector.load %arg5[%c24, %c0_84, %c0_85] : memref<27x8x16xbf16, #tpu.memory_space<vmem>>, vector<1x8x16xbf16>
    %128 = vector.shape_cast %127 : vector<1x8x16xbf16> to vector<8x16xbf16>
    %129 = vector.extract_strided_slice %5 {offsets = [0, 14], sizes = [16, 28], strides = [1, 1]} : vector<16x49xbf16> to vector<16x28xbf16>
    %cst_86 = arith.constant dense<0.000000e+00> : vector<8x28xf32>
    %130 = tpu.matmul %128, %129, %cst_86 {dimension_numbers = #tpu.dot_dimension_numbers<[1], [0], [0], [1], [0, 0, 1, 1], [], []>} : vector<8x16xbf16>, vector<16x28xbf16>, vector<8x28xf32> -> vector<8x28xf32>
    %131 = arith.addf %126, %130 : vector<8x28xf32>
    %c25 = arith.constant 25 : index
    %c0_87 = arith.constant 0 : index
    %c0_88 = arith.constant 0 : index
    %132 = vector.load %arg5[%c25, %c0_87, %c0_88] : memref<27x8x16xbf16, #tpu.memory_space<vmem>>, vector<1x8x16xbf16>
    %133 = vector.shape_cast %132 : vector<1x8x16xbf16> to vector<8x16xbf16>
    %134 = vector.extract_strided_slice %5 {offsets = [0, 15], sizes = [16, 28], strides = [1, 1]} : vector<16x49xbf16> to vector<16x28xbf16>
    %cst_89 = arith.constant dense<0.000000e+00> : vector<8x28xf32>
    %135 = tpu.matmul %133, %134, %cst_89 {dimension_numbers = #tpu.dot_dimension_numbers<[1], [0], [0], [1], [0, 0, 1, 1], [], []>} : vector<8x16xbf16>, vector<16x28xbf16>, vector<8x28xf32> -> vector<8x28xf32>
    %136 = arith.addf %131, %135 : vector<8x28xf32>
    %c26 = arith.constant 26 : index
    %c0_90 = arith.constant 0 : index
    %c0_91 = arith.constant 0 : index
    %137 = vector.load %arg5[%c26, %c0_90, %c0_91] : memref<27x8x16xbf16, #tpu.memory_space<vmem>>, vector<1x8x16xbf16>
    %138 = vector.shape_cast %137 : vector<1x8x16xbf16> to vector<8x16xbf16>
    %139 = vector.extract_strided_slice %5 {offsets = [0, 16], sizes = [16, 28], strides = [1, 1]} : vector<16x49xbf16> to vector<16x28xbf16>
    %cst_92 = arith.constant dense<0.000000e+00> : vector<8x28xf32>
    %140 = tpu.matmul %138, %139, %cst_92 {dimension_numbers = #tpu.dot_dimension_numbers<[1], [0], [0], [1], [0, 0, 1, 1], [], []>} : vector<8x16xbf16>, vector<16x28xbf16>, vector<8x28xf32> -> vector<8x28xf32>
    %141 = arith.addf %136, %140 : vector<8x28xf32>
    %c0_93 = arith.constant 0 : index
    %c0_94 = arith.constant 0 : index
    %142 = vector.load %arg6[%c0_93, %c0_94] : memref<8x1xf32, #tpu.memory_space<vmem>>, vector<8x1xf32>
    %143 = vector.broadcast %142 : vector<8x1xf32> to vector<8x28xf32>
    %144 = arith.addf %141, %143 : vector<8x28xf32>
    %c0_95 = arith.constant 0 : index
    %c0_96 = arith.constant 0 : index
    %c0_97 = arith.constant 0 : index
    %c0_98 = arith.constant 0 : index
    %145 = vector.load %arg7[%c0_95, %c0_96, %c0_97, %c0_98] : memref<1x1x8x28xf32, #tpu.memory_space<vmem>>, vector<1x1x8x28xf32>
    %146 = vector.shape_cast %145 : vector<1x1x8x28xf32> to vector<8x28xf32>
    %147 = vector.shape_cast %144 : vector<8x28xf32> to vector<1x1x8x28xf32>
    tpu.vector_store %arg7[%c0_95, %c0_96, %c0_97, %c0_98], %147 {strides = array<i32>} : memref<1x1x8x28xf32, #tpu.memory_space<vmem>>, vector<1x1x8x28xf32>,
    return
  }
  func.func @transform_0(%arg0: i32, %arg1: i32) -> (i32, i32, i32, i32) {
    %c0_i32 = arith.constant 0 : i32
    %0 = arith.addi %arg1, %c0_i32 : i32
    %c0_i32_0 = arith.constant 0 : i32
    %c0_i32_1 = arith.constant 0 : i32
    %c0_i32_2 = arith.constant 0 : i32
    return %arg0, %0, %c0_i32_0, %c0_i32_1 : i32, i32, i32, i32
  }
  func.func @transform_1(%arg0: i32, %arg1: i32) -> (i32, i32, i32, i32) {
    %c1_i32 = arith.constant 1 : i32
    %0 = arith.addi %arg1, %c1_i32 : i32
    %c0_i32 = arith.constant 0 : i32
    %c0_i32_0 = arith.constant 0 : i32
    %c0_i32_1 = arith.constant 0 : i32
    return %arg0, %0, %c0_i32, %c0_i32_0 : i32, i32, i32, i32
  }
  func.func @transform_2(%arg0: i32, %arg1: i32) -> (i32, i32, i32, i32) {
    %c2_i32 = arith.constant 2 : i32
    %0 = arith.addi %arg1, %c2_i32 : i32
    %c0_i32 = arith.constant 0 : i32
    %c0_i32_0 = arith.constant 0 : i32
    %c0_i32_1 = arith.constant 0 : i32
    return %arg0, %0, %c0_i32, %c0_i32_0 : i32, i32, i32, i32
  }
  func.func @transform_3(%arg0: i32, %arg1: i32) -> (i32, i32, i32) {
    %c0_i32 = arith.constant 0 : i32
    %c0_i32_0 = arith.constant 0 : i32
    %c0_i32_1 = arith.constant 0 : i32
    %c0_i32_2 = arith.constant 0 : i32
    return %c0_i32, %c0_i32_0, %c0_i32_1 : i32, i32, i32
  }
  func.func @transform_4(%arg0: i32, %arg1: i32) -> (i32, i32) {
    %c0_i32 = arith.constant 0 : i32
    %c0_i32_0 = arith.constant 0 : i32
    %c0_i32_1 = arith.constant 0 : i32
    return %c0_i32, %c0_i32_0 : i32, i32
  }
  func.func @transform_5(%arg0: i32, %arg1: i32) -> (i32, i32, i32, i32) {
    %c0_i32 = arith.constant 0 : i32
    %c0_i32_0 = arith.constant 0 : i32
    %c0_i32_1 = arith.constant 0 : i32
    return %arg0, %arg1, %c0_i32, %c0_i32_0 : i32, i32, i32, i32
  }
}

</mosaic_0001>

<bundles_post_ra>
// kernel: _lambda_.7
= control target key start
LH: loop header
LB: loop body
LE: loop exit
PB: predicated region body
PF: predicated region fallthrough
CT: control target
= control target key end

     0   :  { %7 = vsyncpa [#allocation3], 0  ;;  %s1057_s0 = inlined_call_operand.hbm [shape: bf16[2,64,16], index: 0, kind: input, shape index: {}]   ;;  %s1058_s1 = inlined_call_operand.hbm [shape: bf16[2,16,16], index: 1, kind: input, shape index: {}]   ;;  %s1059_s2 = inlined_call_operand.hbm [shape: bf16[2,64,16], index: 2, kind: output, shape index: {}]  }
   0x1   :  { %9 = vsyncpa [#allocation3 + $0x1], 0 }
   0x2   :  { %10 = vsyncpa [#allocation6], 0 }
   0x3   :  { %12 = vsyncpa [#allocation6 + $0x1], 0 }
   0x4   :  { %13 = vsyncpa [#allocation4], 0 }
   0x5   :  { %15 = vsyncpa [#allocation4 + $0x1], 0  ;;  %s818_s9 = smov 0   ;;  %s820_s10 = smov 0  }
   0x6   :  { %s822_s11 = smov 0   ;;  %s824_s12 = smov 0  }
   0x7   :  { %s826_s13 = smov 0   ;;  %s828_s14 = smov 0  }
   0x8 LB: > { %s506_s15 = sadd.s32 4294967295, %s794_s14   ;;  %s507_s16 = sadd.s32 4294967294, %s794_s14   ;;  %s794_s14 = sphi %s828_s14, %s21_s14   ;;  %s790_s13 = sphi %s826_s13, %s1077_s13   ;;  %s786_s12 = sphi %s824_s12, %s1076_s12   ;;  %s782_s11 = sphi %s822_s11, %s1075_s11   ;;  %s778_s10 = sphi %s820_s10, %s1074_s10   ;;  %s774_s9 = sphi %s818_s9, %s1073_s9  }
   0x9   : > { %s33_s17 = sadd.s32 1, %s790_s13  ;;  %s42_s18 = sadd.s32 1, %s782_s11 }
   0xa   : > { %p35_p0 = scmp.ge.s32.totalorder %s33_s17, 2  ;;  %p49_p1 = scmp.ne.s32.totalorder %s782_s11, %s778_s10 }
   0xb   : > { %p50_p2 = scmp.eq.s32.totalorder %s794_s14, 0  ;;  %p55_p3 = scmp.ne.s32.totalorder %s778_s10, %s774_s9 }
   0xc   : > { %s1079_s17 = smov (%p35_p0, %s33_s17), 0  ;;  %p56_p5 = scmp.eq.s32.totalorder %s506_s15, 0 }
   0xd   : > { %p859_p4 = por %p50_p2, %p49_p1  ;;  %s37_s20 = ssub.s32 %s790_s13, %s1079_s17 }
   0xe   : > { %p107_p6 = scmp.eq.s32.totalorder %s506_s15, 1  ;;  %p40_p7 = scmp.eq.s32.totalorder %s37_s20, 0 }
   0xf   : > { %p865_p8 = por %p56_p5, %p55_p3  ;;  %p113_p10 = scmp.eq.s32.totalorder %s507_s16, 1 }
  0x10   : > { %p869_p9 = por %p107_p6, %p49_p1  ;;  %p589_p13 = scmp.lt.s32.totalorder %s794_s14, 2 }
  0x11   : > { %s1063_s21 = scalar_select %p865_p8, 1, 0 }
  0x12   : > { %s1064_s22 = scalar_select %p869_p9, 1, 0 }
  0x13   : > { %s874_s23 = scalar_select %p40_p7, %s782_s11, %s42_s18  }
  0x14   : > { %p876_p11 = por %p113_p10, %p55_p3  ;;  %s883_s25 = sand.u32 1, %s782_s11  }
  0x15   : > { %s510_s26 = sshll.u32 %s883_s25, 5  ;;  %s542_s27 = sshll.u32 %s790_s13, 9 }
  0x16   : > { %s1065_s24 = scalar_select %p876_p11, 1, 0 }
  0x17   : > { %s890_s30 = scalar_lea.hbm %s1057_s0, %s542_s27  ;;  %s137_s3 = scalar_lea.vmem [#allocation2], %s510_s26 }
  0x18   : > { %s146_s4 = sshll.u32 %s137_s3, 4  ;;  %p896_p0 = pnand %p589_p13, %p859_p4  ;;  %s892_s4 = int_to_ptr.vmem [resolvable:$true] %s146_s4 }
  0x19   : > { %s134_s6 = scalar_lea.sflag [#allocation3], %s883_s25  ;;  %s648_s7 = scalar_lea.hbm %s890_s30, 512 }
  0x1a   : > { %p649_p2 = scmp.ne.s32.totalorder %s890_s30, %s648_s7  ;;  %p650_p3 = pneg %p896_p0 }
  0x1b   : > { %s653_s16 = scalar_lea.hbm %s1057_s0, 1024  ;;  %p654_p4 = scmp.lt.u32.totalorder %s890_s30, %s1057_s0 }
  0x1c   : > { %p651_p5 = pnand %p650_p3, %p649_p2  ;;  %p655_p7 = scmp.lt.u32.totalorder %s653_s16, %s648_s7 }
  0x1d   : > { %p657_p13 = scmp.lt.u32.totalorder %s648_s7, %s890_s30 }
  0x1e   : > { %p652_p6 = pneg %p651_p5  ;;  %p656_p10 = por %p655_p7, %p654_p4 }
  0x20   : > { %p658_p12 = por %p657_p13, %p656_p10 }
  0x22   : > { %p659_p1 = pnand %p658_p12, %p652_p6 }
  0x24   : > { %662 = shalt.err (!%p659_p1)
}
  0x25   : > { %s663_s20 = scalar_lea.vmem %s892_s4, 512  ;;  %s796_s26 = smov [#allocation2]  }
  0x26   : > { %p664_p2 = scmp.ne.s32.totalorder %s892_s4, %s663_s20  ;;  %s668_s27 = sshll.u32 %s796_s26, 4  ;;  %s669_s27 = int_to_ptr.vmem [resolvable:$false] %s668_s27 }
  0x27   : > { %s670_s28 = scalar_lea.vmem %s669_s27, 1024  ;;  %p671_p9 = scmp.lt.s32.totalorder %s892_s4, %s669_s27 }
  0x28   : > { %p666_p5 = pnand %p664_p2, %p650_p3  ;;  %p672_p4 = scmp.lt.s32.totalorder %s670_s28, %s663_s20 }
  0x2a   : > { %p667_p11 = pneg %p666_p5  ;;  %p673_p7 = por %p672_p4, %p671_p9 }
  0x2c   : > { %p674_p10 = pnand %p673_p7, %p667_p11 }
  0x2e   : > { %677 = shalt.err (!%p674_p10)
}
  0x2f   : > { %s797_s29 = smov 64   ;;  %s798_s3 = smov 4  }
  0x30   : > { %581 = dma.hbm_to_vmem [thread:$0]  (!%p896_p0), %s890_s30, 512, %s892_s4, %s134_s6, %s797_s29, %s797_s29, %s798_s3  }
  0x31   : > { %p175_p9 = scmp.lt.s32.totalorder %s794_s14, 3  ;;  %s513_s7 = sshll.u32 %s883_s25, 3 }
  0x32   : > { %s543_s8 = sshll.u32 %s790_s13, 7  ;;  %p1067_p11 = scmp.ge.s32.totalorder %s794_s14, 1 }
  0x33   : > { %s944_s19 = scalar_lea.hbm %s1058_s1, %s543_s8  ;;  %s160_s20 = scalar_lea.vmem [#allocation5], %s513_s7 }
  0x34   : > { %p937_p12 = pnand %p1067_p11, %p175_p9  ;;  %s167_s26 = sshll.u32 %s160_s20, 4  ;;  %s946_s26 = int_to_ptr.vmem [resolvable:$true] %s167_s26 }
  0x35   : > { %s157_s30 = scalar_lea.sflag [#allocation6], %s883_s25  ;;  %s678_s4 = scalar_lea.hbm %s944_s19, 128 }
  0x36   : > { %p679_p1 = scmp.ne.s32.totalorder %s944_s19, %s678_s4  ;;  %s683_s28 = scalar_lea.hbm %s1058_s1, 256 }
  0x37   : > { %p684_p2 = scmp.lt.u32.totalorder %s944_s19, %s1058_s1  ;;  %p685_p5 = scmp.lt.u32.totalorder %s683_s28, %s678_s4 }
  0x38   : > { %p681_p6 = pnand %p679_p1, %p650_p3  ;;  %p687_p7 = scmp.lt.u32.totalorder %s678_s4, %s944_s19 }
  0x39   : > { %p686_p4 = por %p685_p5, %p684_p2 }
  0x3a   : > { %p682_p13 = pneg %p681_p6 }
  0x3b   : > { %p688_p10 = por %p687_p7, %p686_p4 }
  0x3d   : > { %p689_p9 = pnand %p688_p10, %p682_p13 }
  0x3f   : > { %692 = shalt.err (!%p689_p9)
}
  0x40   : > { %s693_s7 = scalar_lea.vmem %s946_s26, 128  ;;  %s799_s18 = smov [#allocation5]  }
  0x41   : > { %p694_p11 = scmp.ne.s32.totalorder %s946_s26, %s693_s7  ;;  %s698_s20 = sshll.u32 %s799_s18, 4  ;;  %s699_s20 = int_to_ptr.vmem [resolvable:$false] %s698_s20 }
  0x42   : > { %s700_s6 = scalar_lea.vmem %s699_s20, 256  ;;  %p701_p8 = scmp.lt.s32.totalorder %s946_s26, %s699_s20 }
  0x43   : > { %p696_p1 = pnand %p694_p11, %p650_p3  ;;  %p702_p2 = scmp.lt.s32.totalorder %s700_s6, %s693_s7 }
  0x45   : > { %p697_p6 = pneg %p696_p1  ;;  %p703_p5 = por %p702_p2, %p701_p8 }
  0x47   : > { %p704_p4 = pnand %p703_p5, %p697_p6 }
  0x49   : > { %707 = shalt.err (!%p704_p4)
}
  0x4a   : > { %584 = dma.hbm_to_vmem [thread:$0]  (!%p896_p0), %s944_s19, 128, %s946_s26, %s157_s30, %s797_s29, %s797_s29, %s798_s3  }
  0x4b   : > { %179 = sbr.rel (%p937_p12) target bundleno = 327 (0x147), region = 28  ;;  %s980_s4 = sand.u32 (!%p937_p12), 1, %s778_s10  }
  0x4c   : > { %s517_s27 = sshll.u32 (!%p937_p12), %s980_s4, 5  ;;  %s182_s28 = scalar_lea.sflag (!%p937_p12), [#allocation3], %s980_s4 }
  0x4d   : > { %s185_s5 = scalar_lea.vmem (!%p937_p12), [#allocation2], %s517_s27  ;;  %p1069_p8 = scmp.ne.s32.totalorder (!%p937_p12), %s1063_s21, 0 }
  0x52   : > { %761 = dma.done.wait (%p1069_p8), %s182_s28, 512  }
  0x53   : > { %763 = vsyncadd (%p1069_p8), %s182_s28, 4294966784  ;;  %s518_s25 = sshll.u32 %s980_s4, 3  ;;  %s191_s29 = scalar_lea.sflag [#allocation6], %s980_s4 }
  0x54   : > { %s194_s3 = scalar_lea.vmem [#allocation5], %s518_s25 }
  0x55   : > { %765 = dma.done.wait (%p1069_p8), %s191_s29, 128  }
  0x56   : > { %767 = vsyncadd (%p1069_p8), %s191_s29, 4294967168  ;;  %vm258_vm0 = vcmask 130048   ;;  %v643_v0 = vld [vmem:[%s194_s3] sm:$0xff]   ;;  %v645_v3 = vld [vmem:[%s185_s5 + $0x10] sm:$0xff]   ;;  %vm371_vm1 = vcmask 125952   ;;  %s552_s21 = sshll.u32 %s786_s12, 9 }
  0x57   : > { %v644_v1 = vld [vmem:[%s185_s5] sm:$0xff]   ;;  %570 = vmatprep.subr.msk.bf16.mxu0 %vm258_vm0, %v643_v0  ;;  %571 = vmatprep.subr.msk.bf16.mxu1 %vm258_vm0, %v643_v0  ;;  %v272_v2 = vsel %vm258_vm0, %v643_v0, 0  ;;  %v646_v4 = vld [vmem:[%s185_s5 + $0x8] sm:$0xff]   ;;  %v647_v5 = vld [vmem:[%s185_s5 + $0x18] sm:$0xff]   ;;  %s219_s15 = scalar_lea.vmem [#allocation7], %s517_s27  ;;  %s1000_s30 = scalar_lea.hbm %s1059_s2, %s552_s21 }
  0x58   : > { %559 = vmatpush3.bf16.xpose.msra.mxu0 %v272_v2  ;;  %569 = vmatpush3.bf16.xpose.msra.mxu1 %v272_v2  ;;  %s396_s19 = sshll.u32 %s219_s15, 4  ;;  %s381_s8 = scalar_lea.sflag [#allocation4], %s980_s4  ;;  %s1002_s19 = int_to_ptr.vmem [resolvable:$true] %s396_s19 }
  0x59   : > { %560 = vmatprep.mubr.msk.bf16.mxu0 %vm258_vm0, %v644_v1  ;;  %564 = vmatprep.mubr.msk.bf16.mxu1 %vm258_vm0, %v645_v3  ;;  %s708_s16 = scalar_lea.vmem %s1002_s19, 512  ;;  %p1070_p3 = scmp.ne.s32.totalorder %s1064_s22, 0 }
  0x5a   : > { %p709_p0 = scmp.ne.s32.totalorder %s1002_s19, %s708_s16  ;;  %s800_s7 = smov [#allocation7]  }
  0x5b   : > { %s712_s18 = sshll.u32 %s800_s7, 4  ;;  %s713_s18 = int_to_ptr.vmem [resolvable:$false] %s712_s18 }
  0x5c   : > { %p710_p12 = pnand %p709_p0, %p1070_p3  ;;  %s714_s20 = scalar_lea.vmem %s713_s18, 1024 }
  0x5d   : > { %p715_p7 = scmp.lt.s32.totalorder %s1002_s19, %s713_s18  ;;  %p716_p10 = scmp.lt.s32.totalorder %s714_s20, %s708_s16 }
  0x5e   : > { %p711_p13 = pneg %p710_p12 }
  0x5f   : > { %561 = vmatmul.mubr.msk.bf16.vlgmr.msra.gmra.mrb[0].mxu0 %vm258_vm0, %v646_v4  ;;  %565 = vmatmul.mubr.msk.bf16.vlgmr.msra.gmra.mrb[0].mxu1 %vm258_vm0, %v647_v5  ;;  %p717_p9 = por %p716_p10, %p715_p7 }
  0x61   : > { %p718_p11 = pnand %p717_p9, %p711_p13 }
 0x132   : > { %v562_v6 = vpop.f32.mrb[0].mxu0  ;;  %v566_v7 = vpop.f32.mrb[0].mxu1 }
 0x133   : > { %v546_v8 = vpack.c.bf16 %v562_v6, %v562_v6  ;;  %v550_v9 = vpack.c.bf16 %v566_v7, %v566_v7  ;;  %v308_v10 = vpop.f32.mrb[1].mxu0  ;;  %v324_v11 = vpop.f32.mrb[1].mxu1 }
 0x134   : > { %v544_v12 = vpack.c.bf16 %v308_v10, %v308_v10  ;;  %v548_v13 = vpack.c.bf16 %v324_v11, %v324_v11  ;;  %v563_v14 = vpop.f32.mrb[2].mxu0  ;;  %v567_v15 = vpop.f32.mrb[2].mxu1 }
 0x135   : > { %374 = vst.msk [vmem:[%s219_s15 + $0x8] sm:$0xf] %vm371_vm1, %v546_v8  ;;  %378 = vst.msk [vmem:[%s219_s15 + $0x18] sm:$0xf] %vm371_vm1, %v550_v9  ;;  %v547_v16 = vpack.c.bf16 %v563_v14, %v563_v14  ;;  %v551_v17 = vpack.c.bf16 %v567_v15, %v567_v15  ;;  %v311_v18 = vpop.f32.mrb[3].mxu0  ;;  %v327_v19 = vpop.f32.mrb[3].mxu1 }
 0x136   : > { %372 = vst.msk [vmem:[%s219_s15] sm:$0xf] %vm371_vm1, %v544_v12  ;;  %376 = vst.msk [vmem:[%s219_s15 + $0x10] sm:$0xf] %vm371_vm1, %v548_v13  ;;  %v545_v20 = vpack.c.bf16 %v311_v18, %v311_v18  ;;  %v549_v21 = vpack.c.bf16 %v327_v19, %v327_v19 }
 0x137   : > { %375 = vst.msk [vmem:[%s219_s15 + $0xc] sm:$0xf] %vm371_vm1, %v547_v16  ;;  %379 = vst.msk [vmem:[%s219_s15 + $0x1c] sm:$0xf] %vm371_vm1, %v551_v17 }
 0x138   : > { %373 = vst.msk [vmem:[%s219_s15 + $0x4] sm:$0xf] %vm371_vm1, %v545_v20  ;;  %377 = vst.msk [vmem:[%s219_s15 + $0x14] sm:$0xf] %vm371_vm1, %v549_v21 }
 0x139   : > { %721 = shalt.err (!%p718_p11)
}
 0x13a   : > { %s722_s6 = scalar_lea.hbm %s1000_s30, 512  ;;  %s726_s5 = scalar_lea.hbm %s1059_s2, 1024 }
 0x13b   : > { %p723_p1 = scmp.ne.s32.totalorder %s1000_s30, %s722_s6  ;;  %p727_p5 = scmp.lt.u32.totalorder %s1000_s30, %s1059_s2 }
 0x13c   : > { %p728_p4 = scmp.lt.u32.totalorder %s726_s5, %s722_s6  ;;  %p730_p0 = scmp.lt.u32.totalorder %s722_s6, %s1000_s30 }
 0x13d   : > { %p724_p6 = pnand %p723_p1, %p1070_p3 }
 0x13e   : > { %p729_p8 = por %p728_p4, %p727_p5 }
 0x13f   : > { %p725_p2 = pneg %p724_p6 }
 0x140   : > { %p731_p12 = por %p730_p0, %p729_p8 }
 0x142   : > { %p732_p13 = pnand %p731_p12, %p725_p2 }
 0x144   : > { %735 = shalt.err (!%p732_p13)
}
 0x145   : > { %s801_s3 = smov 64   ;;  %s802_s21 = smov 4  }
 0x146   : > { %576 = dma.vmem_to_hbm [thread:$0]  (%p1070_p3), %s1002_s19, 512, %s1000_s30, %s381_s8, %s801_s3, %s801_s3, %s802_s21  }
 0x147 PF: > { %s411_s15 = sand.u32 1, %s774_s9   ;;  %p1071_p7 = scmp.ne.s32.totalorder %s1065_s24, 0 }
 0x148   : > { %p1072_p10 = scmp.ge.s32.totalorder %s794_s14, 2  ;;  %s412_s12 = scalar_lea.sflag [#allocation4], %s411_s15 }
 0x14a   : > { %p586_p9 = pnand %p1072_p10, %p1071_p7 }
 0x14c   : > { %769 = dma.done.wait (!%p586_p9), %s412_s12, 512  }
 0x14d   : > { %771 = vsyncadd (!%p586_p9), %s412_s12, 4294966784  ;;  %s21_s14 = sadd.s32 1, %s794_s14   ;;  %s1073_s9 = smov %s778_s10 }
 0x14e   : > { %p18_p11 = scmp.ge.s32.totalorder %s21_s14, 4   ;;  %s1074_s10 = smov %s782_s11 }
 0x14f   : > { %s1075_s11 = smov %s874_s23  ;;  %s1076_s12 = smov %s790_s13 }
 0x150   : > { %s1077_s13 = smov %s1079_s17  ;;  %20 = sbr.rel (!%p18_p11) target bundleno = 8 (0x8), region = 86 }
 0x157   :  { %417 = vsyncpa [#allocation3], 1 }
 0x158   :  { %419 = vsyncpa [#allocation3 + $0x1], 1 }
 0x159   :  { %420 = vsyncpa [#allocation6], 1 }
 0x15a   :  { %422 = vsyncpa [#allocation6 + $0x1], 1 }
 0x15b   :  { %423 = vsyncpa [#allocation4], 1 }
 0x15c   :  { %425 = vsyncpa [#allocation4 + $0x1], 1 }

// kernel: _lambda_.5
= control target key start
LH: loop header
LB: loop body
LE: loop exit
PB: predicated region body
PF: predicated region fallthrough
CT: control target
= control target key end

     0   :  { %9 = vsyncpa [#allocation3], 0  ;;  %s1442_s0 = inlined_call_operand.hbm [shape: f32[2,64,8], index: 0, kind: input, shape index: {}]   ;;  %s1443_s1 = inlined_call_operand.hbm [shape: f32[1,8], index: 1, kind: input, shape index: {}]   ;;  %s1444_s2 = inlined_call_operand.hbm [shape: f32[1,8], index: 2, kind: input, shape index: {}]   ;;  %s1445_s3 = inlined_call_operand.hbm [shape: bf16[8,32], index: 3, kind: input, shape index: {}]   ;;  %s1446_s4 = inlined_call_operand.hbm [shape: bf16[2,64,32], index: 4, kind: output, shape index: {}]  }
   0x1   :  { %11 = vsyncpa [#allocation3 + $0x1], 0 }
   0x2   :  { %12 = vsyncpa [#allocation6], 0 }
   0x3   :  { %13 = vsyncpa [#allocation9], 0 }
   0x4   :  { %14 = vsyncpa [#allocation4], 0 }
   0x5   :  { %16 = vsyncpa [#allocation4 + $0x1], 0  ;;  %s1095_s15 = smov 0   ;;  %s1097_s16 = smov 0  }
   0x6   :  { %s1099_s17 = smov 0   ;;  %s1101_s18 = smov 0  }
   0x7   :  { %s1103_s19 = smov 0   ;;  %s1105_s20 = smov 0  }
   0x8 LB: > { %s678_s21 = sadd.s32 4294967295, %s1059_s20   ;;  %s679_s22 = sadd.s32 4294967294, %s1059_s20   ;;  %s1059_s20 = sphi %s1105_s20, %s22_s20   ;;  %s1055_s19 = sphi %s1103_s19, %s1470_s19   ;;  %s1051_s18 = sphi %s1101_s18, %s1469_s18   ;;  %s1047_s17 = sphi %s1099_s17, %s1468_s17   ;;  %s1043_s16 = sphi %s1097_s16, %s1467_s16   ;;  %s1039_s15 = sphi %s1095_s15, %s1466_s15  }
   0x9   : > { %p56_p0 = scmp.ne.s32.totalorder %s1043_s16, %s1039_s15  ;;  %p1129_p1 = scmp.eq.s32.totalorder %s678_s21, 0 }
   0xa   : > { %p1133_p2 = scmp.eq.s32.totalorder %s678_s21, 1  ;;  %p151_p3 = scmp.eq.s32.totalorder %s679_s22, 1 }
   0xb   : > { %s1451_s23 = scalar_select %p1129_p1, 1, 0 }
   0xc   : > { %s1452_s24 = scalar_select %p1133_p2, 1, 0 }
   0xd   : > { %p1139_p4 = por %p1129_p1, %p56_p0  ;;  %p680_p5 = scmp.ge.s32.totalorder %s1059_s20, 1 }
   0xe   : > { %p1144_p6 = por %p151_p3, %p56_p0  ;;  %p158_p7 = scmp.lt.s32.totalorder %s1059_s20, 3 }
   0xf   : > { %s1453_s25 = scalar_select %p1139_p4, 1, 0 }
  0x10   : > { %s1454_s26 = scalar_select %p1144_p6, 1, 0 }
  0x11   : > { %p1149_p8 = pnand %p680_p5, %p158_p7  ;;  %s1061_s28 = smov [#allocation5]  }
  0x12   : > { %s171_s29 = sshll.u32 %s1061_s28, 4  ;;  %s1062_s30 = smov [#allocation7]   ;;  %s172_s29 = int_to_ptr.vmem [resolvable:$true] %s171_s29 }
  0x13   : > { %s1455_s27 = scalar_select %p1149_p8, 1, 0 }
  0x14   : > { %p758_p10 = pneg %p1149_p8  ;;  %s182_s5 = sshll.u32 %s1062_s30, 4  ;;  %s1162_s5 = int_to_ptr.vmem [resolvable:$true] %s182_s5 }
  0x15   : > { %s1063_s7 = smov [#allocation8]   ;;  %s855_s11 = scalar_lea.hbm %s1443_s1, 16 }
  0x16   : > { %p1158_p11 = pnand %p758_p10, %p1129_p1  ;;  %s193_s8 = sshll.u32 %s1063_s7, 4  ;;  %s1164_s8 = int_to_ptr.vmem [resolvable:$true] %s193_s8 }
  0x17   : > { %p856_p12 = scmp.ne.s32.totalorder %s1443_s1, %s855_s11  ;;  %p862_p5 = scmp.lt.u32.totalorder %s855_s11, %s1443_s1 }
  0x18   : > { %p1174_p13 = pneg %p1158_p11 }
  0x1a   : > { %p858_p0 = pnand %p1174_p13, %p856_p12 }
  0x1c   : > { %p859_p3 = pneg %p858_p0 }
  0x1e   : > { %p864_p7 = pnand %p862_p5, %p859_p3 }
  0x20   : > { %867 = shalt.err (!%p864_p7)
}
  0x21   : > { %s868_s28 = scalar_lea.vmem %s172_s29, 16  ;;  %s875_s30 = scalar_lea.vmem %s172_s29, 32 }
  0x22   : > { %p869_p10 = scmp.ne.s32.totalorder %s172_s29, %s868_s28  ;;  %p876_p1 = scmp.lt.s32.totalorder %s172_s29, %s172_s29 }
  0x23   : > { %p877_p4 = scmp.lt.s32.totalorder %s875_s30, %s868_s28 }
  0x24   : > { %p871_p9 = pnand %p869_p10, %p1174_p13 }
  0x25   : > { %p878_p8 = por %p877_p4, %p876_p1 }
  0x26   : > { %p872_p6 = pneg %p871_p9 }
  0x28   : > { %p879_p2 = pnand %p878_p8, %p872_p6 }
  0x2a   : > { %882 = shalt.err (!%p879_p2)
}
  0x2b   : > { %761 = dma.hbm_to_vmem [thread:$0]  (!%p1158_p11), %s1443_s1, 16, %s172_s29, [#allocation6]  }
  0x2c   : > { %s883_s12 = scalar_lea.hbm %s1444_s2, 16 }
  0x2d   : > { %p884_p9 = scmp.ne.s32.totalorder %s1444_s2, %s883_s12  ;;  %p890_p2 = scmp.lt.u32.totalorder %s883_s12, %s1444_s2 }
  0x2f   : > { %p886_p12 = pnand %p884_p9, %p1174_p13 }
  0x31   : > { %p887_p1 = pneg %p886_p12 }
  0x33   : > { %p892_p4 = pnand %p890_p2, %p887_p1 }
  0x35   : > { %895 = shalt.err (!%p892_p4)
}
  0x36   : > { %s896_s29 = scalar_lea.vmem %s1162_s5, 16  ;;  %s903_s30 = scalar_lea.vmem %s1162_s5, 32 }
  0x37   : > { %p897_p6 = scmp.ne.s32.totalorder %s1162_s5, %s896_s29  ;;  %p904_p3 = scmp.lt.s32.totalorder %s1162_s5, %s1162_s5 }
  0x38   : > { %p905_p5 = scmp.lt.s32.totalorder %s903_s30, %s896_s29 }
  0x39   : > { %p899_p8 = pnand %p897_p6, %p1174_p13 }
  0x3a   : > { %p906_p7 = por %p905_p5, %p904_p3 }
  0x3b   : > { %p900_p0 = pneg %p899_p8 }
  0x3d   : > { %p907_p10 = pnand %p906_p7, %p900_p0 }
  0x3f   : > { %910 = shalt.err (!%p907_p10)
}
  0x40   : > { %764 = dma.hbm_to_vmem [thread:$0]  (!%p1158_p11), %s1444_s2, 16, %s1162_s5, [#allocation6]  }
  0x41   : > { %s911_s12 = scalar_lea.hbm %s1445_s3, 64 }
  0x42   : > { %p912_p9 = scmp.ne.s32.totalorder %s1445_s3, %s911_s12  ;;  %p918_p2 = scmp.lt.u32.totalorder %s911_s12, %s1445_s3 }
  0x44   : > { %p914_p12 = pnand %p912_p9, %p1174_p13 }
  0x46   : > { %p915_p1 = pneg %p914_p12 }
  0x48   : > { %p920_p4 = pnand %p918_p2, %p915_p1 }
  0x4a   : > { %923 = shalt.err (!%p920_p4)
}
  0x4b   : > { %s924_s5 = scalar_lea.vmem %s1164_s8, 64  ;;  %p932_p3 = scmp.lt.s32.totalorder %s1164_s8, %s1164_s8 }
  0x4c   : > { %p925_p6 = scmp.ne.s32.totalorder %s1164_s8, %s924_s5  ;;  %p933_p5 = scmp.lt.s32.totalorder %s924_s5, %s924_s5 }
  0x4e   : > { %p927_p8 = pnand %p925_p6, %p1174_p13  ;;  %p934_p7 = por %p933_p5, %p932_p3 }
  0x50   : > { %p928_p0 = pneg %p927_p8 }
  0x52   : > { %p935_p10 = pnand %p934_p7, %p928_p0 }
  0x54   : > { %938 = shalt.err (!%p935_p10)
}
  0x55   : > { %767 = dma.hbm_to_vmem [thread:$0]  (!%p1158_p11), %s1445_s3, 64, %s1164_s8, [#allocation9]  }
  0x56   : > { %s43_s14 = sadd.s32 1, %s1047_s17  ;;  %s34_s7 = sadd.s32 1, %s1055_s19 }
  0x57   : > { %p50_p13 = scmp.ne.s32.totalorder %s1047_s17, %s1043_s16  ;;  %p36_p9 = scmp.ge.s32.totalorder %s34_s7, 2 }
  0x58   : > { %p51_p12 = scmp.eq.s32.totalorder %s1059_s20, 0  ;;  %p1458_p1 = scmp.ne.s32.totalorder %s1452_s24, 0 }
  0x59   : > { %p779_p4 = scmp.lt.s32.totalorder %s1059_s20, 2  ;;  %s1472_s7 = smov (%p36_p9, %s34_s7), 0 }
  0x5a   : > { %p1244_p2 = por %p1458_p1, %p50_p13  ;;  %p52_p6 = por %p51_p12, %p50_p13 }
  0x5b   : > { %s204_s9 = sand.u32 1, %s1047_s17   ;;  %s38_s10 = ssub.s32 %s1055_s19, %s1472_s7 }
  0x5c   : > { %p41_p8 = scmp.eq.s32.totalorder %s38_s10, 0  ;;  %s685_s8 = sshll.u32 %s204_s9, 6 }
  0x5d   : > { %s713_s11 = sshll.u32 %s1055_s19, 10  ;;  %s208_s22 = scalar_lea.vmem [#allocation2], %s685_s8 }
  0x5e   : > { %s1256_s12 = scalar_select %p41_p8, %s1047_s17, %s43_s14  }
  0x5f   : > { %s1261_s24 = scalar_lea.hbm %s1442_s0, %s713_s11  ;;  %s217_s28 = sshll.u32 %s208_s22, 4  ;;  %s1263_s28 = int_to_ptr.vmem [resolvable:$true] %s217_s28 }
  0x60   : > { %p1267_p11 = pnand %p779_p4, %p52_p6  ;;  %s1271_s29 = scalar_lea.sflag [#allocation3], %s204_s9 }
  0x61   : > { %s939_s30 = scalar_lea.hbm %s1261_s24, 1024  ;;  %s944_s8 = scalar_lea.hbm %s1442_s0, 2048 }
  0x62   : > { %p940_p0 = scmp.ne.s32.totalorder %s1261_s24, %s939_s30  ;;  %p941_p3 = pneg %p1267_p11 }
  0x63   : > { %p945_p10 = scmp.lt.u32.totalorder %s1261_s24, %s1442_s0  ;;  %p946_p13 = scmp.lt.u32.totalorder %s944_s8, %s939_s30 }
  0x64   : > { %p942_p5 = pnand %p941_p3, %p940_p0  ;;  %p948_p12 = scmp.lt.u32.totalorder %s939_s30, %s1261_s24 }
  0x65   : > { %p947_p9 = por %p946_p13, %p945_p10 }
  0x66   : > { %p943_p7 = pneg %p942_p5 }
  0x67   : > { %p949_p1 = por %p948_p12, %p947_p9 }
  0x69   : > { %p950_p4 = pnand %p949_p1, %p943_p7 }
  0x6b   : > { %953 = shalt.err (!%p950_p4)
}
  0x6c   : > { %s954_s9 = scalar_lea.vmem %s1263_s28, 1024  ;;  %s1064_s21 = smov [#allocation2]  }
  0x6d   : > { %p955_p6 = scmp.ne.s32.totalorder %s1263_s28, %s954_s9  ;;  %s959_s22 = sshll.u32 %s1064_s21, 4  ;;  %s960_s22 = int_to_ptr.vmem [resolvable:$false] %s959_s22 }
  0x6e   : > { %s961_s14 = scalar_lea.vmem %s960_s22, 2048  ;;  %p962_p5 = scmp.lt.s32.totalorder %s1263_s28, %s960_s22 }
  0x6f   : > { %p957_p8 = pnand %p955_p6, %p941_p3  ;;  %p963_p10 = scmp.lt.s32.totalorder %s961_s14, %s954_s9 }
  0x71   : > { %p958_p0 = pneg %p957_p8  ;;  %p964_p13 = por %p963_p10, %p962_p5 }
  0x73   : > { %p965_p9 = pnand %p964_p13, %p958_p0 }
  0x75   : > { %968 = shalt.err (!%p965_p9)
}
  0x76   : > { %s1065_s30 = smov 128   ;;  %s1066_s10 = smov 8  }
  0x77   : > { %771 = dma.hbm_to_vmem [thread:$0]  (!%p1267_p11), %s1261_s24, 1024, %s1263_s28, %s1271_s29, %s1065_s30, %s1065_s30, %s1066_s10  }
  0x78   : > { %p1461_p3 = scmp.ne.s32.totalorder %s1455_s27, 0 }
  0x79   : > { %s1302_s8 = sand.u32 (!%p1461_p3), 1, %s1043_s16   ;;  %p1462_p7 = scmp.ne.s32.totalorder (!%p1461_p3), %s1453_s25, 0 }
  0x7a   : > { %229 = sbr.rel (%p1461_p3) target bundleno = 699 (0x2bb), region = 36  ;;  %s689_s11 = sshll.u32 (!%p1461_p3), %s1302_s8, 6 }
  0x7b   : > { %s232_s13 = scalar_lea.sflag (!%p1461_p3), [#allocation3], %s1302_s8  ;;  %s235_s9 = scalar_lea.vmem (!%p1461_p3), [#allocation2], %s689_s11 }
  0x81   : > { %1022 = dma.done.wait (%p1462_p7), %s232_s13, 1024  }
  0x82   : > { %1024 = vsyncadd (%p1462_p7), %s232_s13, 4294966272  ;;  %p1463_p12 = scmp.ne.s32.totalorder %s1451_s23, 0 }
  0x84   : > { %1026 = dma.done.wait (%p1463_p12), [#allocation6], 32  }
  0x85   : > { %1028 = vsyncadd (%p1463_p12), [#allocation6], 4294967264 }
  0x86   : > { %1030 = dma.done.wait (%p1463_p12), [#allocation9], 64  }
  0x87   : > { %1032 = vsyncadd (%p1463_p12), [#allocation9], 4294967232  ;;  %vm283_vm0 = vcmask 64512   ;;  %v275_v0 = vld [vmem:[%s235_s9] sm:$0xff]  ;;  %v276_v2 = vld [vmem:[%s235_s9 + $0x8] sm:$0xff]  ;;  %vm436_vm1 = vcmask 1043456  }
  0x88   : > { %v279_v1 = vld [vmem:[%s235_s9 + $0x20] sm:$0xff]  ;;  %v284_v3 = vsel %vm283_vm0, %v275_v0, 0.0  ;;  %v280_v5 = vld [vmem:[%s235_s9 + $0x28] sm:$0xff]  ;;  %v287_v6 = vsel %vm283_vm0, %v276_v2, 0.0  ;;  %v277_v8 = vld [vmem:[%s235_s9 + $0x10] sm:$0xff]  ;;  %s693_s23 = sshll.u32 %s1302_s8, 5 }
  0x89   : > { %v296_v4 = vsel %vm283_vm0, %v279_v1, 0.0  ;;  %285 = vadd.xlane.f32.xlu0 %v284_v3  ;;  %v299_v7 = vsel %vm283_vm0, %v280_v5, 0.0  ;;  %v278_v9 = vld [vmem:[%s235_s9 + $0x18] sm:$0xff]  ;;  %v290_v10 = vsel %vm283_vm0, %v277_v8, 0.0  ;;  %v281_v12 = vld [vmem:[%s235_s9 + $0x30] sm:$0xff]  ;;  %vm537_vm2 = vcmask 257024  }
  0x8a   : > { %297 = vadd.xlane.f32.xlu1 %v296_v4  ;;  %v293_v11 = vsel %vm283_vm0, %v278_v9, 0.0  ;;  %v282_v13 = vld [vmem:[%s235_s9 + $0x38] sm:$0xff]  ;;  %v302_v14 = vsel %vm283_vm0, %v281_v12, 0.0  ;;  %v423_v56 = vld [vmem:[#allocation8] sm:$0xf]  ;;  %s271_s25 = scalar_lea.vmem [#allocation10], %s693_s23 }
  0x8b   : > { %v305_v15 = vsel %vm283_vm0, %v282_v13, 0.0  ;;  %740 = vmatprep.subr.msk.bf16.mxu0 %vm436_vm1, %v423_v56  ;;  %v438_v57 = vsel %vm436_vm1, %v423_v56, 0  ;;  %741 = vmatprep.subr.msk.bf16.mxu1 %vm436_vm1, %v423_v56  ;;  %s722_s27 = sshll.u32 %s1051_s18, 9  ;;  %s562_s24 = sshll.u32 %s271_s25, 4  ;;  %s1390_s24 = int_to_ptr.vmem [resolvable:$true] %s562_s24 }
  0x8c   : > { %729 = vmatpush3.bf16.msra.mxu0 %v438_v57  ;;  %739 = vmatpush3.bf16.msra.mxu1 %v438_v57  ;;  %s1388_s29 = scalar_lea.hbm %s1446_s4, %s722_s27  ;;  %s547_s18 = scalar_lea.sflag [#allocation4], %s1302_s8 }
  0x8d   : > { %288 = vadd.xlane.f32.xlu0 %v287_v6  ;;  %s969_s21 = scalar_lea.vmem %s1390_s24, 512  ;;  %s1067_s22 = smov [#allocation10]  }
  0x8e   : > { %300 = vadd.xlane.f32.xlu1 %v299_v7  ;;  %p970_p11 = scmp.ne.s32.totalorder %s1390_s24, %s969_s21  ;;  %s973_s14 = sshll.u32 %s1067_s22, 4  ;;  %s974_s14 = int_to_ptr.vmem [resolvable:$false] %s973_s14 }
  0x8f   : > { %s975_s30 = scalar_lea.vmem %s974_s14, 1024  ;;  %p976_p6 = scmp.lt.s32.totalorder %s1390_s24, %s974_s14 }
  0x90   : > { %p971_p1 = pnand %p970_p11, %p1244_p2  ;;  %p977_p8 = scmp.lt.s32.totalorder %s975_s30, %s969_s21 }
  0x91   : > { %291 = vadd.xlane.f32.xlu0 %v290_v10 }
  0x92   : > { %294 = vadd.xlane.f32.xlu1 %v293_v11  ;;  %p972_p4 = pneg %p971_p1  ;;  %p978_p0 = por %p977_p8, %p976_p6 }
  0x94   : > { %p979_p5 = pnand %p978_p0, %p972_p4 }
  0x95   : > { %303 = vadd.xlane.f32.xlu0 %v302_v14 }
  0x96   : > { %306 = vadd.xlane.f32.xlu1 %v305_v15 }
 0x116   : > { %v286_v16 = vpop.xlane.xlu0 %285 }
 0x117   : > { %v298_v17 = vpop.xlane.xlu1 %297  ;;  %v309_v18 = vmul.f32 0.125, %v286_v16 }
 0x118   : > { %v313_v19 = vmul.f32 0.125, %v298_v17 }
 0x119   : > { %v1326_v20 = vsub.f32 %v275_v0, %v309_v18 }
 0x11a   : > { %v1328_v21 = vsub.f32 %v279_v1, %v313_v19  ;;  %v289_v22 = vpop.xlane.xlu0 %288  ;;  %v694_v19 = vld [vmem:[#allocation5] ss:$0 sm:$0xff] }
 0x11b   : > { %v301_v23 = vpop.xlane.xlu1 %300  ;;  %v310_v24 = vmul.f32 0.125, %v289_v22  ;;  %v325_v26 = vmul.f32 %v1326_v20, %v1326_v20 }
 0x11c   : > { %v314_v25 = vmul.f32 0.125, %v301_v23  ;;  %v329_v27 = vmul.f32 %v1328_v21, %v1328_v21 }
 0x11d   : > { %v1334_v28 = vsub.f32 %v276_v2, %v310_v24  ;;  %v333_v30 = vsel %vm283_vm0, %v325_v26, 0.0 }
 0x11e   : > { %v1336_v29 = vsub.f32 %v280_v5, %v314_v25  ;;  %334 = vadd.xlane.f32.xlu0 %v333_v30  ;;  %v292_v31 = vpop.xlane.xlu0 %291  ;;  %v345_v33 = vsel %vm283_vm0, %v329_v27, 0.0  ;;  %v695_v27 = vld [vmem:[#allocation7] ss:$0 sm:$0xff] }
 0x11f   : > { %v295_v32 = vpop.xlane.xlu1 %294  ;;  %v311_v34 = vmul.f32 0.125, %v292_v31  ;;  %v326_v36 = vmul.f32 %v1334_v28, %v1334_v28 }
 0x120   : > { %v312_v35 = vmul.f32 0.125, %v295_v32  ;;  %v330_v37 = vmul.f32 %v1336_v29, %v1336_v29 }
 0x121   : > { %v1344_v38 = vsub.f32 %v277_v8, %v311_v34  ;;  %v336_v40 = vsel %vm283_vm0, %v326_v36, 0.0 }
 0x122   : > { %v1346_v39 = vsub.f32 %v278_v9, %v312_v35  ;;  %346 = vadd.xlane.f32.xlu0 %v345_v33  ;;  %337 = vadd.xlane.f32.xlu1 %v336_v40  ;;  %v304_v41 = vpop.xlane.xlu0 %303  ;;  %v348_v43 = vsel %vm283_vm0, %v330_v37, 0.0 }
 0x123   : > { %v307_v42 = vpop.xlane.xlu1 %306  ;;  %v315_v44 = vmul.f32 0.125, %v304_v41  ;;  %v327_v46 = vmul.f32 %v1344_v38, %v1344_v38 }
 0x124   : > { %v316_v45 = vmul.f32 0.125, %v307_v42  ;;  %v328_v47 = vmul.f32 %v1346_v39, %v1346_v39 }
 0x125   : > { %v1354_v48 = vsub.f32 %v281_v12, %v315_v44  ;;  %v339_v50 = vsel %vm283_vm0, %v327_v46, 0.0 }
 0x126   : > { %v1356_v49 = vsub.f32 %v282_v13, %v316_v45  ;;  %349 = vadd.xlane.f32.xlu1 %v348_v43  ;;  %340 = vadd.xlane.f32.xlu0 %v339_v50  ;;  %v342_v51 = vsel %vm283_vm0, %v328_v47, 0.0 }
 0x127   : > { %v331_v52 = vmul.f32 %v1354_v48, %v1354_v48 }
 0x128   : > { %v332_v53 = vmul.f32 %v1356_v49, %v1356_v49 }
 0x129   : > { %v351_v54 = vsel %vm283_vm0, %v331_v52, 0.0 }
 0x12a   : > { %343 = vadd.xlane.f32.xlu1 %v342_v51  ;;  %352 = vadd.xlane.f32.xlu0 %v351_v54  ;;  %v354_v55 = vsel %vm283_vm0, %v332_v53, 0.0 }
 0x12e   : > { %355 = vadd.xlane.f32.xlu1 %v354_v55 }
 0x1ab   : > { %v335_v58 = vpop.xlane.xlu0 %334 }
 0x1ac   : > { %v357_v59 = vmul.f32 0.125, %v335_v58 }
 0x1ae   : > { %v365_v60 = vadd.f32 1e-05, %v357_v59 }
 0x1af   : > { %v338_v61 = vpop.xlane.xlu1 %337  ;;  %v347_v62 = vpop.xlane.xlu0 %346 }
 0x1b0   : > { %839 = vrsqrt.f32 %v365_v60  ;;  %v358_v63 = vmul.f32 0.125, %v338_v61  ;;  %v361_v0 = vmul.f32 0.125, %v347_v62 }
 0x1b2   : > { %v366_v1 = vadd.f32 1e-05, %v358_v63  ;;  %v369_v2 = vadd.f32 1e-05, %v361_v0 }
 0x1b3   : > { %v350_v3 = vpop.xlane.xlu1 %349  ;;  %v341_v4 = vpop.xlane.xlu0 %340 }
 0x1b4   : > { %841 = vrsqrt.f32 %v366_v1  ;;  %v362_v5 = vmul.f32 0.125, %v350_v3  ;;  %v359_v6 = vmul.f32 0.125, %v341_v4 }
 0x1b5   : > { %843 = vrsqrt.f32 %v369_v2 }
 0x1b6   : > { %v370_v7 = vadd.f32 1e-05, %v362_v5  ;;  %v367_v8 = vadd.f32 1e-05, %v359_v6 }
 0x1b7   : > { %v344_v9 = vpop.xlane.xlu1 %343  ;;  %v353_v10 = vpop.xlane.xlu0 %352 }
 0x1b8   : > { %845 = vrsqrt.f32 %v370_v7  ;;  %v360_v11 = vmul.f32 0.125, %v344_v9  ;;  %v363_v12 = vmul.f32 0.125, %v353_v10 }
 0x1b9   : > { %847 = vrsqrt.f32 %v367_v8 }
 0x1ba   : > { %v840_v13 = vpop.eup %839  ;;  %v368_v14 = vadd.f32 1e-05, %v360_v11  ;;  %v371_v15 = vadd.f32 1e-05, %v363_v12 }
 0x1bb   : > { %v356_v16 = vpop.xlane.xlu1 %355  ;;  %v381_v17 = vmul.f32 %v840_v13, %v1326_v20 }
 0x1bc   : > { %849 = vrsqrt.f32 %v368_v14  ;;  %v364_v18 = vmul.f32 0.125, %v356_v16 }
 0x1bd   : > { %851 = vrsqrt.f32 %v371_v15  ;;  %v396_v26 = vmul.f32 %v694_v19, %v381_v17 }
 0x1be   : > { %v842_v22 = vpop.eup %841  ;;  %v372_v23 = vadd.f32 1e-05, %v364_v18 }
 0x1bf   : > { %v844_v24 = vpop.eup %843  ;;  %v382_v25 = vmul.f32 %v842_v22, %v1334_v28  ;;  %v411_v34 = vadd.f32 %v695_v27, %v396_v26 }
 0x1c0   : > { %853 = vrsqrt.f32 %v372_v23  ;;  %v385_v30 = vmul.f32 %v844_v24, %v1328_v21 }
 0x1c1   : > { %v397_v31 = vmul.f32 %v694_v19, %v382_v25 }
 0x1c2   : > { %v846_v32 = vpop.eup %845  ;;  %v400_v36 = vmul.f32 %v694_v19, %v385_v30 }
 0x1c3   : > { %v848_v33 = vpop.eup %847  ;;  %v412_v35 = vadd.f32 %v695_v27, %v397_v31  ;;  %v386_v20 = vmul.f32 %v846_v32, %v1336_v29 }
 0x1c4   : > { %v383_v37 = vmul.f32 %v848_v33, %v1344_v38  ;;  %v415_v44 = vadd.f32 %v695_v27, %v400_v36 }
 0x1c5   : > { %v419_v40 = vpack.c.bf16 %v412_v35, %v411_v34  ;;  %v401_v41 = vmul.f32 %v694_v19, %v386_v20 }
 0x1c6   : > { %v850_v42 = vpop.eup %849  ;;  %v398_v45 = vmul.f32 %v694_v19, %v383_v37 }
 0x1c7   : > { %v852_v43 = vpop.eup %851  ;;  %v384_v28 = vmul.f32 %v850_v42, %v1346_v39  ;;  %730 = vmatprep.mubr.msk.bf16.mxu0 %vm283_vm0, %v419_v40  ;;  %v416_v21 = vadd.f32 %v695_v27, %v401_v41 }
 0x1c8   : > { %v387_v46 = vmul.f32 %v852_v43, %v1354_v48  ;;  %v413_v38 = vadd.f32 %v695_v27, %v398_v45 }
 0x1c9   : > { %v421_v47 = vpack.c.bf16 %v416_v21, %v415_v44  ;;  %v399_v50 = vmul.f32 %v694_v19, %v384_v28 }
 0x1ca   : > { %v854_v29 = vpop.eup %853  ;;  %v402_v53 = vmul.f32 %v694_v19, %v387_v46 }
 0x1cb   : > { %v388_v51 = vmul.f32 %v854_v29, %v1356_v49  ;;  %734 = vmatprep.mubr.msk.bf16.mxu1 %vm283_vm0, %v421_v47  ;;  %v414_v52 = vadd.f32 %v695_v27, %v399_v50 }
 0x1cc   : > { %v417_v55 = vadd.f32 %v695_v27, %v402_v53 }
 0x1cd   : > { %v420_v54 = vpack.c.bf16 %v414_v52, %v413_v38  ;;  %v403_v39 = vmul.f32 %v694_v19, %v388_v51 }
 0x1cf   : > { %731 = vmatmul.mubr.msk.bf16.vlgmr.msra.gmra.mrb[0].mxu0 %vm283_vm0, %v420_v54  ;;  %v418_v56 = vadd.f32 %v695_v27, %v403_v39 }
 0x1d1   : > { %v422_v57 = vpack.c.bf16 %v418_v56, %v417_v55 }
 0x1d3   : > { %735 = vmatmul.mubr.msk.bf16.vlgmr.msra.gmra.mrb[0].mxu1 %vm283_vm0, %v422_v57 }
 0x2a2   : > { %v732_v48 = vpop.f32.mrb[0].mxu0 }
 0x2a3   : > { %v716_v58 = vpack.c.bf16 %v732_v48, %v732_v48  ;;  %v474_v49 = vpop.f32.mrb[1].mxu0 }
 0x2a4   : > { %v714_v59 = vpack.c.bf16 %v474_v49, %v474_v49  ;;  %v733_v60 = vpop.f32.mrb[2].mxu0 }
 0x2a5   : > { %540 = vst.msk [vmem:[%s271_s25 + $0x8] sm:$0xf] %vm537_vm2, %v716_v58  ;;  %v717_v61 = vpack.c.bf16 %v733_v60, %v733_v60  ;;  %v477_v62 = vpop.f32.mrb[3].mxu0 }
 0x2a6   : > { %538 = vst.msk [vmem:[%s271_s25] sm:$0xf] %vm537_vm2, %v714_v59  ;;  %v715_v63 = vpack.c.bf16 %v477_v62, %v477_v62  ;;  %v736_v0 = vpop.f32.mrb[0].mxu1 }
 0x2a7   : > { %541 = vst.msk [vmem:[%s271_s25 + $0xc] sm:$0xf] %vm537_vm2, %v717_v61  ;;  %v720_v1 = vpack.c.bf16 %v736_v0, %v736_v0  ;;  %v490_v2 = vpop.f32.mrb[1].mxu1 }
 0x2a8   : > { %539 = vst.msk [vmem:[%s271_s25 + $0x4] sm:$0xf] %vm537_vm2, %v715_v63  ;;  %v718_v3 = vpack.c.bf16 %v490_v2, %v490_v2  ;;  %v737_v4 = vpop.f32.mrb[2].mxu1 }
 0x2a9   : > { %544 = vst.msk [vmem:[%s271_s25 + $0x18] sm:$0xf] %vm537_vm2, %v720_v1  ;;  %v721_v5 = vpack.c.bf16 %v737_v4, %v737_v4  ;;  %v493_v6 = vpop.f32.mrb[3].mxu1 }
 0x2aa   : > { %542 = vst.msk [vmem:[%s271_s25 + $0x10] sm:$0xf] %vm537_vm2, %v718_v3  ;;  %v719_v7 = vpack.c.bf16 %v493_v6, %v493_v6 }
 0x2ab   : > { %545 = vst.msk [vmem:[%s271_s25 + $0x1c] sm:$0xf] %vm537_vm2, %v721_v5 }
 0x2ac   : > { %543 = vst.msk [vmem:[%s271_s25 + $0x14] sm:$0xf] %vm537_vm2, %v719_v7 }
 0x2ad   : > { %982 = shalt.err (!%p979_p5)
}
 0x2ae   : > { %s983_s10 = scalar_lea.hbm %s1388_s29, 512  ;;  %s987_s9 = scalar_lea.hbm %s1446_s4, 1024 }
 0x2af   : > { %p984_p10 = scmp.ne.s32.totalorder %s1388_s29, %s983_s10  ;;  %p988_p3 = scmp.lt.u32.totalorder %s1388_s29, %s1446_s4 }
 0x2b0   : > { %p989_p7 = scmp.lt.u32.totalorder %s987_s9, %s983_s10  ;;  %p991_p11 = scmp.lt.u32.totalorder %s983_s10, %s1388_s29 }
 0x2b1   : > { %p985_p13 = pnand %p984_p10, %p1244_p2 }
 0x2b2   : > { %p990_p12 = por %p989_p7, %p988_p3 }
 0x2b3   : > { %p986_p9 = pneg %p985_p13 }
 0x2b4   : > { %p992_p1 = por %p991_p11, %p990_p12 }
 0x2b6   : > { %p993_p4 = pnand %p992_p1, %p986_p9 }
 0x2b8   : > { %996 = shalt.err (!%p993_p4)
}
 0x2b9   : > { %s1068_s27 = smov 64   ;;  %s1069_s28 = smov 4  }
 0x2ba   : > { %756 = dma.vmem_to_hbm [thread:$0]  (%p1244_p2), %s1390_s24, 512, %s1388_s29, %s547_s18, %s1068_s27, %s1068_s27, %s1069_s28  }
 0x2bb PF: > { %s577_s5 = sand.u32 1, %s1039_s15   ;;  %p1464_p6 = scmp.ne.s32.totalorder %s1454_s26, 0 }
 0x2bc   : > { %p1465_p8 = scmp.ge.s32.totalorder %s1059_s20, 2  ;;  %s578_s21 = scalar_lea.sflag [#allocation4], %s577_s5 }
 0x2be   : > { %p773_p0 = pnand %p1465_p8, %p1464_p6 }
 0x2c0   : > { %1034 = dma.done.wait (!%p773_p0), %s578_s21, 512  }
 0x2c1   : > { %1036 = vsyncadd (!%p773_p0), %s578_s21, 4294966784  ;;  %s22_s20 = sadd.s32 1, %s1059_s20   ;;  %s1466_s15 = smov %s1043_s16 }
 0x2c2   : > { %p19_p5 = scmp.ge.s32.totalorder %s22_s20, 4   ;;  %s1467_s16 = smov %s1047_s17 }
 0x2c3   : > { %s1468_s17 = smov %s1256_s12  ;;  %s1469_s18 = smov %s1055_s19 }
 0x2c4   : > { %s1470_s19 = smov %s1472_s7  ;;  %21 = sbr.rel (!%p19_p5) target bundleno = 8 (0x8), region = 93 }
 0x2cb   :  { %583 = vsyncpa [#allocation3], 1 }
 0x2cc   :  { %585 = vsyncpa [#allocation3 + $0x1], 1 }
 0x2cd   :  { %586 = vsyncpa [#allocation6], 1 }
 0x2ce   :  { %587 = vsyncpa [#allocation9], 1 }
 0x2cf   :  { %588 = vsyncpa [#allocation4], 1 }
 0x2d0   :  { %590 = vsyncpa [#allocation4 + $0x1], 1 }

// kernel: _lambda_.6
= control target key start
LH: loop header
LB: loop body
LE: loop exit
PB: predicated region body
PF: predicated region fallthrough
CT: control target
= control target key end

     0   :  { %s2845_s0 = inlined_call_operand.hbm [shape: bf16[2,64,32], index: 0, kind: input, shape index: {}, may-alias: {0,1}]   ;;  %s2846_s1 = inlined_call_operand.hbm [shape: bf16[2,64,32], index: 1, kind: input, shape index: {}, may-alias: {0,1}]   ;;  %s2847_s2 = inlined_call_operand.hbm [shape: f32[4,16], index: 2, kind: input, shape index: {}]   ;;  %s2848_s3 = inlined_call_operand.hbm [shape: f32[1,16], index: 3, kind: input, shape index: {}]   ;;  %s2849_s4 = inlined_call_operand.hbm [shape: bf16[16,8], index: 4, kind: input, shape index: {}]   ;;  %s2850_s5 = inlined_call_operand.hbm [shape: bf16[2,64,16], index: 5, kind: output, shape index: {0}]   ;;  %s2851_s6 = inlined_call_operand.hbm [shape: bf16[2,64,8], index: 6, kind: output, shape index: {1}]   ;;  %s2852_s7 = inlined_call_operand.hbm [shape: bf16[2,16,16], index: 7, kind: output, shape index: {2}]  }
   0x1   :  { %2863 = sst [smem:[#allocation25_spill]] %s2845_s0 }
   0x2   :  { %2864 = sst [smem:[#allocation26_spill]] %s2847_s2 }
   0x3   :  { %2865 = sst [smem:[#allocation27_spill]] %s2848_s3 }
   0x4   :  { %2866 = sst [smem:[#allocation28_spill]] %s2849_s4 }
   0x5   :  { %13 = vsyncpa [#allocation4], 0 }
   0x6   :  { %15 = vsyncpa [#allocation4 + $0x1], 0 }
   0x7   :  { %16 = vsyncpa [#allocation7], 0 }
   0x8   :  { %18 = vsyncpa [#allocation7 + $0x1], 0 }
   0x9   :  { %19 = vsyncpa [#allocation10], 0 }
   0xa   :  { %20 = vsyncpa [#allocation5], 0 }
   0xb   :  { %22 = vsyncpa [#allocation5 + $0x1], 0 }
   0xc   :  { %23 = vsyncpa [#allocation14], 0 }
   0xd   :  { %25 = vsyncpa [#allocation14 + $0x1], 0  ;;  %s2102_s24 = smov 0   ;;  %s2104_s25 = smov 0  }
   0xe   :  { %s2106_s26 = smov 0   ;;  %s2108_s27 = smov 0  }
   0xf   :  { %s2110_s28 = smov 0   ;;  %s2112_s29 = smov 0  }
  0x10 LB: > { %s2133_s30 = sadd.s32 4294967295, %s2045_s29   ;;  %s2856_s8 = sadd.s32 4294967294, %s2045_s29   ;;  %s2045_s29 = sphi %s2112_s29, %s31_s29   ;;  %s2041_s28 = sphi %s2110_s28, %s2903_s28   ;;  %s2037_s27 = sphi %s2108_s27, %s2902_s27   ;;  %s2033_s26 = sphi %s2106_s26, %s2901_s26   ;;  %s2029_s25 = sphi %s2104_s25, %s2900_s25   ;;  %s2025_s24 = sphi %s2102_s24, %s2899_s24  }
  0x11   : > { %p65_p0 = scmp.ne.s32.totalorder %s2029_s25, %s2025_s24  ;;  %p2853_p1 = scmp.eq.s32.totalorder %s2133_s30, 0 }
  0x12   : > { %p196_p3 = scmp.eq.s32.totalorder %s2856_s8, 1  ;;  %p1412_p5 = scmp.ge.s32.totalorder %s2045_s29, 1 }
  0x13   : > { %p2144_p4 = por %p2853_p1, %p65_p0  ;;  %p257_p7 = scmp.lt.s32.totalorder %s2045_s29, 3 }
  0x14   : > { %p2149_p6 = por %p196_p3, %p65_p0  ;;  %s2047_s12 = smov [#allocation8]  }
  0x15   : > { %s2867_s9 = scalar_select %p2144_p4, 1, 0 }
  0x16   : > { %s2868_s10 = scalar_select %p2149_p6, 1, 0 }
  0x17   : > { %p2154_p8 = pnand %p1412_p5, %p257_p7  ;;  %s270_s13 = sshll.u32 %s2047_s12, 4  ;;  %s271_s13 = int_to_ptr.vmem [resolvable:$true] %s270_s13 }
  0x18   : > { %2869 = sst [smem:[#allocation22_spill]] %s2868_s10  ;;  %s2048_s14 = smov [#allocation9]  }
  0x19   : > { %s2870_s11 = scalar_select %p2154_p8, 1, 0 }
  0x1a   : > { %p1580_p10 = pneg %p2154_p8  ;;  %s281_s15 = sshll.u32 %s2048_s14, 4  ;;  %s2167_s15 = int_to_ptr.vmem [resolvable:$true] %s281_s15 }
  0x1b   : > { %s2049_s17 = smov [#allocation11]   ;;  %s2872_s2 = sld [smem:[#allocation26_spill]] }
  0x1c   : > { %p2163_p11 = pnand %p1580_p10, %p2853_p1  ;;  %s291_s18 = sshll.u32 %s2049_s17, 4  ;;  %s2169_s18 = int_to_ptr.vmem [resolvable:$true] %s291_s18 }
  0x1e   : > { %p2179_p13 = pneg %p2163_p11 }
  0x21   : > { %s1747_s21 = scalar_lea.hbm %s2872_s2, 64 }
  0x22   : > { %p1748_p12 = scmp.ne.s32.totalorder %s2872_s2, %s1747_s21  ;;  %p1754_p5 = scmp.lt.u32.totalorder %s1747_s21, %s2872_s2 }
  0x24   : > { %p1750_p0 = pnand %p2179_p13, %p1748_p12 }
  0x26   : > { %p1751_p3 = pneg %p1750_p0 }
  0x28   : > { %p1756_p7 = pnand %p1754_p5, %p1751_p3 }
  0x2a   : > { %1759 = shalt.err (!%p1756_p7)
}
  0x2b   : > { %s1760_s19 = scalar_lea.vmem %s271_s13, 64  ;;  %p1768_p2 = scmp.lt.s32.totalorder %s271_s13, %s271_s13 }
  0x2c   : > { %p1761_p10 = scmp.ne.s32.totalorder %s271_s13, %s1760_s19  ;;  %p1769_p6 = scmp.lt.s32.totalorder %s1760_s19, %s1760_s19 }
  0x2e   : > { %p1763_p9 = pnand %p1761_p10, %p2179_p13  ;;  %p1770_p4 = por %p1769_p6, %p1768_p2 }
  0x30   : > { %p1764_p1 = pneg %p1763_p9 }
  0x32   : > { %p1771_p8 = pnand %p1770_p4, %p1764_p1 }
  0x34   : > { %1774 = shalt.err (!%p1771_p8)
}
  0x35   : > { %1583 = dma.hbm_to_vmem [thread:$0]  (!%p2163_p11), %s2872_s2, 64, %s271_s13, [#allocation7]  }
  0x36   : > { %s2874_s3 = sld [smem:[#allocation27_spill]] }
  0x3c   : > { %s1775_s14 = scalar_lea.hbm %s2874_s3, 16 }
  0x3d   : > { %p1776_p9 = scmp.ne.s32.totalorder %s2874_s3, %s1775_s14  ;;  %p1782_p1 = scmp.lt.u32.totalorder %s1775_s14, %s2874_s3 }
  0x3f   : > { %p1778_p12 = pnand %p1776_p9, %p2179_p13 }
  0x41   : > { %p1779_p2 = pneg %p1778_p12 }
  0x43   : > { %p1784_p4 = pnand %p1782_p1, %p1779_p2 }
  0x45   : > { %1787 = shalt.err (!%p1784_p4)
}
  0x46   : > { %s1788_s13 = scalar_lea.vmem %s2167_s15, 16  ;;  %s1795_s8 = scalar_lea.vmem %s2167_s15, 32 }
  0x47   : > { %p1789_p6 = scmp.ne.s32.totalorder %s2167_s15, %s1788_s13  ;;  %p1796_p3 = scmp.lt.s32.totalorder %s2167_s15, %s2167_s15 }
  0x48   : > { %p1797_p5 = scmp.lt.s32.totalorder %s1795_s8, %s1788_s13 }
  0x49   : > { %p1791_p8 = pnand %p1789_p6, %p2179_p13 }
  0x4a   : > { %p1798_p7 = por %p1797_p5, %p1796_p3 }
  0x4b   : > { %p1792_p0 = pneg %p1791_p8 }
  0x4d   : > { %p1799_p10 = pnand %p1798_p7, %p1792_p0 }
  0x4f   : > { %1802 = shalt.err (!%p1799_p10)
}
  0x50   : > { %1586 = dma.hbm_to_vmem [thread:$0]  (!%p2163_p11), %s2874_s3, 16, %s2167_s15, [#allocation10]  }
  0x51   : > { %s2875_s4 = sld [smem:[#allocation28_spill]] }
  0x57   : > { %s1803_s23 = scalar_lea.hbm %s2875_s4, 128 }
  0x58   : > { %p1804_p9 = scmp.ne.s32.totalorder %s2875_s4, %s1803_s23  ;;  %p1810_p1 = scmp.lt.u32.totalorder %s1803_s23, %s2875_s4 }
  0x5a   : > { %p1806_p12 = pnand %p1804_p9, %p2179_p13 }
  0x5c   : > { %p1807_p2 = pneg %p1806_p12 }
  0x5e   : > { %p1812_p4 = pnand %p1810_p1, %p1807_p2 }
  0x60   : > { %1815 = shalt.err (!%p1812_p4)
}
  0x61   : > { %s1816_s15 = scalar_lea.vmem %s2169_s18, 128  ;;  %p1824_p3 = scmp.lt.s32.totalorder %s2169_s18, %s2169_s18 }
  0x62   : > { %p1817_p6 = scmp.ne.s32.totalorder %s2169_s18, %s1816_s15  ;;  %p1825_p5 = scmp.lt.s32.totalorder %s1816_s15, %s1816_s15 }
  0x64   : > { %p1819_p8 = pnand %p1817_p6, %p2179_p13  ;;  %p1826_p7 = por %p1825_p5, %p1824_p3 }
  0x66   : > { %p1820_p0 = pneg %p1819_p8 }
  0x68   : > { %p1827_p10 = pnand %p1826_p7, %p1820_p0 }
  0x6a   : > { %1830 = shalt.err (!%p1827_p10)
}
  0x6b   : > { %s2858_s8 = smov 64   ;;  %s2859_s12 = smov 4  }
  0x6c   : > { %1589 = dma.hbm_to_vmem [thread:$0]  (!%p2163_p11), %s2875_s4, 128, %s2169_s18, [#allocation10], %s2858_s8, %s2858_s8, %s2859_s12  }
  0x6d   : > { %s52_s22 = sadd.s32 1, %s2033_s26  ;;  %s43_s21 = sadd.s32 1, %s2041_s28 }
  0x6e   : > { %p59_p13 = scmp.ne.s32.totalorder %s2033_s26, %s2029_s25  ;;  %p45_p9 = scmp.ge.s32.totalorder %s43_s21, 2 }
  0x6f   : > { %p60_p12 = scmp.eq.s32.totalorder %s2045_s29, 0  ;;  %p2876_p2 = scmp.eq.s32.totalorder %s2133_s30, 1 }
  0x70   : > { %p1610_p4 = scmp.lt.s32.totalorder %s2045_s29, 2  ;;  %s2905_s21 = smov (%p45_p9, %s43_s21), 0 }
  0x71   : > { %p2252_p1 = por %p2876_p2, %p59_p13  ;;  %2878 = sst [smem:[#allocation23_spill]] %s2905_s21 }
  0x72   : > { %p61_p6 = por %p60_p12, %p59_p13  ;;  %s2260_s16 = sand.u32 1, %s2033_s26  }
  0x73   : > { %s2877_s23 = scalar_select %p2252_p1, 1, 0 }
  0x74   : > { %s47_s18 = ssub.s32 %s2041_s28, %s2905_s21  ;;  %s1417_s14 = sshll.u32 %s2260_s16, 5 }
  0x75   : > { %p50_p11 = scmp.eq.s32.totalorder %s47_s18, 0  ;;  %s2860_s17 = sshll.u32 %s2041_s28, 9 }
  0x76   : > { %s2880_s0 = sld [smem:[#allocation25_spill]]  ;;  %s309_s20 = scalar_lea.vmem [#allocation3], %s1417_s14 }
  0x77   : > { %s2267_s19 = scalar_select %p50_p11, %s2033_s26, %s52_s22  }
  0x78   : > { %s318_s8 = sshll.u32 %s309_s20, 4  ;;  %p2280_p8 = pnand %p1610_p4, %p61_p6  ;;  %s2276_s8 = int_to_ptr.vmem [resolvable:$true] %s318_s8 }
  0x79   : > { %2879 = sst [smem:[#allocation24_spill]] %s2267_s19  ;;  %s1420_s12 = sshll.u32 %s2260_s16, 2 }
  0x7a   : > { %s306_s13 = scalar_lea.sflag [#allocation4], %s2260_s16  ;;  %p1833_p3 = pneg %p2280_p8 }
  0x7c   : > { %s2274_s10 = scalar_lea.hbm %s2880_s0, %s2860_s17  ;;  %s1836_s17 = scalar_lea.hbm %s2880_s0, 1024 }
  0x7d   : > { %s1831_s15 = scalar_lea.hbm %s2274_s10, 512  ;;  %p1837_p10 = scmp.lt.u32.totalorder %s2274_s10, %s2880_s0 }
  0x7e   : > { %p1832_p0 = scmp.ne.s32.totalorder %s2274_s10, %s1831_s15  ;;  %p1838_p13 = scmp.lt.u32.totalorder %s1836_s17, %s1831_s15 }
  0x7f   : > { %p1840_p12 = scmp.lt.u32.totalorder %s1831_s15, %s2274_s10 }
  0x80   : > { %p1834_p5 = pnand %p1833_p3, %p1832_p0  ;;  %p1839_p9 = por %p1838_p13, %p1837_p10 }
  0x82   : > { %p1835_p7 = pneg %p1834_p5  ;;  %p1841_p2 = por %p1840_p12, %p1839_p9 }
  0x84   : > { %p1842_p4 = pnand %p1841_p2, %p1835_p7 }
  0x86   : > { %1845 = shalt.err (!%p1842_p4)
}
  0x87   : > { %s1846_s22 = scalar_lea.vmem %s2276_s8, 512  ;;  %s2052_s14 = smov [#allocation3]  }
  0x88   : > { %p1847_p6 = scmp.ne.s32.totalorder %s2276_s8, %s1846_s22  ;;  %s1851_s20 = sshll.u32 %s2052_s14, 4  ;;  %s1852_s20 = int_to_ptr.vmem [resolvable:$false] %s1851_s20 }
  0x89   : > { %s1853_s2 = scalar_lea.vmem %s1852_s20, 1024  ;;  %p1854_p5 = scmp.lt.s32.totalorder %s2276_s8, %s1852_s20 }
  0x8a   : > { %p1849_p11 = pnand %p1847_p6, %p1833_p3  ;;  %p1855_p10 = scmp.lt.s32.totalorder %s1853_s2, %s1846_s22 }
  0x8c   : > { %p1850_p0 = pneg %p1849_p11  ;;  %p1856_p13 = por %p1855_p10, %p1854_p5 }
  0x8e   : > { %p1857_p9 = pnand %p1856_p13, %p1850_p0 }
  0x90   : > { %1860 = shalt.err (!%p1857_p9)
}
  0x91   : > { %s2882_s3 = smov 4   ;;  %s2883_s17 = smov 64  }
  0x92   : > { %1593 = dma.hbm_to_vmem [thread:$0]  (!%p2280_p8), %s2274_s10, 512, %s2276_s8, %s306_s13, %s2883_s17, %s2883_s17, %s2882_s3  }
  0x93   : > { %s2884_s15 = sshll.u32 %s2041_s28, 9  ;;  %s332_s2 = scalar_lea.vmem [#allocation6], %s1420_s12 }
  0x94   : > { %s2322_s20 = scalar_lea.hbm %s2846_s1, %s2884_s15  ;;  %s345_s0 = sshll.u32 %s332_s2, 4  ;;  %s346_s0 = int_to_ptr.vmem [resolvable:$true] %s345_s0 }
  0x95   : > { %s2885_s4 = sand.u32 1, %s2045_s29   ;;  %s1861_s19 = scalar_lea.hbm %s2322_s20, 64 }
  0x96   : > { %s329_s21 = scalar_lea.sflag [#allocation7], %s2885_s4  ;;  %p1862_p7 = scmp.ne.s32.totalorder %s2322_s20, %s1861_s19 }
  0x97   : > { %s1866_s13 = scalar_lea.hbm %s2846_s1, 1024  ;;  %p1867_p4 = scmp.lt.u32.totalorder %s2322_s20, %s2846_s1 }
  0x98   : > { %p1864_p12 = pnand %p1862_p7, %p1833_p3  ;;  %p1868_p6 = scmp.lt.u32.totalorder %s1866_s13, %s1861_s19 }
  0x99   : > { %p1870_p0 = scmp.lt.u32.totalorder %s1861_s19, %s2322_s20 }
  0x9a   : > { %p1865_p2 = pneg %p1864_p12  ;;  %p1869_p11 = por %p1868_p6, %p1867_p4 }
  0x9c   : > { %p1871_p5 = por %p1870_p0, %p1869_p11 }
  0x9e   : > { %p1872_p10 = pnand %p1871_p5, %p1865_p2 }
  0xa0   : > { %1875 = shalt.err (!%p1872_p10)
}
  0xa1   : > { %s1876_s4 = scalar_lea.vmem %s346_s0, 64  ;;  %s2053_s12 = smov [#allocation6]  }
  0xa2   : > { %p1877_p13 = scmp.ne.s32.totalorder %s346_s0, %s1876_s4  ;;  %s1881_s17 = sshll.u32 %s2053_s12, 4  ;;  %s1882_s17 = int_to_ptr.vmem [resolvable:$false] %s1881_s17 }
  0xa3   : > { %s1883_s15 = scalar_lea.vmem %s1882_s17, 128  ;;  %p1884_p12 = scmp.lt.s32.totalorder %s346_s0, %s1882_s17 }
  0xa4   : > { %p1879_p9 = pnand %p1877_p13, %p1833_p3  ;;  %p1885_p1 = scmp.lt.s32.totalorder %s1883_s15, %s1876_s4 }
  0xa6   : > { %p1880_p7 = pneg %p1879_p9  ;;  %p1886_p4 = por %p1885_p1, %p1884_p12 }
  0xa8   : > { %p1887_p6 = pnand %p1886_p4, %p1880_p7 }
  0xaa   : > { %1890 = shalt.err (!%p1887_p6)
}
  0xab   : > { %1596 = dma.hbm_to_vmem [thread:$0]  (!%p2280_p8), %s2322_s20, 64, %s346_s0, %s329_s21  }
  0xac   : > { %p2886_p2 = scmp.ne.s32.totalorder %s2870_s11, 0 }
  0xad   : > { %s2350_s19 = sand.u32 (!%p2886_p2), 1, %s2029_s25   ;;  %p2887_p1 = scmp.ne.s32.totalorder (!%p2886_p2), %s2867_s9, 0 }
  0xae   : > { %354 = sbr.rel (%p2886_p2) target bundleno = 927 (0x39f), region = 40  ;;  %s2353_s14 = sshll.u32 (!%p2886_p2), %s2350_s19, 5 }
  0xaf   : > { %s357_s22 = scalar_lea.sflag (!%p2886_p2), [#allocation4], %s2350_s19  ;;  %s360_s2 = scalar_lea.vmem (!%p2886_p2), [#allocation3], %s2353_s14 }
  0xb5   : > { %2000 = dma.done.wait (%p2887_p1), %s357_s22, 512  }
  0xb6   : > { %2002 = vsyncadd (%p2887_p1), %s357_s22, 4294966784  ;;  %s365_s0 = sand.u32 1, %s2133_s30  }
  0xb7   : > { %s366_s11 = scalar_lea.sflag [#allocation7], %s365_s0 }
  0xb8   : > { %2004 = dma.done.wait (%p2887_p1), %s366_s11, 64  }
  0xb9   : > { %2006 = vsyncadd (%p2887_p1), %s366_s11, 4294967232  ;;  %p2888_p8 = scmp.eq.s32.totalorder %s2133_s30, 0 }
  0xbb   : > { %2008 = dma.done.wait (%p2888_p8), [#allocation7], 64   ;;  %p2889_p3 = pmov %p2888_p8 }
  0xbd   : > { %2010 = vsyncadd (%p2889_p3), [#allocation7], 4294967232  ;;  %p2890_p11 = pmov %p2889_p3 }
  0xbe   : > { %p2891_p0 = pmov %p2889_p3 }
  0xbf   : > { %2012 = dma.done.wait (%p2890_p11), [#allocation10], 144  }
  0xc0   : > { %2014 = vsyncadd (%p2891_p0), [#allocation10], 4294967152  ;;  %v504_v0 = vlaneseq  ;;  %v2054_v1 = vmov 0.0   ;;  %vm476_vm0 = vcmask 1042432   ;;  %v1508_v5 = vld [vmem:[%s360_s2] sm:$0xff]   ;;  %v1523_v6 = vld [vmem:[%s360_s2 + $0x8] sm:$0xff]  }
  0xc1   : > { %1546 = vmatprep.subr.bf16.mxu1 %v2054_v1  ;;  %v466_v3 = vrot.slane %v2054_v1, 5  ;;  %v1524_v7 = vld [vmem:[%s360_s2 + $0x10] sm:$0xff]   ;;  %v2378_v11 = vunpack.c.l.bf16 %v1508_v5  ;;  %v2380_v12 = vunpack.c.h.bf16 %v1508_v5  ;;  %v2382_v13 = vunpack.c.l.bf16 %v1523_v6  ;;  %v1525_v15 = vld [vmem:[%s360_s2 + $0x18] sm:$0xff]   ;;  %v502_v34 = vld [vmem:[#allocation8] sm:$0xf]  ;;  %s2055_s9 = smov 112  }
  0xc2   : > { %v505_v2 = vshrl.u32 %v504_v0, 7  ;;  %v2384_v14 = vunpack.c.h.bf16 %v1523_v6  ;;  %v2386_v16 = vunpack.c.l.bf16 %v1524_v7  ;;  %v2388_v17 = vunpack.c.h.bf16 %v1524_v7  ;;  %v2427_v44 = vld [vmem:[#allocation9] ss:$0 sm:$0xff]  ;;  %s2652_s21 = scalar_lea.vmem [#allocation12], %s2353_s14  ;;  %s2679_s18 = scalar_lea.vmem [#allocation13], %s2353_s14 }
  0xc3   : > { %v2390_v18 = vunpack.c.l.bf16 %v1525_v15  ;;  %v2392_v19 = vunpack.c.h.bf16 %v1525_v15  ;;  %v478_v20 = vrot.slane %v2380_v12, 5  ;;  %v1441_v21 = vmul.f32 -1.442695, %v2378_v11  ;;  %s1504_s20 = sshll.u32 %s2037_s27, 9  ;;  %s1190_s8 = sshll.u32 %s2679_s18, 4  ;;  %s2714_s8 = int_to_ptr.vmem [resolvable:$true] %s1190_s8 }
  0xc4   : > { %v506_v4 = vsub.s32 0, %v505_v2  ;;  %v532_v8 = vsub.s32 1, %v505_v2  ;;  %v588_v9 = vsub.s32 2, %v505_v2  ;;  %v644_v10 = vsub.s32 3, %v505_v2  ;;  %s2712_s16 = scalar_lea.hbm %s2851_s6, %s1504_s20  ;;  %s2718_s3 = scalar_lea.sflag [#allocation14], %s365_s0 }
  0xc5   : > { %v1442_v22 = vmul.f32 -1.442695, %v2380_v12  ;;  %v477_v23 = vrot.slane %v2378_v11, 5  ;;  %v480_v24 = vrot.slane %v2382_v13, 5  ;;  %v482_v25 = vrot.slane %v2384_v14, 5  ;;  %s1891_s4 = scalar_lea.vmem %s2714_s8, 512 }
  0xc6   : > { %v1443_v26 = vmul.f32 -1.442695, %v2382_v13  ;;  %v1444_v27 = vmul.f32 -1.442695, %v2384_v14  ;;  %1675 = vpow2.f32 %v1441_v21  ;;  %v486_v28 = vrot.slane %v2388_v17, 5  ;;  %p1892_p5 = scmp.ne.s32.totalorder %s2714_s8, %s1891_s4  ;;  %p2892_p10 = scmp.ne.s32.totalorder %s2877_s23, 0 }
  0xc7   : > { %v1445_v29 = vmul.f32 -1.442695, %v2386_v16  ;;  %v1446_v30 = vmul.f32 -1.442695, %v2388_v17  ;;  %vm552_vm1 = vcmask 1046528   ;;  %1677 = vpow2.f32 %v1442_v22  ;;  %s2057_s12 = smov [#allocation13]  }
  0xc8   : > { %v484_v31 = vrot.slane %v2386_v16, 5  ;;  %v488_v32 = vrot.slane %v2390_v18, 5  ;;  %v2408_v33 = vrot.slane %v2392_v19, 5  ;;  %vm608_vm2 = vcmask 1045504   ;;  %p1893_p13 = pnand %p1892_p5, %p2892_p10  ;;  %s1895_s17 = sshll.u32 %s2057_s12, 4  ;;  %s1896_s17 = int_to_ptr.vmem [resolvable:$false] %s1895_s17 }
  0xc9   : > { %1679 = vpow2.f32 %v1443_v26  ;;  %v1447_v35 = vmul.f32 -1.442695, %v2390_v18  ;;  %v1448_v36 = vmul.f32 -1.442695, %v2392_v19  ;;  %v479_v37 = vsel %vm476_vm0, %v477_v23, %v478_v20  ;;  %s1897_s15 = scalar_lea.vmem %s1896_s17, 1024  ;;  %p1898_p7 = scmp.lt.s32.totalorder %s2714_s8, %s1896_s17 }
  0xca   : > { %1681 = vpow2.f32 %v1444_v27  ;;  %v2414_v38 = vsel %vm476_vm0, %v482_v25, %v484_v31  ;;  %v2419_v39 = vsel %vm476_vm0, %v484_v31, %v486_v28  ;;  %v481_v40 = vsel %vm476_vm0, %v478_v20, %v480_v24  ;;  %p1894_p9 = pneg %p1893_p13  ;;  %p1899_p12 = scmp.lt.s32.totalorder %s1897_s15, %s1891_s4 }
  0xcb   : > { %1683 = vpow2.f32 %v1445_v29  ;;  %v501_v41 = vsel %vm476_vm0, %v466_v3, %v477_v23  ;;  %v2423_v42 = vrot.slane %v502_v34, %v506_v4  ;;  %v2425_v43 = vrot.slane %v502_v34, %v532_v8 }
  0xcc   : > { %1685 = vpow2.f32 %v1446_v30  ;;  %v2429_v45 = vrot.slane %v502_v34, %v588_v9  ;;  %v2431_v46 = vrot.slane %v502_v34, %v644_v10  ;;  %v2434_v47 = vsel %vm476_vm0, %v480_v24, %v482_v25  ;;  %p1900_p4 = por %p1899_p12, %p1898_p7 }
  0xcd   : > { %1687 = vpow2.f32 %v1447_v35  ;;  %v508_v48 = vmul.f32 %v2423_v42, %v501_v41  ;;  %v509_v49 = vmul.f32 %v2423_v42, %v479_v37  ;;  %v534_v50 = vmul.f32 %v2425_v43, %v501_v41 }
  0xce   : > { %vm664_vm3 = vcmask 1044480   ;;  %1689 = vpow2.f32 %v1448_v36  ;;  %v535_v51 = vmul.f32 %v2425_v43, %v479_v37  ;;  %v2441_v52 = vmul.f32 %v2425_v43, %v481_v40  ;;  %p1901_p6 = pnand %p1900_p4, %p1894_p9 }
  0xcf   : > { %v590_v53 = vmul.f32 %v2429_v45, %v501_v41  ;;  %v522_v54 = vadd.f32 %v2427_v44, %v508_v48  ;;  %v523_v55 = vadd.f32 %v2427_v44, %v509_v49  ;;  %v553_v56 = vrot.slane %v534_v50, 1 }
  0xd0   : > { %v591_v57 = vmul.f32 %v2429_v45, %v479_v37  ;;  %v554_v58 = vrot.slane %v535_v51, 1  ;;  %v556_v59 = vrot.slane %v2441_v52, 1  ;;  %v2449_v60 = vmul.f32 %v2429_v45, %v481_v40  ;;  %v1676_v62 = vpop.eup %1675 }
  0xd1   : > { %v609_v61 = vrot.slane %v590_v53, 2  ;;  %v646_v0 = vmul.f32 %v2431_v46, %v501_v41  ;;  %v647_v2 = vmul.f32 %v2431_v46, %v479_v37  ;;  %v2454_v3 = vmul.f32 %v2431_v46, %v481_v40  ;;  %v1678_v4 = vpop.eup %1677 }
  0xd2   : > { %v610_v63 = vrot.slane %v591_v57, 2  ;;  %v778_v5 = vadd.f32 1.0, %v1676_v62  ;;  %v555_v6 = vsel %vm552_vm1, %v553_v56, %v554_v58  ;;  %v557_v7 = vsel %vm552_vm1, %v554_v58, %v556_v59 }
  0xd3   : > { %v612_v8 = vrot.slane %v2449_v60, 2  ;;  %v1680_v9 = vpop.eup %1679  ;;  %v779_v10 = vadd.f32 1.0, %v1678_v4  ;;  %v578_v15 = vadd.f32 %v555_v6, %v522_v54  ;;  %v579_v20 = vadd.f32 %v557_v7, %v523_v55 }
  0xd4   : > { %v611_v21 = vsel %vm608_vm2, %v609_v61, %v610_v63  ;;  %v1682_v22 = vpop.eup %1681  ;;  %1691 = vrcp.f32 %v778_v5  ;;  %v780_v23 = vadd.f32 1.0, %v1680_v9  ;;  %v665_v25 = vrot.slane %v646_v0, 3 }
  0xd5   : > { %v613_v24 = vsel %vm608_vm2, %v610_v63, %v612_v8  ;;  %v1684_v26 = vpop.eup %1683  ;;  %1693 = vrcp.f32 %v779_v10  ;;  %v781_v27 = vadd.f32 1.0, %v1682_v22  ;;  %v634_v29 = vadd.f32 %v611_v21, %v578_v15 }
  0xd6   : > { %v635_v30 = vadd.f32 %v613_v24, %v579_v20  ;;  %v1686_v31 = vpop.eup %1685  ;;  %1695 = vrcp.f32 %v780_v23  ;;  %v782_v34 = vadd.f32 1.0, %v1684_v26  ;;  %v666_v35 = vrot.slane %v647_v2, 3 }
  0xd7   : > { %v668_v36 = vrot.slane %v2454_v3, 3  ;;  %v1688_v37 = vpop.eup %1687  ;;  %1697 = vrcp.f32 %v781_v27  ;;  %v783_v41 = vadd.f32 1.0, %v1686_v31  ;;  %v510_v48 = vmul.f32 %v2423_v42, %v481_v40 }
  0xd8   : > { %v511_v49 = vmul.f32 %v2423_v42, %v2434_v47  ;;  %v1690_v50 = vpop.eup %1689  ;;  %1699 = vrcp.f32 %v782_v34  ;;  %v784_v51 = vadd.f32 1.0, %v1688_v37  ;;  %v667_v53 = vsel %vm664_vm3, %v665_v25, %v666_v35 }
  0xd9   : > { %v669_v54 = vsel %vm664_vm3, %v666_v35, %v668_v36  ;;  %1701 = vrcp.f32 %v783_v41  ;;  %v785_v55 = vadd.f32 1.0, %v1690_v50  ;;  %v2471_v56 = vadd.f32 %v667_v53, %v634_v29 }
  0xda   : > { %v2473_v57 = vadd.f32 %v669_v54, %v635_v30  ;;  %1703 = vrcp.f32 %v784_v51  ;;  %v524_v58 = vadd.f32 %v2427_v44, %v510_v48  ;;  %v525_v40 = vadd.f32 %v2427_v44, %v511_v49 }
  0xdb   : > { %v537_v61 = vmul.f32 %v2425_v43, %v2434_v47  ;;  %1705 = vrcp.f32 %v785_v55  ;;  %v1433_v62 = vmul.f32 -1.442695, %v2471_v56  ;;  %v2483_v0 = vmul.f32 %v2425_v43, %v2414_v38 }
  0xdc   : > { %v1434_v63 = vmul.f32 -1.442695, %v2473_v57  ;;  %v593_v3 = vmul.f32 %v2429_v45, %v2434_v47  ;;  %v2489_v4 = vmul.f32 %v2429_v45, %v2414_v38  ;;  %v649_v5 = vmul.f32 %v2431_v46, %v2434_v47 }
  0xdd   : > { %v558_v2 = vrot.slane %v537_v61, 1  ;;  %1707 = vpow2.f32 %v1433_v62  ;;  %v560_v6 = vrot.slane %v2483_v0, 1  ;;  %v2496_v7 = vmul.f32 %v2431_v46, %v2414_v38 }
  0xde   : > { %v2503_v9 = vsel %vm476_vm0, %v486_v28, %v488_v32  ;;  %v1692_v10 = vpop.eup %1691  ;;  %1709 = vpow2.f32 %v1434_v63  ;;  %v614_v15 = vrot.slane %v593_v3, 2  ;;  %v616_v20 = vrot.slane %v2489_v4, 2 }
  0xdf   : > { %v559_v47 = vsel %vm552_vm1, %v556_v59, %v558_v2  ;;  %v1694_v21 = vpop.eup %1693  ;;  %v2510_v22 = vmul.f32 %v1692_v10, %v2378_v11  ;;  %v561_v23 = vsel %vm552_vm1, %v558_v2, %v560_v6  ;;  %v670_v28 = vrot.slane %v649_v5, 3 }
  0xe0   : > { %v580_v24 = vadd.f32 %v559_v47, %v524_v58  ;;  %v1696_v25 = vpop.eup %1695  ;;  %v2516_v26 = vmul.f32 %v1694_v21, %v2380_v12  ;;  %v581_v52 = vadd.f32 %v561_v23, %v525_v40  ;;  %v615_v59 = vsel %vm608_vm2, %v612_v8, %v614_v15 }
  0xe1   : > { %v617_v11 = vsel %vm608_vm2, %v614_v15, %v616_v20  ;;  %v1698_v27 = vpop.eup %1697  ;;  %v2525_v29 = vmul.f32 %v1696_v25, %v2382_v13  ;;  %v671_v31 = vsel %vm664_vm3, %v668_v36, %v670_v28  ;;  %v672_v34 = vrot.slane %v2496_v7, 3 }
  0xe2   : > { %v636_v30 = vadd.f32 %v615_v59, %v580_v24  ;;  %v1700_v12 = vpop.eup %1699  ;;  %v854_v35 = vpack.c.bf16 %v2516_v26, %v2510_v22  ;;  %v2532_v60 = vmul.f32 %v1698_v27, %v2384_v14  ;;  %v637_v8 = vadd.f32 %v617_v11, %v581_v52 }
  0xe3   : > { %v512_v37 = vmul.f32 %v2423_v42, %v2414_v38  ;;  %v1702_v41 = vpop.eup %1701  ;;  %v2537_v13 = vmul.f32 %v1700_v12, %v2386_v16  ;;  %v673_v48 = vsel %vm664_vm3, %v670_v28, %v672_v34  ;;  %v513_v49 = vmul.f32 %v2423_v42, %v2419_v39 }
  0xe4   : > { %v2540_v36 = vadd.f32 %v671_v31, %v636_v30  ;;  %v1704_v50 = vpop.eup %1703  ;;  %1048 = vrot.lane.b32.xlu0 %v854_v35, %s2055_s9  ;;  %v855_v14 = vpack.c.bf16 %v2532_v60, %v2525_v29  ;;  %v2548_v38 = vmul.f32 %v1702_v41, %v2388_v17  ;;  %v2550_v51 = vadd.f32 %v673_v48, %v637_v8 }
  0xe5   : > { %v526_v16 = vadd.f32 %v2427_v44, %v512_v37  ;;  %v1706_v53 = vpop.eup %1705  ;;  %v2554_v54 = vmul.f32 %v1704_v50, %v2390_v18  ;;  %v527_v58 = vadd.f32 %v2427_v44, %v513_v49  ;;  %v539_v40 = vmul.f32 %v2425_v43, %v2419_v39 }
  0xe6   : > { %v1435_v55 = vmul.f32 -1.442695, %v2540_v36  ;;  %v856_v61 = vpack.c.bf16 %v2548_v38, %v2537_v13  ;;  %v2563_v17 = vmul.f32 %v1706_v53, %v2392_v19  ;;  %v1436_v62 = vmul.f32 -1.442695, %v2550_v51 }
  0xe7   : > { %v540_v63 = vmul.f32 %v2425_v43, %v2503_v9  ;;  %v1708_v2 = vpop.eup %1707  ;;  %v562_v3 = vrot.slane %v539_v40, 1  ;;  %v595_v5 = vmul.f32 %v2429_v45, %v2419_v39  ;;  %v596_v7 = vmul.f32 %v2429_v45, %v2503_v9 }
  0xe8   : > { %1711 = vpow2.f32 %v1435_v55  ;;  %v1710_v10 = vpop.eup %1709  ;;  %1050 = vrot.lane.b32.xlu0 %v855_v14, %s2055_s9  ;;  %1052 = vrot.lane.b32.xlu1 %v856_v61, %s2055_s9  ;;  %v857_v19 = vpack.c.bf16 %v2563_v17, %v2554_v54  ;;  %v722_v47 = vadd.f32 1.0, %v1708_v2  ;;  %v651_v59 = vmul.f32 %v2431_v46, %v2419_v39 }
  0xe9   : > { %1713 = vpow2.f32 %v1436_v62  ;;  %v564_v15 = vrot.slane %v540_v63, 1  ;;  %v723_v21 = vadd.f32 1.0, %v1710_v10  ;;  %v563_v23 = vsel %vm552_vm1, %v560_v6, %v562_v3 }
  0xea   : > { %v618_v24 = vrot.slane %v595_v5, 2  ;;  %v620_v28 = vrot.slane %v596_v7, 2  ;;  %1715 = vrcp.f32 %v722_v47  ;;  %v582_v52 = vadd.f32 %v563_v23, %v526_v16 }
  0xeb   : > { %v565_v25 = vsel %vm552_vm1, %v562_v3, %v564_v15  ;;  %1717 = vrcp.f32 %v723_v21  ;;  %v652_v6 = vmul.f32 %v2431_v46, %v2503_v9  ;;  %v674_v31 = vrot.slane %v651_v59, 3 }
  0xec   : > { %v583_v11 = vadd.f32 %v565_v25, %v527_v58  ;;  %v619_v27 = vsel %vm608_vm2, %v616_v20, %v618_v24  ;;  %v621_v30 = vsel %vm608_vm2, %v618_v24, %v620_v28  ;;  %1054 = vrot.lane.b32.xlu1 %v857_v19, %s2055_s9  ;;  %v491_v39 = vsel %vm476_vm0, %v488_v32, %v2408_v33 }
  0xed   : > { %v638_v0 = vadd.f32 %v619_v27, %v582_v52  ;;  %v514_v4 = vmul.f32 %v2423_v42, %v2503_v9  ;;  %v515_v20 = vmul.f32 %v2423_v42, %v491_v39  ;;  %v541_v35 = vmul.f32 %v2425_v43, %v491_v39 }
  0xee   : > { %v639_v12 = vadd.f32 %v621_v30, %v583_v11  ;;  %v675_v8 = vsel %vm664_vm3, %v672_v34, %v674_v31  ;;  %v676_v37 = vrot.slane %v652_v6, 3  ;;  %v542_v41 = vmul.f32 %v2425_v43, %v2408_v33 }
  0xef   : > { %v597_v48 = vmul.f32 %v2429_v45, %v491_v39  ;;  %v2601_v49 = vadd.f32 %v675_v8, %v638_v0  ;;  %v528_v18 = vadd.f32 %v2427_v44, %v514_v4  ;;  %v529_v32 = vadd.f32 %v2427_v44, %v515_v20 }
  0xf0   : > { %v566_v50 = vrot.slane %v541_v35, 1  ;;  %v677_v9 = vsel %vm664_vm3, %v674_v31, %v676_v37  ;;  %v568_v42 = vrot.slane %v542_v41, 1  ;;  %v598_v14 = vmul.f32 %v2429_v45, %v2408_v33  ;;  %818 = vrot.lane.b32.xlu1 %v2510_v22, %s2055_s9 }
  0xf1   : > { %v622_v34 = vrot.slane %v597_v48, 2  ;;  %v2610_v16 = vadd.f32 %v677_v9, %v639_v12  ;;  %v1437_v53 = vmul.f32 -1.442695, %v2601_v49  ;;  %v653_v44 = vmul.f32 %v2431_v46, %v491_v39 }
  0xf2   : > { %v1712_v43 = vpop.eup %1711  ;;  %v567_v55 = vsel %vm552_vm1, %v564_v15, %v566_v50  ;;  %v569_v61 = vsel %vm552_vm1, %v566_v50, %v568_v42  ;;  %v624_v5 = vrot.slane %v598_v14, 2  ;;  %v654_v10 = vmul.f32 %v2431_v46, %v2408_v33  ;;  %v1674_v42 = vld [vmem:[#allocation11] sm:$0xff]  }
  0xf3   : > { %v1714_v58 = vpop.eup %1713  ;;  %v724_v40 = vadd.f32 1.0, %v1712_v43  ;;  %v584_v62 = vadd.f32 %v567_v55, %v528_v18  ;;  %v623_v45 = vsel %vm608_vm2, %v620_v28, %v622_v34  ;;  %1719 = vpow2.f32 %v1437_v53  ;;  %1536 = vmatprep.subr.bf16.mxu0 %v1674_v42 }
  0xf4   : > { %v725_v63 = vadd.f32 1.0, %v1714_v58  ;;  %v1438_v22 = vmul.f32 -1.442695, %v2610_v16  ;;  %v585_v2 = vadd.f32 %v569_v61, %v529_v32  ;;  %v1716_v3 = vpop.eup %1715  ;;  %820 = vrot.lane.b32.xlu1 %v2516_v26, %s2055_s9  ;;  %v678_v47 = vrot.slane %v653_v44, 3  ;;  %1537 = vmatpush3.bf16.msra.mxu0 %v1674_v42 }
  0xf5   : > { %1721 = vrcp.f32 %v724_v40  ;;  %v640_v7 = vadd.f32 %v623_v45, %v584_v62  ;;  %v1718_v19 = vpop.eup %1717  ;;  %v625_v15 = vsel %vm608_vm2, %v622_v34, %v624_v5  ;;  %v680_v21 = vrot.slane %v654_v10, 3 }
  0xf6   : > { %1723 = vrcp.f32 %v725_v63  ;;  %vm2056_vm4 = vmmov 0   ;;  %v641_v23 = vadd.f32 %v625_v15, %v585_v2  ;;  %v679_v24 = vsel %vm664_vm3, %v676_v37, %v678_v47 }
  0xf7   : > { %1725 = vpow2.f32 %v1438_v22  ;;  %1554 = vmatprep.mubr.msk.bf16.mxu1 %vm2056_vm4, %v2054_v1  ;;  %vm439_vm5 = vcmask 130048   ;;  %v681_v28 = vsel %vm664_vm3, %v678_v47, %v680_v21  ;;  %v696_v33 = vadd.f32 %v679_v24, %v640_v7 }
  0xf8   : > { %822 = vrot.lane.b32.xlu1 %v2525_v29, %s2055_s9  ;;  %440 = vst.msk [vmem:[#allocation2] sm:$0xff] %vm439_vm5, %v2054_v1  ;;  %441 = vst.msk [vmem:[#allocation2 + $0x8] sm:$0xff] %vm439_vm5, %v2054_v1  ;;  %v697_v46 = vadd.f32 %v681_v28, %v641_v23  ;;  %v746_v11 = vmul.f32 %v1716_v3, %v2471_v56  ;;  %v747_v29 = vmul.f32 %v1718_v19, %v2473_v57  ;;  %vm1060_vm6 = vcmask 523264  }
  0xf9   : > { %v1439_v26 = vmul.f32 -1.442695, %v696_v33  ;;  %vm890_vm7 = vcmask 125952   ;;  %vm1017_vm8 = vcmask 60416  }
  0xfa   : > { %v1440_v25 = vmul.f32 -1.442695, %v697_v46  ;;  %v850_v31 = vpack.c.bf16 %v747_v29, %v746_v11 }
  0xfb   : > { %1727 = vpow2.f32 %v1439_v26 }
  0xfc   : > { %824 = vrot.lane.b32.xlu1 %v2532_v60, %s2055_s9  ;;  %1729 = vpow2.f32 %v1440_v25 }
  0xfd   : > { %v1720_v52 = vpop.eup %1719 }
  0xfe   : > { %v726_v27 = vadd.f32 1.0, %v1720_v52 }
  0xff   : > { %v1722_v59 = vpop.eup %1721  ;;  %v1027_v26 = vld [vmem:[#allocation2 + $0x8] sm:$0xff] }
 0x100   : > { %v1724_v30 = vpop.eup %1723  ;;  %1731 = vrcp.f32 %v726_v27  ;;  %826 = vrot.lane.b32.xlu1 %v2537_v13, %s2055_s9  ;;  %v748_v39 = vmul.f32 %v1722_v59, %v2540_v36 }
 0x101   : > { %v1726_v0 = vpop.eup %1725  ;;  %v749_v60 = vmul.f32 %v1724_v30, %v2550_v51 }
 0x102   : > { %v727_v6 = vadd.f32 1.0, %v1726_v0 }
 0x103   : > { %v851_v57 = vpack.c.bf16 %v749_v60, %v748_v39 }
 0x104   : > { %1733 = vrcp.f32 %v727_v6  ;;  %828 = vrot.lane.b32.xlu1 %v2548_v38, %s2055_s9 }
 0x105   : > { %v1728_v56 = vpop.eup %1727 }
 0x106   : > { %1028 = vxpose.xlu0.c.b16.start [1/4] (short) (narrow) %v850_v31, 16  ;;  %v1730_v12 = vpop.eup %1729  ;;  %v728_v4 = vadd.f32 1.0, %v1728_v56 }
 0x107   : > { %v729_v20 = vadd.f32 1.0, %v1730_v12 }
 0x108   : > { %830 = vrot.lane.b32.xlu1 %v2554_v54, %s2055_s9  ;;  %1735 = vrcp.f32 %v728_v4 }
 0x109   : > { %1737 = vrcp.f32 %v729_v20 }
 0x10a   : > { %v1732_v13 = vpop.eup %1731  ;;  %1029 = vxpose.xlu0.c.b16.cont [2/4] (short) (narrow) %v851_v57, 16 }
 0x10b   : > { %v750_v36 = vmul.f32 %v1732_v13, %v2601_v49 }
 0x10c   : > { %832 = vrot.lane.b32.xlu1 %v2563_v17, %s2055_s9 }
 0x10e   : > { %v1734_v51 = vpop.eup %1733 }
 0x10f   : > { %v751_v38 = vmul.f32 %v1734_v51, %v2610_v16 }
 0x111   : > { %v852_v35 = vpack.c.bf16 %v751_v38, %v750_v36 }
 0x112   : > { %v1736_v8 = vpop.eup %1735 }
 0x113   : > { %1030 = vxpose.xlu0.c.b16.cont [3/4] (short) (narrow) %v852_v35, 16  ;;  %v1738_v37 = vpop.eup %1737  ;;  %v752_v41 = vmul.f32 %v1736_v8, %v696_v33  ;;  %v1026_v33 = vld [vmem:[#allocation2] sm:$0xff] }
 0x114   : > { %v753_v48 = vmul.f32 %v1738_v37, %v697_v46 }
 0x116   : > { %v853_v18 = vpack.c.bf16 %v753_v48, %v752_v41 }
 0x118   : > { %1031 = vxpose.xlu0.c.b16.end [4/4] (short) (narrow) %v853_v18, 16 }
 0x156   : > { %v1049_v54 = vpop.permute.xlu0 %1048 }
 0x157   : > { %1547 = vmatpush3.bf16.msra.mxu1 %v1049_v54 }
 0x158   : > { %1548 = vmatprep.subr.bf16.mxu1 %v2054_v1 }
 0x15a   : > { %v1051_v32 = vpop.permute.xlu0 %1050  ;;  %v1053_v49 = vpop.permute.xlu1 %1052 }
 0x15b   : > { %1549 = vmatpush3.bf16.msra.mxu1 %v1051_v32 }
 0x15c   : > { %1550 = vmatprep.subr.bf16.mxu1 %v2054_v1 }
 0x15e   : > { %v1055_v17 = vpop.permute.xlu1 %1054 }
 0x15f   : > { %1551 = vmatpush3.bf16.msra.mxu1 %v1053_v49 }
 0x160   : > { %1552 = vmatprep.subr.bf16.mxu1 %v2054_v1 }
 0x162   : > { %v819_v9 = vpop.permute.xlu1 %818 }
 0x163   : > { %1553 = vmatpush3.bf16.msra.mxu1 %v1055_v17  ;;  %v842_v14 = vmul.f32 %v819_v9, %v746_v11 }
 0x165   : > { %v1486_v34 = vpack.c.bf16 %v842_v14, %v842_v14 }
 0x166   : > { %v821_v43 = vpop.permute.xlu1 %820 }
 0x167   : > { %891 = vst.msk [vmem:[%s2652_s21] sm:$0xf] %vm890_vm7, %v1486_v34  ;;  %v843_v1 = vmul.f32 %v821_v43, %v747_v29 }
 0x169   : > { %v1487_v16 = vpack.c.bf16 %v843_v1, %v843_v1  ;;  %v858_v53 = vpack.c.bf16 %v843_v1, %v842_v14 }
 0x16a   : > { %v823_v55 = vpop.permute.xlu1 %822 }
 0x16b   : > { %892 = vst.msk [vmem:[%s2652_s21 + $0x4] sm:$0xf] %vm890_vm7, %v1487_v16  ;;  %v844_v44 = vmul.f32 %v823_v55, %v748_v39  ;;  %1538 = vmatprep.mubr.msk.bf16.mxu0 %vm439_vm5, %v858_v53 }
 0x16d   : > { %v1488_v58 = vpack.c.bf16 %v844_v44, %v844_v44 }
 0x16e   : > { %v825_v40 = vpop.permute.xlu1 %824 }
 0x16f   : > { %893 = vst.msk [vmem:[%s2652_s21 + $0x8] sm:$0xf] %vm890_vm7, %v1488_v58  ;;  %v845_v61 = vmul.f32 %v825_v40, %v749_v60 }
 0x171   : > { %v859_v62 = vpack.c.bf16 %v845_v61, %v844_v44  ;;  %v1489_v45 = vpack.c.bf16 %v845_v61, %v845_v61 }
 0x172   : > { %v1036_v50 = vpop.trf.xlu0  ;;  %v827_v63 = vpop.permute.xlu1 %826 }
 0x173   : > { %1555 = vmatmul.mubr.msk.bf16.vlgmr.msra.gmra.mrb[0].mxu1 %vm1060_vm6, %v1036_v50  ;;  %894 = vst.msk [vmem:[%s2652_s21 + $0xc] sm:$0xf] %vm890_vm7, %v1489_v45  ;;  %v846_v22 = vmul.f32 %v827_v63, %v750_v36  ;;  %1539 = vmatmul.mubr.msk.bf16.vlgmr.msra.gmra.mrb[0].mxu0 %vm439_vm5, %v859_v62 }
 0x175   : > { %v1490_v2 = vpack.c.bf16 %v846_v22, %v846_v22 }
 0x176   : > { %v829_v3 = vpop.permute.xlu1 %828 }
 0x177   : > { %895 = vst.msk [vmem:[%s2652_s21 + $0x10] sm:$0xf] %vm890_vm7, %v1490_v2  ;;  %v847_v5 = vmul.f32 %v829_v3, %v751_v38 }
 0x179   : > { %v860_v7 = vpack.c.bf16 %v847_v5, %v846_v22  ;;  %v1491_v10 = vpack.c.bf16 %v847_v5, %v847_v5 }
 0x17a   : > { %v831_v19 = vpop.permute.xlu1 %830 }
 0x17b   : > { %896 = vst.msk [vmem:[%s2652_s21 + $0x14] sm:$0xf] %vm890_vm7, %v1491_v10  ;;  %v848_v47 = vmul.f32 %v831_v19, %v752_v41  ;;  %1542 = vmatprep.mubr.msk.bf16.mxu0 %vm439_vm5, %v860_v7 }
 0x17d   : > { %v1492_v15 = vpack.c.bf16 %v848_v47, %v848_v47 }
 0x17e   : > { %v833_v21 = vpop.permute.xlu1 %832 }
 0x17f   : > { %897 = vst.msk [vmem:[%s2652_s21 + $0x18] sm:$0xf] %vm890_vm7, %v1492_v15  ;;  %v849_v23 = vmul.f32 %v833_v21, %v753_v48 }
 0x181   : > { %v861_v24 = vpack.c.bf16 %v849_v23, %v848_v47  ;;  %v1493_v28 = vpack.c.bf16 %v849_v23, %v849_v23 }
 0x183   : > { %898 = vst.msk [vmem:[%s2652_s21 + $0x1c] sm:$0xf] %vm890_vm7, %v1493_v28  ;;  %1543 = vmatmul.mubr.msk.bf16.gmra.mrb[4].mxu0 %vm439_vm5, %v861_v24 }
 0x246   : > { %v1098_v46 = vpop.f32.mrb[0].mxu1  ;;  %v1540_v31 = vpop.f32.mrb[0].mxu0 }
 0x247   : > { %v1105_v25 = vadd.f32 %v1098_v46, %v1026_v33  ;;  %v1556_v52 = vpop.f32.mrb[1].mxu1  ;;  %v1496_v39 = vpack.c.bf16 %v1540_v31, %v1540_v31  ;;  %v954_v60 = vpop.f32.mrb[1].mxu0 }
 0x248   : > { %v1101_v59 = vpop.f32.mrb[2].mxu1  ;;  %v1494_v56 = vpack.c.bf16 %v954_v60, %v954_v60  ;;  %v1541_v57 = vpop.f32.mrb[2].mxu0 }
 0x249   : > { %1107 = vst.msk [vmem:[#allocation2] sm:$0xff] %vm439_vm5, %v1105_v25  ;;  %v1106_v11 = vadd.f32 %v1101_v59, %v1027_v26  ;;  %v1557_v29 = vpop.f32.mrb[3].mxu1  ;;  %v1497_v12 = vpack.c.bf16 %v1541_v57, %v1541_v57  ;;  %v957_v4 = vpop.f32.mrb[3].mxu0 }
 0x24a   : > { %1020 = vst.msk [vmem:[%s2679_s18 + $0x8] sm:$0xf] %vm1017_vm8, %v1496_v39  ;;  %1018 = vst.msk [vmem:[%s2679_s18] sm:$0xf] %vm1017_vm8, %v1494_v56  ;;  %v1495_v20 = vpack.c.bf16 %v957_v4, %v957_v4 }
 0x24b   : > { %1108 = vst.msk [vmem:[#allocation2 + $0x8] sm:$0xff] %vm439_vm5, %v1106_v11 }
 0x24c   : > { %1021 = vst.msk [vmem:[%s2679_s18 + $0xc] sm:$0xf] %vm1017_vm8, %v1497_v12  ;;  %1019 = vst.msk [vmem:[%s2679_s18 + $0x4] sm:$0xf] %vm1017_vm8, %v1495_v20 }
 0x250   : > { %v1112_v27 = vld [vmem:[#allocation2] sm:$0xff] }
 0x251   : > { %v1114_v30 = vsel %vm439_vm5, %v1112_v27, -inf }
 0x252   : > { %1115 = vmax.xlane.f32.xlu1 %v1114_v30  ;;  %v1113_v0 = vld [vmem:[#allocation2 + $0x8] sm:$0xff] }
 0x253   : > { %v1117_v6 = vsel %vm439_vm5, %v1113_v0, -inf }
 0x254   : > { %1118 = vmax.xlane.f32.xlu0 %v1117_v6 }
 0x256   : > { %v1544_v13 = vpop.f32.mrb[4].mxu0 }
 0x257   : > { %v1500_v36 = vpack.c.bf16 %v1544_v13, %v1544_v13  ;;  %v970_v51 = vpop.f32.mrb[5].mxu0 }
 0x258   : > { %v1498_v38 = vpack.c.bf16 %v970_v51, %v970_v51  ;;  %v1545_v35 = vpop.f32.mrb[6].mxu0 }
 0x259   : > { %1024 = vst.msk [vmem:[%s2679_s18 + $0x18] sm:$0xf] %vm1017_vm8, %v1500_v36  ;;  %v1501_v8 = vpack.c.bf16 %v1545_v35, %v1545_v35  ;;  %v973_v37 = vpop.f32.mrb[7].mxu0 }
 0x25a   : > { %1022 = vst.msk [vmem:[%s2679_s18 + $0x10] sm:$0xf] %vm1017_vm8, %v1498_v38  ;;  %v1499_v41 = vpack.c.bf16 %v973_v37, %v973_v37 }
 0x25b   : > { %1025 = vst.msk [vmem:[%s2679_s18 + $0x1c] sm:$0xf] %vm1017_vm8, %v1501_v8 }
 0x25c   : > { %1023 = vst.msk [vmem:[%s2679_s18 + $0x14] sm:$0xf] %vm1017_vm8, %v1499_v41 }
 0x2df   : > { %v1116_v48 = vpop.xlane.xlu1 %1115 }
 0x2e0   : > { %v1120_v18 = vsub.f32 %v1112_v27, %v1116_v48 }
 0x2e1   : > { %v1119_v54 = vpop.xlane.xlu0 %1118 }
 0x2e2   : > { %v1122_v32 = vmul.f32 1.442695, %v1120_v18  ;;  %v1121_v49 = vsub.f32 %v1113_v0, %v1119_v54 }
 0x2e4   : > { %1739 = vpow2.f32 %v1122_v32  ;;  %v1124_v17 = vmul.f32 1.442695, %v1121_v49 }
 0x2e6   : > { %1741 = vpow2.f32 %v1124_v17 }
 0x2ee   : > { %v2697_v50 = vpop.eup %1739 }
 0x2ef   : > { %v1126_v9 = vsel %vm439_vm5, %v2697_v50, 0.0 }
 0x2f0   : > { %v2701_v42 = vpop.eup %1741  ;;  %1127 = vadd.xlane.f32.xlu0 %v1126_v9 }
 0x2f1   : > { %v1129_v14 = vsel %vm439_vm5, %v2701_v42, 0.0 }
 0x2f4   : > { %1130 = vadd.xlane.f32.xlu0 %v1129_v14 }
 0x2f5   : > { %1904 = shalt.err (!%p1901_p6)
}
 0x2f6   : > { %s1905_s30 = scalar_lea.hbm %s2712_s16, 512  ;;  %s1909_s2 = scalar_lea.hbm %s2851_s6, 1024 }
 0x2f7   : > { %p1906_p2 = scmp.ne.s32.totalorder %s2712_s16, %s1905_s30  ;;  %p1910_p3 = scmp.lt.u32.totalorder %s2712_s16, %s2851_s6 }
 0x2f8   : > { %p1911_p11 = scmp.lt.u32.totalorder %s1909_s2, %s1905_s30  ;;  %p1913_p5 = scmp.lt.u32.totalorder %s1905_s30, %s2712_s16 }
 0x2f9   : > { %p1907_p1 = pnand %p1906_p2, %p2892_p10 }
 0x2fa   : > { %p1912_p0 = por %p1911_p11, %p1910_p3 }
 0x2fb   : > { %p1908_p8 = pneg %p1907_p1 }
 0x2fc   : > { %p1914_p13 = por %p1913_p5, %p1912_p0 }
 0x2fe   : > { %p1915_p9 = pnand %p1914_p13, %p1908_p8 }
 0x300   : > { %1918 = shalt.err (!%p1915_p9)
}
 0x301   : > { %s2058_s9 = smov 64   ;;  %s2059_s18 = smov 4  }
 0x302   : > { %1575 = dma.vmem_to_hbm [thread:$0]  (%p2892_p10), %s2714_s8, 512, %s2712_s16, %s2718_s3, %s2058_s9, %s2058_s9, %s2059_s18  }
 0x303   : > { %s2750_s4 = scalar_lea.hbm %s2850_s5, %s1504_s20  ;;  %s1172_s12 = sshll.u32 %s2652_s21, 4  ;;  %s2753_s12 = int_to_ptr.vmem [resolvable:$true] %s1172_s12 }
 0x304   : > { %s1147_s17 = scalar_lea.sflag [#allocation5], %s2350_s19  ;;  %s1919_s15 = scalar_lea.vmem %s2753_s12, 512 }
 0x305   : > { %p1920_p7 = scmp.ne.s32.totalorder %s2753_s12, %s1919_s15  ;;  %s2060_s30 = smov [#allocation12]  }
 0x306   : > { %s1923_s8 = sshll.u32 %s2060_s30, 4  ;;  %s1924_s8 = int_to_ptr.vmem [resolvable:$false] %s1923_s8 }
 0x307   : > { %p1921_p12 = pnand %p1920_p7, %p2892_p10  ;;  %s1925_s16 = scalar_lea.vmem %s1924_s8, 1024 }
 0x308   : > { %p1926_p6 = scmp.lt.s32.totalorder %s2753_s12, %s1924_s8  ;;  %p1927_p2 = scmp.lt.s32.totalorder %s1925_s16, %s1919_s15 }
 0x309   : > { %p1922_p4 = pneg %p1921_p12 }
 0x30a   : > { %p1928_p1 = por %p1927_p2, %p1926_p6 }
 0x30c   : > { %p1929_p8 = pnand %p1928_p1, %p1922_p4 }
 0x30e   : > { %1932 = shalt.err (!%p1929_p8)
}
 0x30f   : > { %s1933_s21 = scalar_lea.hbm %s2750_s4, 512  ;;  %s1937_s22 = scalar_lea.hbm %s2850_s5, 1024 }
 0x310   : > { %p1934_p3 = scmp.ne.s32.totalorder %s2750_s4, %s1933_s21  ;;  %p1938_p5 = scmp.lt.u32.totalorder %s2750_s4, %s2850_s5 }
 0x311   : > { %p1939_p13 = scmp.lt.u32.totalorder %s1937_s22, %s1933_s21  ;;  %p1941_p7 = scmp.lt.u32.totalorder %s1933_s21, %s2750_s4 }
 0x312   : > { %p1935_p11 = pnand %p1934_p3, %p2892_p10 }
 0x313   : > { %p1940_p9 = por %p1939_p13, %p1938_p5 }
 0x314   : > { %p1936_p0 = pneg %p1935_p11 }
 0x315   : > { %p1942_p12 = por %p1941_p7, %p1940_p9 }
 0x317   : > { %p1943_p4 = pnand %p1942_p12, %p1936_p0 }
 0x319   : > { %1946 = shalt.err (!%p1943_p4)
}
 0x31a   : > { %1574 = dma.vmem_to_hbm [thread:$0]  (%p2892_p10), %s2753_s12, 512, %s2750_s4, %s1147_s17, %s2058_s9, %s2058_s9, %s2059_s18  }
 0x31b   : > { %s1431_s11 = sshll.u32 %s2350_s19, 3  ;;  %s1506_s10 = sshll.u32 %s2037_s27, 7 }
 0x31c   : > { %s426_s13 = scalar_lea.vmem [#allocation15], %s1431_s11  ;;  %s2790_s17 = scalar_lea.hbm %s2852_s7, %s1506_s10 }
 0x31d   : > { %s1206_s15 = sshll.u32 %s426_s13, 4  ;;  %s2061_s19 = smov [#allocation15]   ;;  %s2792_s15 = int_to_ptr.vmem [resolvable:$true] %s1206_s15 }
 0x31e   : > { %s1947_s27 = scalar_lea.vmem %s2792_s15, 128  ;;  %s1951_s30 = sshll.u32 %s2061_s19, 4  ;;  %s1952_s30 = int_to_ptr.vmem [resolvable:$false] %s1951_s30 }
 0x31f   : > { %p1948_p6 = scmp.ne.s32.totalorder %s2792_s15, %s1947_s27  ;;  %s1953_s8 = scalar_lea.vmem %s1952_s30, 256 }
 0x320   : > { %p1954_p8 = scmp.lt.s32.totalorder %s2792_s15, %s1952_s30  ;;  %p1955_p3 = scmp.lt.s32.totalorder %s1953_s8, %s1947_s27 }
 0x321   : > { %p1949_p2 = pnand %p1948_p6, %p2892_p10 }
 0x322   : > { %p1956_p11 = por %p1955_p3, %p1954_p8 }
 0x323   : > { %p1950_p1 = pneg %p1949_p2 }
 0x325   : > { %p1957_p0 = pnand %p1956_p11, %p1950_p1 }
 0x37d   : > { %v1128_v34 = vpop.xlane.xlu0 %1127 }
 0x37e   : > { %1743 = vrcp.f32 %v1128_v34 }
 0x381   : > { %v1131_v43 = vpop.xlane.xlu0 %1130 }
 0x382   : > { %1745 = vrcp.f32 %v1131_v43 }
 0x388   : > { %v1744_v1 = vpop.eup %1743 }
 0x389   : > { %v1134_v16 = vmul.f32 %v1744_v1, %v2697_v50 }
 0x38b   : > { %v1502_v53 = vpack.c.bf16 %v1134_v16, %v1134_v16 }
 0x38c   : > { %v1746_v55 = vpop.eup %1745 }
 0x38d   : > { %v1135_v44 = vmul.f32 %v1746_v55, %v2701_v42  ;;  %1144 = vst.msk [vmem:[%s426_s13] sm:$0xf] %vm890_vm7, %v1502_v53 }
 0x38f   : > { %v1503_v58 = vpack.c.bf16 %v1135_v44, %v1135_v44 }
 0x391   : > { %1145 = vst.msk [vmem:[%s426_s13 + $0x4] sm:$0xf] %vm890_vm7, %v1503_v58 }
 0x392   : > { %1960 = shalt.err (!%p1957_p0)
}
 0x393   : > { %s1961_s16 = scalar_lea.hbm %s2790_s17, 128  ;;  %s1965_s14 = scalar_lea.hbm %s2852_s7, 256 }
 0x394   : > { %p1962_p5 = scmp.ne.s32.totalorder %s2790_s17, %s1961_s16  ;;  %p1966_p7 = scmp.lt.u32.totalorder %s2790_s17, %s2852_s7 }
 0x395   : > { %p1967_p12 = scmp.lt.u32.totalorder %s1965_s14, %s1961_s16  ;;  %p1969_p6 = scmp.lt.u32.totalorder %s1961_s16, %s2790_s17 }
 0x396   : > { %p1963_p13 = pnand %p1962_p5, %p2892_p10 }
 0x397   : > { %p1968_p4 = por %p1967_p12, %p1966_p7 }
 0x398   : > { %p1964_p9 = pneg %p1963_p13 }
 0x399   : > { %p1970_p2 = por %p1969_p6, %p1968_p4 }
 0x39b   : > { %p1971_p1 = pnand %p1970_p2, %p1964_p9 }
 0x39d   : > { %1974 = shalt.err (!%p1971_p1)
}
 0x39e   : > { %1576 = dma.vmem_to_hbm [thread:$0]  (%p2892_p10), %s2792_s15, 128, %s2790_s17, %s2718_s3, %s2058_s9, %s2058_s9, %s2059_s18  }
 0x39f PF: > { %s2893_s0 = sld [smem:[#allocation22_spill]]  ;;  %s1221_s11 = sand.u32 1, %s2025_s24  }
 0x3a0   : > { %p2895_p3 = scmp.ge.s32.totalorder %s2045_s29, 2  ;;  %s1222_s10 = scalar_lea.sflag [#allocation5], %s1221_s11 }
 0x3a5   : > { %p2894_p8 = scmp.ne.s32.totalorder %s2893_s0, 0 }
 0x3a7   : > { %p1598_p11 = pnand %p2895_p3, %p2894_p8 }
 0x3a9   : > { %2016 = dma.done.wait (!%p1598_p11), %s1222_s10, 512  }
 0x3aa   : > { %2018 = vsyncadd (!%p1598_p11), %s1222_s10, 4294966784  ;;  %s2896_s23 = sadd.s32 4294967294, %s2045_s29  }
 0x3ab   : > { %s1230_s13 = sand.u32 1, %s2896_s23  }
 0x3ac   : > { %s1231_s4 = scalar_lea.sflag [#allocation14], %s1230_s13 }
 0x3ad   : > { %2020 = dma.done.wait (!%p1598_p11), %s1231_s4, 640  }
 0x3ae   : > { %2022 = vsyncadd (!%p1598_p11), %s1231_s4, 4294966656  ;;  %s31_s29 = sadd.s32 1, %s2045_s29   ;;  %s2897_s3 = sld [smem:[#allocation24_spill]] }
 0x3af   : > { %p28_p10 = scmp.ge.s32.totalorder %s31_s29, 4   ;;  %s2898_s9 = sld [smem:[#allocation23_spill]] }
 0x3b0   : > { %s2899_s24 = smov %s2029_s25  ;;  %s2900_s25 = smov %s2033_s26 }
 0x3b1   : > { %s2902_s27 = smov %s2041_s28  ;;  %30 = sbr.rel (!%p28_p10) target bundleno = 16 (0x10), region = 150 }
 0x3b4   : > { %s2901_s26 = smov %s2897_s3 }
 0x3b5   : > { %s2903_s28 = smov %s2898_s9 }
 0x3b8   :  { %1245 = vsyncpa [#allocation4], 1 }
 0x3b9   :  { %1247 = vsyncpa [#allocation4 + $0x1], 1 }
 0x3ba   :  { %1248 = vsyncpa [#allocation7], 1 }
 0x3bb   :  { %1250 = vsyncpa [#allocation7 + $0x1], 1 }
 0x3bc   :  { %1251 = vsyncpa [#allocation10], 1 }
 0x3bd   :  { %1252 = vsyncpa [#allocation5], 1 }
 0x3be   :  { %1254 = vsyncpa [#allocation5 + $0x1], 1 }
 0x3bf   :  { %1255 = vsyncpa [#allocation14], 1 }
 0x3c0   :  { %1257 = vsyncpa [#allocation14 + $0x1], 1 }

// kernel: _lambda_.8
= control target key start
LH: loop header
LB: loop body
LE: loop exit
PB: predicated region body
PF: predicated region fallthrough
CT: control target
= control target key end

     0   :  { %s3318_s0 = inlined_call_operand.hbm [shape: bf16[2,6,16,49], index: 0, kind: input, shape index: {}, may-alias: {0,1,2}]   ;;  %s3319_s1 = inlined_call_operand.hbm [shape: bf16[2,6,16,49], index: 1, kind: input, shape index: {}, may-alias: {0,1,2}]   ;;  %s3320_s2 = inlined_call_operand.hbm [shape: bf16[2,6,16,49], index: 2, kind: input, shape index: {}, may-alias: {0,1,2}]   ;;  %s3321_s3 = inlined_call_operand.hbm [shape: bf16[27,8,16], index: 3, kind: input, shape index: {}]   ;;  %s3322_s4 = inlined_call_operand.hbm [shape: f32[8,1], index: 4, kind: input, shape index: {}]   ;;  %s3323_s5 = inlined_call_operand.hbm [shape: bf16[2,4,8,28], index: 5, kind: output, shape index: {}]  }
   0x1   :  { %3347 = sst [smem:[#allocation28_spill]] %s3318_s0 }
   0x2   :  { %3348 = sst [smem:[#allocation29_spill]] %s3319_s1 }
   0x3   :  { %3349 = sst [smem:[#allocation30_spill]] %s3320_s2 }
   0x4   :  { %3350 = sst [smem:[#allocation31_spill]] %s3321_s3 }
   0x5   :  { %3351 = sst [smem:[#allocation32_spill]] %s3322_s4 }
   0x6   :  { %3352 = sst [smem:[#allocation33_spill]] %s3323_s5 }
   0x7   :  { %10 = vsyncpa [#allocation3], 0 }
   0x8   :  { %12 = vsyncpa [#allocation3 + $0x1], 0 }
   0x9   :  { %13 = vsyncpa [#allocation6], 0 }
   0xa   :  { %15 = vsyncpa [#allocation6 + $0x1], 0 }
   0xb   :  { %16 = vsyncpa [#allocation9], 0 }
   0xc   :  { %17 = vsyncpa [#allocation4], 0 }
   0xd   :  { %19 = vsyncpa [#allocation4 + $0x1], 0  ;;  %s2705_s18 = smov 0   ;;  %s2707_s19 = smov 0  }
   0xe   :  { %s2709_s20 = smov 0   ;;  %s2711_s21 = smov 0  }
   0xf   :  { %s2713_s22 = smov 0   ;;  %s2715_s23 = smov 0  }
  0x10   :  { %s2717_s24 = smov 0   ;;  %s2719_s25 = smov 0  }
  0x11   :  { %s2721_s26 = smov 0   ;;  %s2723_s27 = smov 0  }
  0x12   :  { %s2725_s28 = smov 0   ;;  %s2727_s29 = smov 0  }
  0x13   :  { %s2729_s30 = smov 0   ;;  %s2731_s6 = smov 0  }
  0x14 LB: > { %3353 = sst [smem:[#allocation17_spill]] %s2602_s18  ;;  %s2776_s7 = sadd.s32 4294967295, %s2654_s6   ;;  %s2654_s6 = sphi %s2731_s6, %s25_s6   ;;  %s2650_s30 = sphi %s2729_s30, %s3419_s30   ;;  %s2646_s29 = sphi %s2727_s29, %s3418_s29   ;;  %s2642_s28 = sphi %s2725_s28, %s3427_s28   ;;  %s2638_s27 = sphi %s2723_s27, %s3416_s27   ;;  %s2634_s26 = sphi %s2721_s26, %s3426_s26   ;;  %s2630_s25 = sphi %s2719_s25, %s3425_s25   ;;  %s2626_s24 = sphi %s2717_s24, %s3424_s24   ;;  %s2622_s23 = sphi %s2715_s23, %s3423_s23   ;;  %s2618_s22 = sphi %s2713_s22, %s3422_s22   ;;  %s2614_s21 = sphi %s2711_s21, %s3414_s21   ;;  %s2610_s20 = sphi %s2709_s20, %s3421_s20   ;;  %s2606_s19 = sphi %s2707_s19, %s3420_s19   ;;  %s2602_s18 = sphi %s2705_s18, %s3413_s18  }
  0x15   : > { %3354 = sst [smem:[#allocation18_spill]] %s2606_s19  ;;  %p1902_p0 = scmp.ge.s32.totalorder %s2654_s6, 1 }
  0x16   : > { %3355 = sst [smem:[#allocation19_spill]] %s2618_s22  ;;  %p3324_p1 = scmp.eq.s32.totalorder %s2776_s7, 0 }
  0x17   : > { %3356 = sst [smem:[#allocation20_spill]] %s2638_s27  ;;  %p200_p3 = scmp.lt.s32.totalorder %s2654_s6, 9 }
  0x18   : > { %3357 = sst [smem:[#allocation21_spill]] %s2642_s28  ;;  %s2656_s9 = smov [#allocation8]  }
  0x19   : > { %3358 = sst [smem:[#allocation22_spill]] %s2646_s29  ;;  %p2782_p4 = pnand %p1902_p0, %p200_p3 }
  0x1a   : > { %3359 = sst [smem:[#allocation23_spill]] %s2650_s30  ;;  %s212_s10 = sshll.u32 %s2656_s9, 4  ;;  %s213_s10 = int_to_ptr.vmem [resolvable:$true] %s212_s10 }
  0x1b   : > { %s3360_s8 = scalar_select %p2782_p4, 1, 0 }
  0x1c   : > { %p2190_p5 = pneg %p2782_p4  ;;  %s3363_s3 = sld [smem:[#allocation31_spill]] }
  0x1d   : > { %3361 = sst [smem:[#allocation24_spill]] %s3360_s8 }
  0x1e   : > { %p2790_p6 = pnand %p2190_p5, %p3324_p1 }
  0x20   : > { %p3341_p8 = pneg %p2790_p6 }
  0x22   : > { %s2348_s14 = scalar_lea.hbm %s3363_s3, 1728 }
  0x23   : > { %p2349_p7 = scmp.ne.s32.totalorder %s3363_s3, %s2348_s14  ;;  %p2355_p11 = scmp.lt.u32.totalorder %s2348_s14, %s3363_s3 }
  0x25   : > { %p2351_p9 = pnand %p3341_p8, %p2349_p7 }
  0x27   : > { %p2352_p10 = pneg %p2351_p9 }
  0x29   : > { %p2357_p12 = pnand %p2355_p11, %p2352_p10 }
  0x2b   : > { %2360 = shalt.err (!%p2357_p12)
}
  0x2c   : > { %s2361_s12 = scalar_lea.vmem %s213_s10, 1728  ;;  %p2369_p5 = scmp.lt.s32.totalorder %s213_s10, %s213_s10 }
  0x2d   : > { %p2362_p13 = scmp.ne.s32.totalorder %s213_s10, %s2361_s12  ;;  %p2370_p2 = scmp.lt.s32.totalorder %s2361_s12, %s2361_s12 }
  0x2f   : > { %p2364_p0 = pnand %p2362_p13, %p3341_p8  ;;  %p2371_p1 = por %p2370_p2, %p2369_p5 }
  0x31   : > { %p2365_p3 = pneg %p2364_p0 }
  0x33   : > { %p2372_p4 = pnand %p2371_p1, %p2365_p3 }
  0x35   : > { %2375 = shalt.err (!%p2372_p4)
}
  0x36   : > { %s3327_s13 = smov 64   ;;  %s3329_s14 = smov 4  }
  0x37   : > { %2193 = dma.hbm_to_vmem [thread:$0]  (!%p2790_p6), %s3363_s3, 1728, %s213_s10, [#allocation9], %s3327_s13, %s3327_s13, %s3329_s14  }
  0x38   : > { %s34_s17 = sadd.s32 1, %s2646_s29  ;;  %s37_s9 = sadd.s32 1, %s2650_s30 }
  0x39   : > { %p35_p1 = scmp.ge.s32.totalorder %s34_s17, 4  ;;  %p3340_p2 = scmp.eq.s32.totalorder %s2654_s6, 0 }
  0x3a   : > { %s76_s12 = sadd.s32 1, %s2622_s23  ;;  %p83_p4 = scmp.ne.s32.totalorder %s2622_s23, %s2618_s22 }
  0x3b   : > { %s2825_s5 = scalar_select %p35_p1, 0, %s34_s17  }
  0x3c   : > { %s3429_s9 = smov (!%p35_p1, %s37_s9), %s2650_s30  ;;  %p2833_p9 = por %p83_p4, %p3340_p2 }
  0x3d   : > { %3364 = sst [smem:[#allocation25_spill]] %s2825_s5  ;;  %s42_s27 = ssub.s32 %s2646_s29, %s2825_s5 }
  0x3e   : > { %s70_s28 = sadd.s32 1, %s2825_s5  ;;  %p39_p7 = scmp.ge.s32.totalorder %s3429_s9, 2 }
  0x3f   : > { %s72_s10 = ssub.s32 %s34_s17, %s70_s28  ;;  %p89_p10 = scmp.ne.s32.totalorder %s2618_s22, %s2614_s21 }
  0x40   : > { %s3431_s9 = smov (%p39_p7, %s3429_s9), 0  ;;  %p3367_p11 = scmp.eq.s32.totalorder %s2776_s7, 0 }
  0x41   : > { %3366 = sst [smem:[#allocation26_spill]] %s3431_s9  ;;  %s99_s13 = sadd.s32 2, %s2646_s29 }
  0x42   : > { %p2843_p12 = por %p89_p10, %p3367_p11  ;;  %s41_s28 = ssub.s32 %s2650_s30, %s3431_s9 }
  0x43   : > { %s100_s17 = sadd.s32 2, %s2825_s5  ;;  %s2851_s14 = sor.u32 %s42_s27, %s41_s28 }
  0x44   : > { %s3368_s16 = scalar_select %p2843_p12, 1, 0 }
  0x45   : > { %s73_s3 = sor.u32 %s72_s10, %s41_s28  ;;  %s102_s21 = ssub.s32 %s99_s13, %s100_s17 }
  0x46   : > { %3369 = sst [smem:[#allocation27_spill]] %s3368_s16  ;;  %p74_p0 = scmp.eq.s32.totalorder %s73_s3, 0 }
  0x47   : > { %p3339_p3 = scmp.lt.s32.totalorder %s2654_s6, 8  ;;  %s103_s8 = sor.u32 %s102_s21, %s41_s28 }
  0x48   : > { %s2856_s22 = scalar_select %p74_p0, %s2622_s23, %s76_s12  }
  0x49   : > { %s1907_s2 = sshll.u32 %s2646_s29, 1  ;;  %p2859_p5 = scmp.eq.s32.totalorder %s103_s8, 0 }
  0x4a   : > { %s2173_s9 = smul.u32 12, %s2650_s30  ;;  %s260_s5 = sand.u32 1, %s2654_s6  }
  0x4b   : > { %s3370_s16 = scalar_select %p2859_p5, 1, 0 }
  0x4c   : > { %s262_s27 = sand.u32 1, %s2622_s23   ;;  %s247_s18 = sadd.s32 %s2173_s9, %s1907_s2 }
  0x4d   : > { %s2866_s19 = sshll.u32 %s247_s18, 6  ;;  %s1909_s3 = sshll.u32 %s262_s27, 3 }
  0x4e   : > { %s3371_s1 = sld [smem:[#allocation29_spill]]  ;;  %s264_s8 = scalar_lea.vmem [#allocation5], %s1909_s3 }
  0x4f   : > { %s274_s28 = sshll.u32 %s264_s8, 4  ;;  %p2880_p1 = pnand %p3339_p3, %p2833_p9  ;;  %s2874_s28 = int_to_ptr.vmem [resolvable:$true] %s274_s28 }
  0x50   : > { %s2659_s18 = smov [#allocation10]   ;;  %s2886_s21 = scalar_lea.sflag [#allocation6], %s260_s5 }
  0x51   : > { %s2884_s9 = sshll.u32 %s2659_s18, 4  ;;  %p2378_p7 = pneg %p2880_p1  ;;  %s227_s9 = int_to_ptr.vmem [resolvable:$true] %s2884_s9 }
  0x54   : > { %s1787_s17 = scalar_lea.hbm %s3371_s1, %s2866_s19  ;;  %s2381_s13 = scalar_lea.hbm %s3371_s1, 1536 }
  0x55   : > { %s2872_s12 = scalar_lea.hbm %s1787_s17, 128  ;;  %s2406_s27 = scalar_lea.hbm %s1787_s17, 256 }
  0x56   : > { %p2377_p4 = scmp.ne.s32.totalorder %s2872_s12, %s2406_s27  ;;  %p2382_p9 = scmp.lt.u32.totalorder %s2872_s12, %s3371_s1 }
  0x57   : > { %p2383_p0 = scmp.lt.u32.totalorder %s2381_s13, %s2406_s27  ;;  %p2385_p2 = scmp.lt.u32.totalorder %s2406_s27, %s2872_s12 }
  0x58   : > { %p2379_p10 = pnand %p2378_p7, %p2377_p4 }
  0x59   : > { %p2384_p3 = por %p2383_p0, %p2382_p9 }
  0x5a   : > { %p2380_p11 = pneg %p2379_p10 }
  0x5b   : > { %p2386_p13 = por %p2385_p2, %p2384_p3 }
  0x5d   : > { %p2387_p8 = pnand %p2386_p13, %p2380_p11 }
  0x5f   : > { %2390 = shalt.err (!%p2387_p8)
}
  0x60   : > { %s2391_s5 = scalar_lea.vmem %s2874_s28, 128  ;;  %s2660_s17 = smov [#allocation5]  }
  0x61   : > { %p2392_p4 = scmp.ne.s32.totalorder %s2874_s28, %s2391_s5  ;;  %s2396_s18 = sshll.u32 %s2660_s17, 4  ;;  %s2397_s18 = int_to_ptr.vmem [resolvable:$false] %s2396_s18 }
  0x62   : > { %s2398_s15 = scalar_lea.vmem %s2397_s18, 256  ;;  %p2399_p5 = scmp.lt.s32.totalorder %s2874_s28, %s2397_s18 }
  0x63   : > { %p2394_p10 = pnand %p2392_p4, %p2378_p7  ;;  %p2400_p9 = scmp.lt.s32.totalorder %s2398_s15, %s2391_s5 }
  0x65   : > { %p2395_p12 = pneg %p2394_p10  ;;  %p2401_p0 = por %p2400_p9, %p2399_p5 }
  0x67   : > { %p2402_p2 = pnand %p2401_p0, %p2395_p12 }
  0x69   : > { %2405 = shalt.err (!%p2402_p2)
}
  0x6a   : > { %s3373_s27 = smov 4   ;;  %s3374_s3 = smov 64  }
  0x6b   : > { %2203 = dma.hbm_to_vmem [thread:$0]  (!%p2880_p1), %s2872_s12, 128, %s2874_s28, %s2886_s21, %s3374_s3, %s3374_s3, %s3373_s27  }
  0x6c   : > { %s3375_s4 = sld [smem:[#allocation32_spill]]  ;;  %p3376_p12 = pneg %p2790_p6 }
  0x72   : > { %s2407_s8 = scalar_lea.hbm %s3375_s4, 128 }
  0x73   : > { %p2408_p8 = scmp.ne.s32.totalorder %s3375_s4, %s2407_s8  ;;  %p2414_p5 = scmp.lt.u32.totalorder %s2407_s8, %s3375_s4 }
  0x75   : > { %p2410_p13 = pnand %p2408_p8, %p3376_p12 }
  0x77   : > { %p2411_p3 = pneg %p2410_p13 }
  0x79   : > { %p2416_p7 = pnand %p2414_p5, %p2411_p3 }
  0x7b   : > { %2419 = shalt.err (!%p2416_p7)
}
  0x7c   : > { %s2420_s12 = scalar_lea.vmem %s227_s9, 128  ;;  %p3377_p11 = pmov %p3376_p12 }
  0x7d   : > { %p2421_p1 = scmp.ne.s32.totalorder %s227_s9, %s2420_s12  ;;  %p2428_p9 = scmp.lt.s32.totalorder %s227_s9, %s227_s9 }
  0x7e   : > { %p2429_p0 = scmp.lt.s32.totalorder %s2420_s12, %s2420_s12 }
  0x7f   : > { %p2423_p4 = pnand %p2421_p1, %p3377_p11 }
  0x80   : > { %p2430_p2 = por %p2429_p0, %p2428_p9 }
  0x81   : > { %p2424_p10 = pneg %p2423_p4 }
  0x83   : > { %p2431_p8 = pnand %p2430_p2, %p2424_p10 }
  0x85   : > { %2434 = shalt.err (!%p2431_p8)
}
  0x86   : > { %2196 = dma.hbm_to_vmem [thread:$0]  (!%p2790_p6), %s3375_s4, 128, %s227_s9, [#allocation9]  }
  0x87   : > { %s1901_s13 = sadd.s32 4294967294, %s2654_s6   ;;  %s46_s11 = sadd.s32 1, %s2634_s26 }
  0x88   : > { %p3378_p12 = scmp.eq.s32.totalorder %s2851_s14, 0  ;;  %p53_p13 = scmp.ne.s32.totalorder %s2634_s26, %s2630_s25 }
  0x89   : > { %p59_p3 = scmp.ne.s32.totalorder %s2630_s25, %s2626_s24  ;;  %p193_p5 = scmp.eq.s32.totalorder %s1901_s13, 7 }
  0x8a   : > { %s2942_s10 = scalar_select %p3378_p12, %s2634_s26, %s46_s11  }
  0x8b   : > { %s237_s8 = sand.u32 1, %s2634_s26   ;;  %p3379_p7 = scmp.eq.s32.totalorder %s2654_s6, 0 }
  0x8c   : > { %p3380_p11 = scmp.eq.s32.totalorder %s2776_s7, 0  ;;  %p3382_p10 = scmp.eq.s32.totalorder %s2776_s7, 7 }
  0x8d   : > { %p55_p1 = por %p3379_p7, %p53_p13  ;;  %p2963_p6 = por %p193_p5, %p59_p3 }
  0x8e   : > { %p2953_p4 = por %p3380_p11, %p59_p3  ;;  %p2959_p9 = por %p3382_p10, %p53_p13 }
  0x8f   : > { %s3384_s14 = scalar_select %p2963_p6, 1, 0 }
  0x90   : > { %s3383_s9 = scalar_select %p2959_p9, 1, 0 }
  0x91   : > { %s1906_s17 = sshll.u32 %s237_s8, 3  ;;  %s3385_s0 = sld [smem:[#allocation28_spill]] }
  0x92   : > { %s241_s28 = scalar_lea.vmem [#allocation2], %s1906_s17  ;;  %p3386_p0 = scmp.lt.s32.totalorder %s2654_s6, 8 }
  0x93   : > { %s250_s15 = sshll.u32 %s241_s28, 4  ;;  %s2981_s11 = scalar_lea.sflag [#allocation3], %s237_s8  ;;  %s2979_s15 = int_to_ptr.vmem [resolvable:$true] %s250_s15 }
  0x94   : > { %p2975_p2 = pnand %p3386_p0, %p55_p1 }
  0x96   : > { %p2437_p12 = pneg %p2975_p2 }
  0x97   : > { %s2971_s12 = scalar_lea.hbm %s3385_s0, %s2866_s19  ;;  %s2440_s28 = scalar_lea.hbm %s3385_s0, 1536 }
  0x98   : > { %s2435_s2 = scalar_lea.hbm %s2971_s12, 128  ;;  %p2441_p5 = scmp.lt.u32.totalorder %s2971_s12, %s3385_s0 }
  0x99   : > { %p2436_p8 = scmp.ne.s32.totalorder %s2971_s12, %s2435_s2  ;;  %p2442_p7 = scmp.lt.u32.totalorder %s2440_s28, %s2435_s2 }
  0x9a   : > { %p2444_p11 = scmp.lt.u32.totalorder %s2435_s2, %s2971_s12 }
  0x9b   : > { %p2438_p13 = pnand %p2437_p12, %p2436_p8  ;;  %p2443_p1 = por %p2442_p7, %p2441_p5 }
  0x9d   : > { %p2439_p3 = pneg %p2438_p13  ;;  %p2445_p10 = por %p2444_p11, %p2443_p1 }
  0x9f   : > { %p2446_p0 = pnand %p2445_p10, %p2439_p3 }
  0xa1   : > { %2449 = shalt.err (!%p2446_p0)
}
  0xa2   : > { %s2450_s8 = scalar_lea.vmem %s2979_s15, 128  ;;  %s2661_s17 = smov [#allocation2]  }
  0xa3   : > { %p2451_p8 = scmp.ne.s32.totalorder %s2979_s15, %s2450_s8  ;;  %s2455_s18 = sshll.u32 %s2661_s17, 4  ;;  %s2456_s18 = int_to_ptr.vmem [resolvable:$false] %s2455_s18 }
  0xa4   : > { %s2457_s1 = scalar_lea.vmem %s2456_s18, 256  ;;  %p2458_p9 = scmp.lt.s32.totalorder %s2979_s15, %s2456_s18 }
  0xa5   : > { %p2453_p13 = pnand %p2451_p8, %p2437_p12  ;;  %p2459_p5 = scmp.lt.s32.totalorder %s2457_s1, %s2450_s8 }
  0xa7   : > { %p2454_p6 = pneg %p2453_p13  ;;  %p2460_p7 = por %p2459_p5, %p2458_p9 }
  0xa9   : > { %p2461_p1 = pnand %p2460_p7, %p2454_p6 }
  0xab   : > { %2464 = shalt.err (!%p2461_p1)
}
  0xac   : > { %s3388_s4 = sld [smem:[#allocation18_spill]]  ;;  %s3389_s2 = sld [smem:[#allocation17_spill]] }
  0xad   : > { %2200 = dma.hbm_to_vmem [thread:$0]  (!%p2975_p2), %s2971_s12, 128, %s2979_s15, %s2981_s11, %s3374_s3, %s3374_s3, %s3373_s27  }
  0xae   : > { %s106_s13 = sadd.s32 1, %s2610_s20  ;;  %p3390_p6 = scmp.ne.s32.totalorder %s3370_s16, 0 }
  0xaf   : > { %p3391_p12 = scmp.eq.s32.totalorder %s2654_s6, 0  ;;  %s286_s8 = sand.u32 1, %s2610_s20  }
  0xb0   : > { %s3018_s28 = scalar_select %p3390_p6, %s2610_s20, %s106_s13  }
  0xb1   : > { %s3392_s1 = sld [smem:[#allocation30_spill]]  ;;  %p3393_p10 = scmp.eq.s32.totalorder %s2776_s7, 0 }
  0xb2   : > { %p113_p9 = scmp.ne.s32.totalorder %s2610_s20, %s3388_s4  ;;  %p119_p11 = scmp.ne.s32.totalorder %s3388_s4, %s3389_s2 }
  0xb3   : > { %s1912_s29 = sshll.u32 %s286_s8, 3  ;;  %p3395_p2 = scmp.lt.s32.totalorder %s2654_s6, 8 }
  0xb4   : > { %p115_p3 = por %p113_p9, %p3391_p12  ;;  %p3031_p0 = por %p119_p11, %p3393_p10 }
  0xb5   : > { %s288_s16 = scalar_lea.vmem [#allocation7], %s1912_s29 }
  0xb6   : > { %s3394_s30 = scalar_select %p3031_p0, 1, 0 }
  0xb7   : > { %s1796_s0 = scalar_lea.hbm %s3392_s1, %s2866_s19  ;;  %s298_s15 = sshll.u32 %s288_s16, 4  ;;  %s3043_s15 = int_to_ptr.vmem [resolvable:$true] %s298_s15 }
  0xb8   : > { %s3035_s12 = scalar_lea.hbm %s1796_s0, 256  ;;  %p3039_p8 = pnand %p3395_p2, %p115_p3 }
  0xb9   : > { %s2495_s19 = scalar_lea.hbm %s1796_s0, 384  ;;  %s2470_s2 = scalar_lea.hbm %s3392_s1, 1536 }
  0xba   : > { %p2466_p13 = scmp.ne.s32.totalorder %s3035_s12, %s2495_s19  ;;  %p2467_p5 = pneg %p3039_p8 }
  0xbb   : > { %p2471_p9 = scmp.lt.u32.totalorder %s3035_s12, %s3392_s1  ;;  %p2472_p6 = scmp.lt.u32.totalorder %s2470_s2, %s2495_s19 }
  0xbc   : > { %p2468_p7 = pnand %p2467_p5, %p2466_p13  ;;  %p2474_p3 = scmp.lt.u32.totalorder %s2495_s19, %s3035_s12 }
  0xbd   : > { %p2473_p12 = por %p2472_p6, %p2471_p9 }
  0xbe   : > { %p2469_p1 = pneg %p2468_p7 }
  0xbf   : > { %p2475_p11 = por %p2474_p3, %p2473_p12 }
  0xc1   : > { %p2476_p10 = pnand %p2475_p11, %p2469_p1 }
  0xc3   : > { %2479 = shalt.err (!%p2476_p10)
}
  0xc4   : > { %s2480_s0 = scalar_lea.vmem %s3043_s15, 128  ;;  %s2662_s17 = smov [#allocation7]  }
  0xc5   : > { %p2481_p2 = scmp.ne.s32.totalorder %s3043_s15, %s2480_s0  ;;  %s2485_s18 = sshll.u32 %s2662_s17, 4  ;;  %s2486_s18 = int_to_ptr.vmem [resolvable:$false] %s2485_s18 }
  0xc6   : > { %s2487_s16 = scalar_lea.vmem %s2486_s18, 256  ;;  %p2488_p0 = scmp.lt.s32.totalorder %s3043_s15, %s2486_s18 }
  0xc7   : > { %p2483_p13 = pnand %p2481_p2, %p2467_p5  ;;  %p2489_p9 = scmp.lt.s32.totalorder %s2487_s16, %s2480_s0 }
  0xc9   : > { %p2484_p7 = pneg %p2483_p13  ;;  %p2490_p6 = por %p2489_p9, %p2488_p0 }
  0xcb   : > { %p2491_p12 = pnand %p2490_p6, %p2484_p7 }
  0xcd   : > { %2494 = shalt.err (!%p2491_p12)
}
  0xce   : > { %2206 = dma.hbm_to_vmem [thread:$0]  (!%p3039_p8), %s3035_s12, 128, %s3043_s15, %s2886_s21, %s3374_s3, %s3374_s3, %s3373_s27  }
  0xcf   : > { %s3397_s19 = sld [smem:[#allocation24_spill]] }
  0xd5   : > { %p3398_p5 = scmp.ne.s32.totalorder %s3397_s19, 0 }
  0xd6   : > { %s3076_s4 = sand.u32 (!%p3398_p5), 1, %s2630_s25  }
  0xd7   : > { %310 = sbr.rel (%p3398_p5) target bundleno = 703 (0x2bf), region = 40  ;;  %s1916_s29 = sshll.u32 (!%p3398_p5), %s3076_s4, 3 }
  0xd8   : > { %s313_s2 = scalar_lea.sflag (!%p3398_p5), [#allocation3], %s3076_s4  ;;  %s316_s13 = scalar_lea.vmem (!%p3398_p5), [#allocation2], %s1916_s29 }
  0xde   : > { %2581 = dma.done.wait (%p2953_p4), %s313_s2, 128  }
  0xdf   : > { %2583 = vsyncadd (%p2953_p4), %s313_s2, 4294967168  ;;  %s3399_s11 = sld [smem:[#allocation19_spill]]  ;;  %s3400_s21 = sld [smem:[#allocation27_spill]] }
  0xe0   : > { %s321_s27 = sand.u32 1, %s2776_s7  }
  0xe1   : > { %s322_s15 = scalar_lea.sflag [#allocation6], %s321_s27 }
  0xe5   : > { %s323_s3 = sand.u32 1, %s3399_s11   ;;  %p3401_p0 = scmp.ne.s32.totalorder %s3400_s21, 0 }
  0xe6   : > { %s3086_s12 = sshll.u32 %s323_s3, 3 }
  0xe7   : > { %s325_s8 = scalar_lea.vmem [#allocation5], %s3086_s12 }
  0xe8   : > { %2585 = dma.done.wait (%p3401_p0), %s322_s15, 128  }
  0xe9   : > { %2587 = vsyncadd (%p3401_p0), %s322_s15, 4294967168  ;;  %s3402_s0 = sld [smem:[#allocation18_spill]]  ;;  %p3403_p4 = scmp.ne.s32.totalorder %s3394_s30, 0 }
  0xef   : > { %s332_s17 = sand.u32 1, %s3402_s0  }
  0xf0   : > { %s3094_s5 = sshll.u32 %s332_s17, 3 }
  0xf1   : > { %s334_s18 = scalar_lea.vmem [#allocation7], %s3094_s5 }
  0xf2   : > { %2589 = dma.done.wait (%p3403_p4), %s322_s15, 128  }
  0xf3   : > { %2591 = vsyncadd (%p3403_p4), %s322_s15, 4294967168  ;;  %p3404_p8 = scmp.eq.s32.totalorder %s2776_s7, 0 }
  0xf5   : > { %2593 = dma.done.wait (%p3404_p8), [#allocation9], 1856   ;;  %p3405_p1 = pmov %p3404_p8 }
  0xf6   : > { %v2663_v0 = vmov 0.0   ;;  %vm2664_vm0 = vmmov 0   ;;  %v2345_v1 = vld [vmem:[%s316_s13] sm:$0xff]   ;;  %s2665_s30 = smov 127   ;;  %s2666_s16 = smov 121   ;;  %vm399_vm1 = vcmask 130048  }
  0xf7   : > { %2595 = vsyncadd (%p3405_p1), [#allocation9], 4294965440  ;;  %2011 = vmatprep.subr.bf16.mxu0 %v2663_v0  ;;  %2017 = vmatprep.subr.bf16.mxu1 %v2663_v0  ;;  %v388_v2 = vld [vmem:[#allocation8] sm:$0xf]  ;;  %s2667_s7 = smov 126   ;;  %s2668_s19 = smov 120  }
  0xf8   : > { %2013 = vmatprep.mubr.msk.bf16.mxu0 %vm2664_vm0, %v2663_v0  ;;  %2019 = vmatprep.mubr.msk.bf16.mxu1 %vm2664_vm0, %v2663_v0  ;;  %s2669_s29 = smov 119   ;;  %s2670_s2 = smov 114   ;;  %v2346_v3 = vld [vmem:[%s325_s8] sm:$0xff]   ;;  %v3123_v4 = vld [vmem:[%s334_s18] sm:$0xff]   ;;  %v2673_v6 = vmov 0   ;;  %vm1726_vm2 = vcmask 224256  }
  0xf9   : > { %396 = vrot.lane.b32.xlu0 %v2345_v1, %s2665_s30  ;;  %538 = vrot.lane.b32.xlu1 %v2345_v1, %s2666_s16  ;;  %s2671_s13 = smov 113   ;;  %s2672_s11 = smov 112   ;;  %v1718_v5 = vld [vmem:[#allocation10] sm:$0xff]  ;;  %v390_v9 = vld [vmem:[#allocation8 + $0x4] sm:$0xf] }
  0xfa   : > { %2018 = vmatpush3.bf16.msra.mxu1 %v2345_v1  ;;  %2344 = vset.pattern.permute.xlu0 %v2673_v6  ;;  %v537_v10 = vld [vmem:[#allocation8 + $0xc] sm:$0xf]  ;;  %v488_v13 = vld [vmem:[#allocation8 + $0x8] sm:$0xf]  ;;  %v635_v14 = vld [vmem:[#allocation8 + $0x14] sm:$0xf] }
  0xfb   : > { %2029 = vmatprep.subr.bf16.mxu1 %v2663_v0  ;;  %v586_v17 = vld [vmem:[#allocation8 + $0x10] sm:$0xf]  ;;  %v733_v18 = vld [vmem:[#allocation8 + $0x1c] sm:$0xf]  ;;  %v684_v21 = vld [vmem:[#allocation8 + $0x18] sm:$0xf] }
  0xfc   : > { %v831_v22 = vld [vmem:[#allocation8 + $0x24] sm:$0xf]  ;;  %v782_v24 = vld [vmem:[#allocation8 + $0x20] sm:$0xf]  ;;  %v932_v25 = vld [vmem:[#allocation8 + $0x2c] sm:$0xf] }
  0xfd   : > { %489 = vrot.lane.b32.xlu0 %v2345_v1, %s2667_s7  ;;  %587 = vrot.lane.b32.xlu1 %v2345_v1, %s2668_s19  ;;  %v883_v28 = vld [vmem:[#allocation8 + $0x28] sm:$0xf]  ;;  %v1030_v29 = vld [vmem:[#allocation8 + $0x34] sm:$0xf]  ;;  %v981_v32 = vld [vmem:[#allocation8 + $0x30] sm:$0xf] }
  0xfe   : > { %2020 = vmatmul.mubr.msk.bf16.vlgmr.msra.gmra.mrb[0].mxu1 %vm399_vm1, %v388_v2  ;;  %v1128_v33 = vld [vmem:[#allocation8 + $0x3c] sm:$0xf]  ;;  %v1079_v37 = vld [vmem:[#allocation8 + $0x38] sm:$0xf]  ;;  %v1226_v38 = vld [vmem:[#allocation8 + $0x44] sm:$0xf] }
  0xff   : > { %2031 = vmatprep.mubr.msk.bf16.mxu1 %vm2664_vm0, %v2663_v0  ;;  %v1177_v40 = vld [vmem:[#allocation8 + $0x40] sm:$0xf]  ;;  %v1327_v41 = vld [vmem:[#allocation8 + $0x4c] sm:$0xf]  ;;  %v1275_v43 = vld [vmem:[#allocation8 + $0x48] sm:$0xf] }
 0x100   : > { %v1425_v44 = vld [vmem:[#allocation8 + $0x54] sm:$0xf]  ;;  %v1376_v47 = vld [vmem:[#allocation8 + $0x50] sm:$0xf]  ;;  %v1523_v48 = vld [vmem:[#allocation8 + $0x5c] sm:$0xf] }
 0x101   : > { %636 = vrot.lane.b32.xlu0 %v2345_v1, %s2669_s29  ;;  %685 = vrot.lane.b32.xlu1 %v2345_v1, %s2670_s2  ;;  %v1474_v51 = vld [vmem:[#allocation8 + $0x58] sm:$0xf]  ;;  %v1621_v52 = vld [vmem:[#allocation8 + $0x64] sm:$0xf]  ;;  %v1572_v54 = vld [vmem:[#allocation8 + $0x60] sm:$0xf] }
 0x102   : > { %v1670_v59 = vld [vmem:[#allocation8 + $0x68] sm:$0xf]  ;;  %s3406_s21 = sld [smem:[#allocation21_spill]]  ;;  %s3407_s27 = sld [smem:[#allocation20_spill]] }
 0x103   : > { %s1921_s3 = sshll.u32 %s3076_s4, 2  ;;  %p3410_p11 = scmp.ne.s32.totalorder %s3383_s9, 0 }
 0x104   : > { %s378_s0 = scalar_lea.vmem [#allocation11], %s1921_s3 }
 0x105   : > { %734 = vrot.lane.b32.xlu0 %v2345_v1, %s2671_s13  ;;  %783 = vrot.lane.b32.xlu1 %v2345_v1, %s2672_s11  ;;  %s1744_s17 = sshll.u32 %s378_s0, 4  ;;  %s3242_s17 = int_to_ptr.vmem [resolvable:$true] %s1744_s17 }
 0x108   : > { %s1953_s12 = sshll.u32 %s3406_s21, 2 }
 0x109   : > { %884 = vrot.lane.b32.xlu0 %v2346_v3, %s2665_s30  ;;  %933 = vrot.lane.b32.xlu1 %v2346_v3, %s2667_s7  ;;  %s1740_s15 = sadd.s32 %s3407_s27, %s1953_s12 }
 0x10a   : > { %s1954_s8 = sshll.u32 %s1740_s15, 6 }
 0x10d   : > { %982 = vrot.lane.b32.xlu0 %v2346_v3, %s2666_s16  ;;  %1031 = vrot.lane.b32.xlu1 %v2346_v3, %s2668_s19 }
 0x111   : > { %1080 = vrot.lane.b32.xlu0 %v2346_v3, %s2669_s29  ;;  %1129 = vrot.lane.b32.xlu1 %v2346_v3, %s2670_s2 }
 0x115   : > { %1178 = vrot.lane.b32.xlu0 %v2346_v3, %s2671_s13  ;;  %1227 = vrot.lane.b32.xlu1 %v2346_v3, %s2672_s11 }
 0x119   : > { %1328 = vrot.lane.b32.xlu0 %v3123_v4, %s2665_s30  ;;  %1377 = vrot.lane.b32.xlu1 %v3123_v4, %s2667_s7  ;;  %s3408_s30 = sld [smem:[#allocation33_spill]] }
 0x11d   : > { %1426 = vrot.lane.b32.xlu0 %v3123_v4, %s2666_s16  ;;  %1475 = vrot.lane.b32.xlu1 %v3123_v4, %s2668_s19  ;;  %s1729_s19 = scalar_lea.sflag [#allocation4], %s3076_s4 }
 0x11f   : > { %s3409_s16 = smov %s3408_s30  ;;  %s3240_s7 = scalar_lea.hbm %s3408_s30, %s1954_s8 }
 0x121   : > { %1524 = vrot.lane.b32.xlu0 %v3123_v4, %s2669_s29  ;;  %1573 = vrot.lane.b32.xlu1 %v3123_v4, %s2670_s2  ;;  %s2496_s29 = scalar_lea.vmem %s3242_s17, 64  ;;  %s2674_s2 = smov [#allocation11]  }
 0x122   : > { %p2497_p3 = scmp.ne.s32.totalorder %s3242_s17, %s2496_s29 }
 0x124   : > { %p2498_p10 = pnand %p2497_p3, %p3410_p11 }
 0x125   : > { %1622 = vrot.lane.b32.xlu0 %v3123_v4, %s2671_s13  ;;  %1671 = vrot.lane.b32.xlu1 %v3123_v4, %s2672_s11  ;;  %s2500_s13 = sshll.u32 %s2674_s2, 4  ;;  %s2501_s13 = int_to_ptr.vmem [resolvable:$false] %s2500_s13 }
 0x126   : > { %p2499_p2 = pneg %p2498_p10  ;;  %s2502_s11 = scalar_lea.vmem %s2501_s13, 128 }
 0x127   : > { %p2503_p13 = scmp.lt.s32.totalorder %s3242_s17, %s2501_s13  ;;  %p2504_p7 = scmp.lt.s32.totalorder %s2502_s11, %s2496_s29 }
 0x129   : > { %1721 = vperm.xlu0 %2344, %v1718_v5   ;;  %p2505_p9 = por %p2504_p7, %p2503_p13 }
 0x12b   : > { %p2506_p6 = pnand %p2505_p9, %p2499_p2 }
 0x16b   : > { %v397_v7 = vpop.permute.xlu0 %396  ;;  %v539_v8 = vpop.permute.xlu1 %538 }
 0x16c   : > { %2012 = vmatpush3.bf16.msra.mxu0 %v397_v7  ;;  %2030 = vmatpush3.bf16.msra.mxu1 %v539_v8 }
 0x16d   : > { %2023 = vmatprep.subr.bf16.mxu0 %v2663_v0  ;;  %2041 = vmatprep.subr.bf16.mxu1 %v2663_v0 }
 0x16f   : > { %2014 = vmatmul.mubr.msk.bf16.vlgmr.msra.gmra.mrb[0].mxu0 %vm399_vm1, %v390_v9  ;;  %v490_v11 = vpop.permute.xlu0 %489  ;;  %2032 = vmatmul.mubr.msk.bf16.vlgmr.msra.gmra.mrb[4].mxu1 %vm399_vm1, %v537_v10  ;;  %v588_v15 = vpop.permute.xlu1 %587 }
 0x170   : > { %2024 = vmatpush3.bf16.msra.mxu0 %v490_v11  ;;  %2025 = vmatprep.mubr.msk.bf16.mxu0 %vm2664_vm0, %v2663_v0 }
 0x171   : > { %2035 = vmatprep.subr.bf16.mxu0 %v2663_v0  ;;  %2043 = vmatprep.mubr.msk.bf16.mxu1 %vm2664_vm0, %v2663_v0 }
 0x173   : > { %v637_v12 = vpop.permute.xlu0 %636  ;;  %v686_v19 = vpop.permute.xlu1 %685 }
 0x174   : > { %2042 = vmatpush3.bf16.msra.mxu1 %v637_v12 }
 0x175   : > { %2053 = vmatprep.subr.bf16.mxu1 %v2663_v0 }
 0x177   : > { %2026 = vmatmul.mubr.msk.bf16.vlgmr.msra.gmra.mrb[4].mxu0 %vm399_vm1, %v488_v13  ;;  %2044 = vmatmul.mubr.msk.bf16.vlgmr.msra.gmra.mrb[8].mxu1 %vm399_vm1, %v635_v14  ;;  %v735_v16 = vpop.permute.xlu0 %734  ;;  %v784_v20 = vpop.permute.xlu1 %783 }
 0x178   : > { %2036 = vmatpush3.bf16.msra.mxu0 %v588_v15  ;;  %2037 = vmatprep.mubr.msk.bf16.mxu0 %vm2664_vm0, %v2663_v0 }
 0x179   : > { %2047 = vmatprep.subr.bf16.mxu0 %v2663_v0  ;;  %2054 = vmatpush3.bf16.msra.mxu1 %v735_v16 }
 0x17a   : > { %2055 = vmatprep.mubr.msk.bf16.mxu1 %vm2664_vm0, %v2663_v0  ;;  %2065 = vmatprep.subr.bf16.mxu1 %v2663_v0 }
 0x17b   : > { %v934_v23 = vpop.permute.xlu1 %933  ;;  %v885_v26 = vpop.permute.xlu0 %884 }
 0x17f   : > { %2038 = vmatmul.mubr.msk.bf16.vlgmr.msra.gmra.mrb[8].mxu0 %vm399_vm1, %v586_v17  ;;  %2056 = vmatmul.mubr.msk.bf16.vlgmr.msra.gmra.mrb[12].mxu1 %vm399_vm1, %v733_v18  ;;  %v1032_v27 = vpop.permute.xlu1 %1031  ;;  %v983_v30 = vpop.permute.xlu0 %982 }
 0x180   : > { %2048 = vmatpush3.bf16.msra.mxu0 %v686_v19  ;;  %2049 = vmatprep.mubr.msk.bf16.mxu0 %vm2664_vm0, %v2663_v0 }
 0x181   : > { %2059 = vmatprep.subr.bf16.mxu0 %v2663_v0  ;;  %2066 = vmatpush3.bf16.msra.mxu1 %v2346_v3 }
 0x182   : > { %2067 = vmatprep.mubr.msk.bf16.mxu1 %vm2664_vm0, %v2663_v0  ;;  %2077 = vmatprep.subr.bf16.mxu1 %v2663_v0 }
 0x183   : > { %v1130_v31 = vpop.permute.xlu1 %1129  ;;  %v1081_v34 = vpop.permute.xlu0 %1080 }
 0x187   : > { %2050 = vmatmul.mubr.msk.bf16.vlgmr.msra.gmra.mrb[12].mxu0 %vm399_vm1, %v684_v21  ;;  %2068 = vmatmul.mubr.msk.bf16.vlgmr.msra.gmra.mrb[16].mxu1 %vm399_vm1, %v831_v22  ;;  %v1228_v35 = vpop.permute.xlu1 %1227  ;;  %v1179_v36 = vpop.permute.xlu0 %1178 }
 0x188   : > { %2060 = vmatpush3.bf16.msra.mxu0 %v784_v20  ;;  %2061 = vmatprep.mubr.msk.bf16.mxu0 %vm2664_vm0, %v2663_v0 }
 0x189   : > { %2071 = vmatprep.subr.bf16.mxu0 %v2663_v0  ;;  %2078 = vmatpush3.bf16.msra.mxu1 %v934_v23 }
 0x18a   : > { %2079 = vmatprep.mubr.msk.bf16.mxu1 %vm2664_vm0, %v2663_v0  ;;  %2089 = vmatprep.subr.bf16.mxu1 %v2663_v0 }
 0x18b   : > { %v1329_v39 = vpop.permute.xlu0 %1328  ;;  %v1378_v45 = vpop.permute.xlu1 %1377 }
 0x18f   : > { %2062 = vmatmul.mubr.msk.bf16.vlgmr.msra.gmra.mrb[16].mxu0 %vm399_vm1, %v782_v24  ;;  %2080 = vmatmul.mubr.msk.bf16.vlgmr.msra.gmra.mrb[20].mxu1 %vm399_vm1, %v932_v25  ;;  %v1427_v42 = vpop.permute.xlu0 %1426  ;;  %v1476_v49 = vpop.permute.xlu1 %1475 }
 0x190   : > { %2072 = vmatpush3.bf16.msra.mxu0 %v885_v26  ;;  %2073 = vmatprep.mubr.msk.bf16.mxu0 %vm2664_vm0, %v2663_v0 }
 0x191   : > { %2083 = vmatprep.subr.bf16.mxu0 %v2663_v0  ;;  %2090 = vmatpush3.bf16.msra.mxu1 %v1032_v27 }
 0x192   : > { %2091 = vmatprep.mubr.msk.bf16.mxu1 %vm2664_vm0, %v2663_v0  ;;  %2101 = vmatprep.subr.bf16.mxu1 %v2663_v0 }
 0x193   : > { %v1525_v46 = vpop.permute.xlu0 %1524  ;;  %v1574_v53 = vpop.permute.xlu1 %1573 }
 0x197   : > { %2074 = vmatmul.mubr.msk.bf16.vlgmr.msra.gmra.mrb[20].mxu0 %vm399_vm1, %v883_v28  ;;  %2092 = vmatmul.mubr.msk.bf16.vlgmr.msra.gmra.mrb[24].mxu1 %vm399_vm1, %v1030_v29  ;;  %v1623_v50 = vpop.permute.xlu0 %1622  ;;  %v1672_v55 = vpop.permute.xlu1 %1671 }
 0x198   : > { %2084 = vmatpush3.bf16.msra.mxu0 %v983_v30  ;;  %2085 = vmatprep.mubr.msk.bf16.mxu0 %vm2664_vm0, %v2663_v0 }
 0x199   : > { %2095 = vmatprep.subr.bf16.mxu0 %v2663_v0  ;;  %2102 = vmatpush3.bf16.msra.mxu1 %v1130_v31 }
 0x19a   : > { %2103 = vmatprep.mubr.msk.bf16.mxu1 %vm2664_vm0, %v2663_v0  ;;  %2113 = vmatprep.subr.bf16.mxu1 %v2663_v0 }
 0x19f   : > { %2086 = vmatmul.mubr.msk.bf16.vlgmr.msra.gmra.mrb[24].mxu0 %vm399_vm1, %v981_v32  ;;  %2104 = vmatmul.mubr.msk.bf16.vlgmr.msra.gmra.mrb[28].mxu1 %vm399_vm1, %v1128_v33 }
 0x1a0   : > { %2096 = vmatpush3.bf16.msra.mxu0 %v1081_v34  ;;  %2097 = vmatprep.mubr.msk.bf16.mxu0 %vm2664_vm0, %v2663_v0 }
 0x1a1   : > { %2107 = vmatprep.subr.bf16.mxu0 %v2663_v0  ;;  %2114 = vmatpush3.bf16.msra.mxu1 %v1228_v35 }
 0x1a2   : > { %2115 = vmatprep.mubr.msk.bf16.mxu1 %vm2664_vm0, %v2663_v0  ;;  %2125 = vmatprep.subr.bf16.mxu1 %v2663_v0 }
 0x1a7   : > { %2098 = vmatmul.mubr.msk.bf16.vlgmr.msra.gmra.mrb[28].mxu0 %vm399_vm1, %v1079_v37  ;;  %2116 = vmatmul.mubr.msk.bf16.vlgmr.msra.gmra.mrb[32].mxu1 %vm399_vm1, %v1226_v38 }
 0x1a8   : > { %2108 = vmatpush3.bf16.msra.mxu0 %v1179_v36  ;;  %2109 = vmatprep.mubr.msk.bf16.mxu0 %vm2664_vm0, %v2663_v0 }
 0x1a9   : > { %2119 = vmatprep.subr.bf16.mxu0 %v2663_v0  ;;  %2126 = vmatpush3.bf16.msra.mxu1 %v1329_v39 }
 0x1aa   : > { %2127 = vmatprep.mubr.msk.bf16.mxu1 %vm2664_vm0, %v2663_v0  ;;  %2137 = vmatprep.subr.bf16.mxu1 %v2663_v0 }
 0x1af   : > { %2110 = vmatmul.mubr.msk.bf16.vlgmr.msra.gmra.mrb[32].mxu0 %vm399_vm1, %v1177_v40  ;;  %2128 = vmatmul.mubr.msk.bf16.vlgmr.msra.gmra.mrb[36].mxu1 %vm399_vm1, %v1327_v41 }
 0x1b0   : > { %2120 = vmatpush3.bf16.msra.mxu0 %v3123_v4  ;;  %2121 = vmatprep.mubr.msk.bf16.mxu0 %vm2664_vm0, %v2663_v0 }
 0x1b1   : > { %2131 = vmatprep.subr.bf16.mxu0 %v2663_v0  ;;  %2138 = vmatpush3.bf16.msra.mxu1 %v1427_v42 }
 0x1b2   : > { %2139 = vmatprep.mubr.msk.bf16.mxu1 %vm2664_vm0, %v2663_v0  ;;  %2149 = vmatprep.subr.bf16.mxu1 %v2663_v0 }
 0x1b7   : > { %2122 = vmatmul.mubr.msk.bf16.vlgmr.msra.gmra.mrb[36].mxu0 %vm399_vm1, %v1275_v43  ;;  %2140 = vmatmul.mubr.msk.bf16.vlgmr.msra.gmra.mrb[40].mxu1 %vm399_vm1, %v1425_v44 }
 0x1b8   : > { %2132 = vmatpush3.bf16.msra.mxu0 %v1378_v45  ;;  %2133 = vmatprep.mubr.msk.bf16.mxu0 %vm2664_vm0, %v2663_v0 }
 0x1b9   : > { %2143 = vmatprep.subr.bf16.mxu0 %v2663_v0  ;;  %2150 = vmatpush3.bf16.msra.mxu1 %v1525_v46 }
 0x1ba   : > { %2151 = vmatprep.mubr.msk.bf16.mxu1 %vm2664_vm0, %v2663_v0  ;;  %2161 = vmatprep.subr.bf16.mxu1 %v2663_v0 }
 0x1bf   : > { %2134 = vmatmul.mubr.msk.bf16.vlgmr.msra.gmra.mrb[40].mxu0 %vm399_vm1, %v1376_v47  ;;  %2152 = vmatmul.mubr.msk.bf16.vlgmr.msra.gmra.mrb[44].mxu1 %vm399_vm1, %v1523_v48 }
 0x1c0   : > { %2144 = vmatpush3.bf16.msra.mxu0 %v1476_v49  ;;  %2145 = vmatprep.mubr.msk.bf16.mxu0 %vm2664_vm0, %v2663_v0 }
 0x1c1   : > { %2155 = vmatprep.subr.bf16.mxu0 %v2663_v0  ;;  %2162 = vmatpush3.bf16.msra.mxu1 %v1623_v50 }
 0x1c2   : > { %2163 = vmatprep.mubr.msk.bf16.mxu1 %vm2664_vm0, %v2663_v0 }
 0x1c7   : > { %2146 = vmatmul.mubr.msk.bf16.vlgmr.msra.gmra.mrb[44].mxu0 %vm399_vm1, %v1474_v51  ;;  %2164 = vmatmul.mubr.msk.bf16.vlgmr.msra.gmra.mrb[48].mxu1 %vm399_vm1, %v1621_v52 }
 0x1c8   : > { %2156 = vmatpush3.bf16.msra.mxu0 %v1574_v53  ;;  %2157 = vmatprep.mubr.msk.bf16.mxu0 %vm2664_vm0, %v2663_v0 }
 0x1c9   : > { %2167 = vmatprep.subr.bf16.mxu0 %v2663_v0 }
 0x1cf   : > { %2158 = vmatmul.mubr.msk.bf16.vlgmr.msra.gmra.mrb[48].mxu0 %vm399_vm1, %v1572_v54 }
 0x1d0   : > { %2168 = vmatpush3.bf16.msra.mxu0 %v1672_v55  ;;  %2169 = vmatprep.mubr.msk.bf16.mxu0 %vm2664_vm0, %v2663_v0 }
 0x1d1   : > { %v481_v56 = vpop.f32.mrb[0].mxu1 }
 0x1d2   : > { %v2021_v57 = vpop.f32.mrb[1].mxu1 }
 0x1d3   : > { %v484_v58 = vpop.f32.mrb[2].mxu1 }
 0x1d4   : > { %v2022_v60 = vpop.f32.mrb[3].mxu1 }
 0x1d7   : > { %2170 = vmatmul.mubr.msk.bf16.vlgmr.msra.gmra.mrb[52].mxu0 %vm399_vm1, %v1670_v59 }
 0x242   : > { %v437_v61 = vpop.f32.mrb[0].mxu0  ;;  %v578_v62 = vpop.f32.mrb[4].mxu1 }
 0x243   : > { %v2015_v63 = vpop.f32.mrb[1].mxu0  ;;  %v482_v1 = vadd.f32 %v481_v56, %v437_v61  ;;  %v2033_v2 = vpop.f32.mrb[5].mxu1 }
 0x244   : > { %v440_v3 = vpop.f32.mrb[2].mxu0  ;;  %v581_v4 = vpop.f32.mrb[6].mxu1 }
 0x245   : > { %v2016_v5 = vpop.f32.mrb[3].mxu0  ;;  %v2034_v6 = vpop.f32.mrb[7].mxu1 }
 0x24a   : > { %v529_v7 = vpop.f32.mrb[4].mxu0  ;;  %v676_v8 = vpop.f32.mrb[8].mxu1 }
 0x24b   : > { %v535_v9 = vadd.f32 %v529_v7, %v482_v1  ;;  %v2027_v0 = vpop.f32.mrb[5].mxu0  ;;  %v2045_v10 = vpop.f32.mrb[9].mxu1 }
 0x24c   : > { %v532_v11 = vpop.f32.mrb[6].mxu0  ;;  %v679_v12 = vpop.f32.mrb[10].mxu1 }
 0x24d   : > { %v584_v13 = vadd.f32 %v578_v62, %v535_v9  ;;  %v2028_v14 = vpop.f32.mrb[7].mxu0  ;;  %v2046_v15 = vpop.f32.mrb[11].mxu1 }
 0x252   : > { %v627_v16 = vpop.f32.mrb[8].mxu0  ;;  %v774_v17 = vpop.f32.mrb[12].mxu1 }
 0x253   : > { %v633_v18 = vadd.f32 %v627_v16, %v584_v13  ;;  %v2039_v19 = vpop.f32.mrb[9].mxu0  ;;  %v2057_v20 = vpop.f32.mrb[13].mxu1 }
 0x254   : > { %v630_v21 = vpop.f32.mrb[10].mxu0  ;;  %v777_v22 = vpop.f32.mrb[14].mxu1 }
 0x255   : > { %v682_v23 = vadd.f32 %v676_v8, %v633_v18  ;;  %v2040_v24 = vpop.f32.mrb[11].mxu0  ;;  %v2058_v25 = vpop.f32.mrb[15].mxu1 }
 0x25a   : > { %v725_v26 = vpop.f32.mrb[12].mxu0  ;;  %v875_v27 = vpop.f32.mrb[16].mxu1 }
 0x25b   : > { %v731_v28 = vadd.f32 %v725_v26, %v682_v23  ;;  %v2051_v29 = vpop.f32.mrb[13].mxu0  ;;  %v2069_v30 = vpop.f32.mrb[17].mxu1 }
 0x25c   : > { %v728_v31 = vpop.f32.mrb[14].mxu0  ;;  %v878_v32 = vpop.f32.mrb[18].mxu1 }
 0x25d   : > { %v780_v33 = vadd.f32 %v774_v17, %v731_v28  ;;  %v2052_v34 = vpop.f32.mrb[15].mxu0  ;;  %v2070_v35 = vpop.f32.mrb[19].mxu1 }
 0x262   : > { %v823_v36 = vpop.f32.mrb[16].mxu0  ;;  %v973_v37 = vpop.f32.mrb[20].mxu1 }
 0x263   : > { %v829_v38 = vadd.f32 %v823_v36, %v780_v33  ;;  %v2063_v39 = vpop.f32.mrb[17].mxu0  ;;  %v2081_v40 = vpop.f32.mrb[21].mxu1 }
 0x264   : > { %v826_v41 = vpop.f32.mrb[18].mxu0  ;;  %v976_v42 = vpop.f32.mrb[22].mxu1 }
 0x265   : > { %v881_v43 = vadd.f32 %v875_v27, %v829_v38  ;;  %v2064_v44 = vpop.f32.mrb[19].mxu0  ;;  %v2082_v45 = vpop.f32.mrb[23].mxu1 }
 0x26a   : > { %v924_v46 = vpop.f32.mrb[20].mxu0  ;;  %v1071_v47 = vpop.f32.mrb[24].mxu1 }
 0x26b   : > { %v930_v48 = vadd.f32 %v924_v46, %v881_v43  ;;  %v2075_v49 = vpop.f32.mrb[21].mxu0  ;;  %v2093_v50 = vpop.f32.mrb[25].mxu1 }
 0x26c   : > { %v927_v51 = vpop.f32.mrb[22].mxu0  ;;  %v1074_v52 = vpop.f32.mrb[26].mxu1 }
 0x26d   : > { %v979_v53 = vadd.f32 %v973_v37, %v930_v48  ;;  %v2076_v54 = vpop.f32.mrb[23].mxu0  ;;  %v2094_v55 = vpop.f32.mrb[27].mxu1 }
 0x272   : > { %v1022_v56 = vpop.f32.mrb[24].mxu0  ;;  %v1169_v57 = vpop.f32.mrb[28].mxu1 }
 0x273   : > { %v1028_v58 = vadd.f32 %v1022_v56, %v979_v53  ;;  %v2087_v59 = vpop.f32.mrb[25].mxu0  ;;  %v2105_v60 = vpop.f32.mrb[29].mxu1 }
 0x274   : > { %v1025_v61 = vpop.f32.mrb[26].mxu0  ;;  %v1172_v62 = vpop.f32.mrb[30].mxu1 }
 0x275   : > { %v1077_v63 = vadd.f32 %v1071_v47, %v1028_v58  ;;  %v2088_v1 = vpop.f32.mrb[27].mxu0  ;;  %v2106_v2 = vpop.f32.mrb[31].mxu1 }
 0x276   : > { %v1722_v59 = vpop.permute.xlu0 %1721 }
 0x27a   : > { %v1120_v3 = vpop.f32.mrb[28].mxu0  ;;  %v1267_v4 = vpop.f32.mrb[32].mxu1 }
 0x27b   : > { %v1126_v5 = vadd.f32 %v1120_v3, %v1077_v63  ;;  %v2099_v6 = vpop.f32.mrb[29].mxu0  ;;  %v2117_v7 = vpop.f32.mrb[33].mxu1 }
 0x27c   : > { %v1123_v8 = vpop.f32.mrb[30].mxu0  ;;  %v1270_v9 = vpop.f32.mrb[34].mxu1 }
 0x27d   : > { %v1175_v0 = vadd.f32 %v1169_v57, %v1126_v5  ;;  %v2100_v10 = vpop.f32.mrb[31].mxu0  ;;  %v2118_v11 = vpop.f32.mrb[35].mxu1 }
 0x282   : > { %v1218_v12 = vpop.f32.mrb[32].mxu0  ;;  %v1368_v13 = vpop.f32.mrb[36].mxu1 }
 0x283   : > { %v1224_v14 = vadd.f32 %v1218_v12, %v1175_v0  ;;  %v2111_v15 = vpop.f32.mrb[33].mxu0  ;;  %v2129_v16 = vpop.f32.mrb[37].mxu1 }
 0x284   : > { %v1221_v17 = vpop.f32.mrb[34].mxu0  ;;  %v1371_v18 = vpop.f32.mrb[38].mxu1 }
 0x285   : > { %v1273_v19 = vadd.f32 %v1267_v4, %v1224_v14  ;;  %v2112_v20 = vpop.f32.mrb[35].mxu0  ;;  %v2130_v21 = vpop.f32.mrb[39].mxu1 }
 0x28a   : > { %v1319_v22 = vpop.f32.mrb[36].mxu0  ;;  %v1466_v23 = vpop.f32.mrb[40].mxu1 }
 0x28b   : > { %v1325_v24 = vadd.f32 %v1319_v22, %v1273_v19  ;;  %v2123_v25 = vpop.f32.mrb[37].mxu0  ;;  %v2141_v26 = vpop.f32.mrb[41].mxu1 }
 0x28c   : > { %v1322_v27 = vpop.f32.mrb[38].mxu0  ;;  %v1469_v28 = vpop.f32.mrb[42].mxu1 }
 0x28d   : > { %v1374_v29 = vadd.f32 %v1368_v13, %v1325_v24  ;;  %v2124_v30 = vpop.f32.mrb[39].mxu0  ;;  %v2142_v31 = vpop.f32.mrb[43].mxu1 }
 0x292   : > { %v1417_v32 = vpop.f32.mrb[40].mxu0  ;;  %v1564_v33 = vpop.f32.mrb[44].mxu1 }
 0x293   : > { %v1423_v34 = vadd.f32 %v1417_v32, %v1374_v29  ;;  %v2135_v35 = vpop.f32.mrb[41].mxu0  ;;  %v2153_v36 = vpop.f32.mrb[45].mxu1 }
 0x294   : > { %v1420_v37 = vpop.f32.mrb[42].mxu0  ;;  %v1567_v38 = vpop.f32.mrb[46].mxu1 }
 0x295   : > { %v1472_v39 = vadd.f32 %v1466_v23, %v1423_v34  ;;  %v2136_v40 = vpop.f32.mrb[43].mxu0  ;;  %v2154_v41 = vpop.f32.mrb[47].mxu1 }
 0x29a   : > { %v1515_v42 = vpop.f32.mrb[44].mxu0  ;;  %v1662_v43 = vpop.f32.mrb[48].mxu1 }
 0x29b   : > { %v1521_v44 = vadd.f32 %v1515_v42, %v1472_v39  ;;  %v2147_v45 = vpop.f32.mrb[45].mxu0  ;;  %v2165_v46 = vpop.f32.mrb[49].mxu1 }
 0x29c   : > { %v1518_v47 = vpop.f32.mrb[46].mxu0  ;;  %v1665_v48 = vpop.f32.mrb[50].mxu1 }
 0x29d   : > { %v1570_v49 = vadd.f32 %v1564_v33, %v1521_v44  ;;  %v2148_v50 = vpop.f32.mrb[47].mxu0  ;;  %v2166_v51 = vpop.f32.mrb[51].mxu1 }
 0x2a2   : > { %v1613_v52 = vpop.f32.mrb[48].mxu0 }
 0x2a3   : > { %v1619_v53 = vadd.f32 %v1613_v52, %v1570_v49  ;;  %v2159_v54 = vpop.f32.mrb[49].mxu0 }
 0x2a4   : > { %v1616_v55 = vpop.f32.mrb[50].mxu0 }
 0x2a5   : > { %v1668_v56 = vadd.f32 %v1662_v43, %v1619_v53  ;;  %v2160_v57 = vpop.f32.mrb[51].mxu0 }
 0x2aa   : > { %v1711_v58 = vpop.f32.mrb[52].mxu0 }
 0x2ab   : > { %v1717_v60 = vadd.f32 %v1711_v58, %v1668_v56  ;;  %v2171_v61 = vpop.f32.mrb[53].mxu0 }
 0x2ac   : > { %v1714_v62 = vpop.f32.mrb[54].mxu0 }
 0x2ad   : > { %v1724_v63 = vadd.f32 %v1722_v59, %v1717_v60  ;;  %v2172_v1 = vpop.f32.mrb[55].mxu0 }
 0x2af   : > { %v1725_v2 = vpack.c.bf16 %v1724_v63, %v1724_v63 }
 0x2b1   : > { %1727 = vst.msk [vmem:[%s378_s0] sm:$0xf] %vm1726_vm2, %v1725_v2 }
 0x2b2   : > { %2509 = shalt.err (!%p2506_p6)
}
 0x2b3   : > { %s2510_s4 = scalar_lea.hbm %s3240_s7, 64  ;;  %s2514_s3 = scalar_lea.hbm %s3409_s16, 512 }
 0x2b4   : > { %p2511_p12 = scmp.ne.s32.totalorder %s3240_s7, %s2510_s4  ;;  %p2515_p4 = scmp.lt.u32.totalorder %s3240_s7, %s3409_s16 }
 0x2b5   : > { %p2516_p8 = scmp.lt.u32.totalorder %s2514_s3, %s2510_s4  ;;  %p2518_p3 = scmp.lt.u32.totalorder %s2510_s4, %s3240_s7 }
 0x2b6   : > { %p2512_p5 = pnand %p2511_p12, %p3410_p11 }
 0x2b7   : > { %p2517_p1 = por %p2516_p8, %p2515_p4 }
 0x2b8   : > { %p2513_p0 = pneg %p2512_p5 }
 0x2b9   : > { %p2519_p10 = por %p2518_p3, %p2517_p1 }
 0x2bb   : > { %p2520_p2 = pnand %p2519_p10, %p2513_p0 }
 0x2bd   : > { %2523 = shalt.err (!%p2520_p2)
}
 0x2be   : > { %2188 = dma.vmem_to_hbm [thread:$0]  (%p3410_p11), %s3242_s17, 64, %s3240_s7, %s1729_s19  }
 0x2bf PF: > { %p2216_p13 = scmp.ge.s32.totalorder %s2654_s6, 2  ;;  %s1756_s8 = sand.u32 1, %s2626_s24  }
 0x2c0   : > { %p3411_p7 = scmp.ne.s32.totalorder %s3384_s14, 0  ;;  %s1757_s0 = scalar_lea.sflag [#allocation4], %s1756_s8 }
 0x2c2   : > { %p2208_p9 = pnand %p2216_p13, %p3411_p7 }
 0x2c4   : > { %2597 = dma.done.wait (!%p2208_p9), %s1757_s0, 64  }
 0x2c5   : > { %2599 = vsyncadd (!%p2208_p9), %s1757_s0, 4294967232  ;;  %s25_s6 = sadd.s32 1, %s2654_s6   ;;  %s3413_s18 = sld [smem:[#allocation18_spill]] }
 0x2c6   : > { %p3271_p6 = scmp.ge.s32.totalorder %s25_s6, 10   ;;  %s3414_s21 = sld [smem:[#allocation19_spill]] }
 0x2c7   : > { %s3415_s9 = smov %s2856_s22  ;;  %s3416_s27 = sld [smem:[#allocation22_spill]] }
 0x2c8   : > { %s3417_s14 = sld [smem:[#allocation23_spill]]  ;;  %s3418_s29 = sld [smem:[#allocation25_spill]] }
 0x2c9   : > { %s3419_s30 = sld [smem:[#allocation26_spill]]  ;;  %s3420_s19 = smov %s2610_s20 }
 0x2ca   : > { %s3421_s20 = smov %s3018_s28  ;;  %s3422_s22 = smov %s2622_s23 }
 0x2cb   : > { %s3423_s23 = smov %s3415_s9  ;;  %s3424_s24 = smov %s2630_s25 }
 0x2cc   : > { %s3425_s25 = smov %s2634_s26  ;;  %s3426_s26 = smov %s2942_s10 }
 0x2cd   :  { %24 = sbr.rel (!%p3271_p6) target bundleno = 20 (0x14), region = 143 }
 0x2ce   : > { %s3427_s28 = smov %s3417_s14 }
 0x2d4   :  { %1762 = vsyncpa [#allocation3], 1 }
 0x2d5   :  { %1764 = vsyncpa [#allocation3 + $0x1], 1 }
 0x2d6   :  { %1765 = vsyncpa [#allocation6], 1 }
 0x2d7   :  { %1767 = vsyncpa [#allocation6 + $0x1], 1 }
 0x2d8   :  { %1768 = vsyncpa [#allocation9], 1 }
 0x2d9   :  { %1769 = vsyncpa [#allocation4], 1 }
 0x2da   :  { %1771 = vsyncpa [#allocation4 + $0x1], 1 }

// kernel: _lambda_.9
= control target key start
LH: loop header
LB: loop body
LE: loop exit
PB: predicated region body
PF: predicated region fallthrough
CT: control target
= control target key end

     0   :  { %s3320_s0 = inlined_call_operand.hbm [shape: bf16[2,6,16,49], index: 0, kind: input, shape index: {}, may-alias: {0,1,2}]   ;;  %s3321_s1 = inlined_call_operand.hbm [shape: bf16[2,6,16,49], index: 1, kind: input, shape index: {}, may-alias: {0,1,2}]   ;;  %s3322_s2 = inlined_call_operand.hbm [shape: bf16[2,6,16,49], index: 2, kind: input, shape index: {}, may-alias: {0,1,2}]   ;;  %s3323_s3 = inlined_call_operand.hbm [shape: bf16[27,8,16], index: 3, kind: input, shape index: {}]   ;;  %s3324_s4 = inlined_call_operand.hbm [shape: f32[8,1], index: 4, kind: input, shape index: {}]   ;;  %s3325_s5 = inlined_call_operand.hbm [shape: f32[2,4,8,28], index: 5, kind: output, shape index: {}]  }
   0x1   :  { %3349 = sst [smem:[#allocation28_spill]] %s3320_s0 }
   0x2   :  { %3350 = sst [smem:[#allocation29_spill]] %s3321_s1 }
   0x3   :  { %3351 = sst [smem:[#allocation30_spill]] %s3322_s2 }
   0x4   :  { %3352 = sst [smem:[#allocation31_spill]] %s3323_s3 }
   0x5   :  { %3353 = sst [smem:[#allocation32_spill]] %s3324_s4 }
   0x6   :  { %3354 = sst [smem:[#allocation33_spill]] %s3325_s5 }
   0x7   :  { %10 = vsyncpa [#allocation3], 0 }
   0x8   :  { %12 = vsyncpa [#allocation3 + $0x1], 0 }
   0x9   :  { %13 = vsyncpa [#allocation6], 0 }
   0xa   :  { %15 = vsyncpa [#allocation6 + $0x1], 0 }
   0xb   :  { %16 = vsyncpa [#allocation9], 0 }
   0xc   :  { %17 = vsyncpa [#allocation4], 0 }
   0xd   :  { %19 = vsyncpa [#allocation4 + $0x1], 0  ;;  %s2704_s18 = smov 0   ;;  %s2706_s19 = smov 0  }
   0xe   :  { %s2708_s20 = smov 0   ;;  %s2710_s21 = smov 0  }
   0xf   :  { %s2712_s22 = smov 0   ;;  %s2714_s23 = smov 0  }
  0x10   :  { %s2716_s24 = smov 0   ;;  %s2718_s25 = smov 0  }
  0x11   :  { %s2720_s26 = smov 0   ;;  %s2722_s27 = smov 0  }
  0x12   :  { %s2724_s28 = smov 0   ;;  %s2726_s29 = smov 0  }
  0x13   :  { %s2728_s30 = smov 0   ;;  %s2730_s6 = smov 0  }
  0x14 LB: > { %3355 = sst [smem:[#allocation17_spill]] %s2601_s18  ;;  %s2775_s7 = sadd.s32 4294967295, %s2653_s6   ;;  %s2653_s6 = sphi %s2730_s6, %s25_s6   ;;  %s2649_s30 = sphi %s2728_s30, %s3421_s30   ;;  %s2645_s29 = sphi %s2726_s29, %s3420_s29   ;;  %s2641_s28 = sphi %s2724_s28, %s3429_s28   ;;  %s2637_s27 = sphi %s2722_s27, %s3418_s27   ;;  %s2633_s26 = sphi %s2720_s26, %s3428_s26   ;;  %s2629_s25 = sphi %s2718_s25, %s3427_s25   ;;  %s2625_s24 = sphi %s2716_s24, %s3426_s24   ;;  %s2621_s23 = sphi %s2714_s23, %s3425_s23   ;;  %s2617_s22 = sphi %s2712_s22, %s3424_s22   ;;  %s2613_s21 = sphi %s2710_s21, %s3416_s21   ;;  %s2609_s20 = sphi %s2708_s20, %s3423_s20   ;;  %s2605_s19 = sphi %s2706_s19, %s3422_s19   ;;  %s2601_s18 = sphi %s2704_s18, %s3415_s18  }
  0x15   : > { %3356 = sst [smem:[#allocation18_spill]] %s2605_s19  ;;  %p1901_p0 = scmp.ge.s32.totalorder %s2653_s6, 1 }
  0x16   : > { %3357 = sst [smem:[#allocation19_spill]] %s2617_s22  ;;  %p3326_p1 = scmp.eq.s32.totalorder %s2775_s7, 0 }
  0x17   : > { %3358 = sst [smem:[#allocation20_spill]] %s2637_s27  ;;  %p200_p3 = scmp.lt.s32.totalorder %s2653_s6, 9 }
  0x18   : > { %3359 = sst [smem:[#allocation21_spill]] %s2641_s28  ;;  %s2655_s9 = smov [#allocation8]  }
  0x19   : > { %3360 = sst [smem:[#allocation22_spill]] %s2645_s29  ;;  %p2781_p4 = pnand %p1901_p0, %p200_p3 }
  0x1a   : > { %3361 = sst [smem:[#allocation23_spill]] %s2649_s30  ;;  %s212_s10 = sshll.u32 %s2655_s9, 4  ;;  %s213_s10 = int_to_ptr.vmem [resolvable:$true] %s212_s10 }
  0x1b   : > { %s3362_s8 = scalar_select %p2781_p4, 1, 0 }
  0x1c   : > { %p2189_p5 = pneg %p2781_p4  ;;  %s3365_s3 = sld [smem:[#allocation31_spill]] }
  0x1d   : > { %3363 = sst [smem:[#allocation24_spill]] %s3362_s8 }
  0x1e   : > { %p2789_p6 = pnand %p2189_p5, %p3326_p1 }
  0x20   : > { %p3343_p8 = pneg %p2789_p6 }
  0x22   : > { %s2347_s14 = scalar_lea.hbm %s3365_s3, 1728 }
  0x23   : > { %p2348_p7 = scmp.ne.s32.totalorder %s3365_s3, %s2347_s14  ;;  %p2354_p11 = scmp.lt.u32.totalorder %s2347_s14, %s3365_s3 }
  0x25   : > { %p2350_p9 = pnand %p3343_p8, %p2348_p7 }
  0x27   : > { %p2351_p10 = pneg %p2350_p9 }
  0x29   : > { %p2356_p12 = pnand %p2354_p11, %p2351_p10 }
  0x2b   : > { %2359 = shalt.err (!%p2356_p12)
}
  0x2c   : > { %s2360_s12 = scalar_lea.vmem %s213_s10, 1728  ;;  %p2368_p5 = scmp.lt.s32.totalorder %s213_s10, %s213_s10 }
  0x2d   : > { %p2361_p13 = scmp.ne.s32.totalorder %s213_s10, %s2360_s12  ;;  %p2369_p2 = scmp.lt.s32.totalorder %s2360_s12, %s2360_s12 }
  0x2f   : > { %p2363_p0 = pnand %p2361_p13, %p3343_p8  ;;  %p2370_p1 = por %p2369_p2, %p2368_p5 }
  0x31   : > { %p2364_p3 = pneg %p2363_p0 }
  0x33   : > { %p2371_p4 = pnand %p2370_p1, %p2364_p3 }
  0x35   : > { %2374 = shalt.err (!%p2371_p4)
}
  0x36   : > { %s3329_s13 = smov 64   ;;  %s3331_s14 = smov 4  }
  0x37   : > { %2192 = dma.hbm_to_vmem [thread:$0]  (!%p2789_p6), %s3365_s3, 1728, %s213_s10, [#allocation9], %s3329_s13, %s3329_s13, %s3331_s14  }
  0x38   : > { %s34_s17 = sadd.s32 1, %s2645_s29  ;;  %s37_s9 = sadd.s32 1, %s2649_s30 }
  0x39   : > { %p35_p1 = scmp.ge.s32.totalorder %s34_s17, 4  ;;  %p3342_p2 = scmp.eq.s32.totalorder %s2653_s6, 0 }
  0x3a   : > { %s76_s12 = sadd.s32 1, %s2621_s23  ;;  %p83_p4 = scmp.ne.s32.totalorder %s2621_s23, %s2617_s22 }
  0x3b   : > { %s2824_s5 = scalar_select %p35_p1, 0, %s34_s17  }
  0x3c   : > { %s3431_s9 = smov (!%p35_p1, %s37_s9), %s2649_s30  ;;  %p2832_p9 = por %p83_p4, %p3342_p2 }
  0x3d   : > { %3366 = sst [smem:[#allocation25_spill]] %s2824_s5  ;;  %s42_s27 = ssub.s32 %s2645_s29, %s2824_s5 }
  0x3e   : > { %s70_s28 = sadd.s32 1, %s2824_s5  ;;  %p39_p7 = scmp.ge.s32.totalorder %s3431_s9, 2 }
  0x3f   : > { %s72_s10 = ssub.s32 %s34_s17, %s70_s28  ;;  %p89_p10 = scmp.ne.s32.totalorder %s2617_s22, %s2613_s21 }
  0x40   : > { %s3433_s9 = smov (%p39_p7, %s3431_s9), 0  ;;  %p3369_p11 = scmp.eq.s32.totalorder %s2775_s7, 0 }
  0x41   : > { %3368 = sst [smem:[#allocation26_spill]] %s3433_s9  ;;  %s99_s13 = sadd.s32 2, %s2645_s29 }
  0x42   : > { %p2842_p12 = por %p89_p10, %p3369_p11  ;;  %s41_s28 = ssub.s32 %s2649_s30, %s3433_s9 }
  0x43   : > { %s100_s17 = sadd.s32 2, %s2824_s5  ;;  %s2850_s14 = sor.u32 %s42_s27, %s41_s28 }
  0x44   : > { %s3370_s16 = scalar_select %p2842_p12, 1, 0 }
  0x45   : > { %s73_s3 = sor.u32 %s72_s10, %s41_s28  ;;  %s102_s21 = ssub.s32 %s99_s13, %s100_s17 }
  0x46   : > { %3371 = sst [smem:[#allocation27_spill]] %s3370_s16  ;;  %p74_p0 = scmp.eq.s32.totalorder %s73_s3, 0 }
  0x47   : > { %p3341_p3 = scmp.lt.s32.totalorder %s2653_s6, 8  ;;  %s103_s8 = sor.u32 %s102_s21, %s41_s28 }
  0x48   : > { %s2855_s22 = scalar_select %p74_p0, %s2621_s23, %s76_s12  }
  0x49   : > { %s1906_s2 = sshll.u32 %s2645_s29, 1  ;;  %p2858_p5 = scmp.eq.s32.totalorder %s103_s8, 0 }
  0x4a   : > { %s2172_s9 = smul.u32 12, %s2649_s30  ;;  %s260_s5 = sand.u32 1, %s2653_s6  }
  0x4b   : > { %s3372_s16 = scalar_select %p2858_p5, 1, 0 }
  0x4c   : > { %s262_s27 = sand.u32 1, %s2621_s23   ;;  %s247_s18 = sadd.s32 %s2172_s9, %s1906_s2 }
  0x4d   : > { %s2865_s19 = sshll.u32 %s247_s18, 6  ;;  %s1908_s3 = sshll.u32 %s262_s27, 3 }
  0x4e   : > { %s3373_s1 = sld [smem:[#allocation29_spill]]  ;;  %s264_s8 = scalar_lea.vmem [#allocation5], %s1908_s3 }
  0x4f   : > { %s274_s28 = sshll.u32 %s264_s8, 4  ;;  %p2879_p1 = pnand %p3341_p3, %p2832_p9  ;;  %s2873_s28 = int_to_ptr.vmem [resolvable:$true] %s274_s28 }
  0x50   : > { %s2658_s18 = smov [#allocation10]   ;;  %s2885_s21 = scalar_lea.sflag [#allocation6], %s260_s5 }
  0x51   : > { %s2883_s9 = sshll.u32 %s2658_s18, 4  ;;  %p2377_p7 = pneg %p2879_p1  ;;  %s227_s9 = int_to_ptr.vmem [resolvable:$true] %s2883_s9 }
  0x54   : > { %s1786_s17 = scalar_lea.hbm %s3373_s1, %s2865_s19  ;;  %s2380_s13 = scalar_lea.hbm %s3373_s1, 1536 }
  0x55   : > { %s2871_s12 = scalar_lea.hbm %s1786_s17, 128  ;;  %s2405_s27 = scalar_lea.hbm %s1786_s17, 256 }
  0x56   : > { %p2376_p4 = scmp.ne.s32.totalorder %s2871_s12, %s2405_s27  ;;  %p2381_p9 = scmp.lt.u32.totalorder %s2871_s12, %s3373_s1 }
  0x57   : > { %p2382_p0 = scmp.lt.u32.totalorder %s2380_s13, %s2405_s27  ;;  %p2384_p2 = scmp.lt.u32.totalorder %s2405_s27, %s2871_s12 }
  0x58   : > { %p2378_p10 = pnand %p2377_p7, %p2376_p4 }
  0x59   : > { %p2383_p3 = por %p2382_p0, %p2381_p9 }
  0x5a   : > { %p2379_p11 = pneg %p2378_p10 }
  0x5b   : > { %p2385_p13 = por %p2384_p2, %p2383_p3 }
  0x5d   : > { %p2386_p8 = pnand %p2385_p13, %p2379_p11 }
  0x5f   : > { %2389 = shalt.err (!%p2386_p8)
}
  0x60   : > { %s2390_s5 = scalar_lea.vmem %s2873_s28, 128  ;;  %s2659_s17 = smov [#allocation5]  }
  0x61   : > { %p2391_p4 = scmp.ne.s32.totalorder %s2873_s28, %s2390_s5  ;;  %s2395_s18 = sshll.u32 %s2659_s17, 4  ;;  %s2396_s18 = int_to_ptr.vmem [resolvable:$false] %s2395_s18 }
  0x62   : > { %s2397_s15 = scalar_lea.vmem %s2396_s18, 256  ;;  %p2398_p5 = scmp.lt.s32.totalorder %s2873_s28, %s2396_s18 }
  0x63   : > { %p2393_p10 = pnand %p2391_p4, %p2377_p7  ;;  %p2399_p9 = scmp.lt.s32.totalorder %s2397_s15, %s2390_s5 }
  0x65   : > { %p2394_p12 = pneg %p2393_p10  ;;  %p2400_p0 = por %p2399_p9, %p2398_p5 }
  0x67   : > { %p2401_p2 = pnand %p2400_p0, %p2394_p12 }
  0x69   : > { %2404 = shalt.err (!%p2401_p2)
}
  0x6a   : > { %s3375_s27 = smov 4   ;;  %s3376_s3 = smov 64  }
  0x6b   : > { %2202 = dma.hbm_to_vmem [thread:$0]  (!%p2879_p1), %s2871_s12, 128, %s2873_s28, %s2885_s21, %s3376_s3, %s3376_s3, %s3375_s27  }
  0x6c   : > { %s3377_s4 = sld [smem:[#allocation32_spill]]  ;;  %p3378_p12 = pneg %p2789_p6 }
  0x72   : > { %s2406_s8 = scalar_lea.hbm %s3377_s4, 128 }
  0x73   : > { %p2407_p8 = scmp.ne.s32.totalorder %s3377_s4, %s2406_s8  ;;  %p2413_p5 = scmp.lt.u32.totalorder %s2406_s8, %s3377_s4 }
  0x75   : > { %p2409_p13 = pnand %p2407_p8, %p3378_p12 }
  0x77   : > { %p2410_p3 = pneg %p2409_p13 }
  0x79   : > { %p2415_p7 = pnand %p2413_p5, %p2410_p3 }
  0x7b   : > { %2418 = shalt.err (!%p2415_p7)
}
  0x7c   : > { %s2419_s12 = scalar_lea.vmem %s227_s9, 128  ;;  %p3379_p11 = pmov %p3378_p12 }
  0x7d   : > { %p2420_p1 = scmp.ne.s32.totalorder %s227_s9, %s2419_s12  ;;  %p2427_p9 = scmp.lt.s32.totalorder %s227_s9, %s227_s9 }
  0x7e   : > { %p2428_p0 = scmp.lt.s32.totalorder %s2419_s12, %s2419_s12 }
  0x7f   : > { %p2422_p4 = pnand %p2420_p1, %p3379_p11 }
  0x80   : > { %p2429_p2 = por %p2428_p0, %p2427_p9 }
  0x81   : > { %p2423_p10 = pneg %p2422_p4 }
  0x83   : > { %p2430_p8 = pnand %p2429_p2, %p2423_p10 }
  0x85   : > { %2433 = shalt.err (!%p2430_p8)
}
  0x86   : > { %2195 = dma.hbm_to_vmem [thread:$0]  (!%p2789_p6), %s3377_s4, 128, %s227_s9, [#allocation9]  }
  0x87   : > { %s1900_s13 = sadd.s32 4294967294, %s2653_s6   ;;  %s46_s11 = sadd.s32 1, %s2633_s26 }
  0x88   : > { %p3380_p12 = scmp.eq.s32.totalorder %s2850_s14, 0  ;;  %p53_p13 = scmp.ne.s32.totalorder %s2633_s26, %s2629_s25 }
  0x89   : > { %p59_p3 = scmp.ne.s32.totalorder %s2629_s25, %s2625_s24  ;;  %p193_p5 = scmp.eq.s32.totalorder %s1900_s13, 7 }
  0x8a   : > { %s2941_s10 = scalar_select %p3380_p12, %s2633_s26, %s46_s11  }
  0x8b   : > { %s237_s8 = sand.u32 1, %s2633_s26   ;;  %p3381_p7 = scmp.eq.s32.totalorder %s2653_s6, 0 }
  0x8c   : > { %p3382_p11 = scmp.eq.s32.totalorder %s2775_s7, 0  ;;  %p3384_p10 = scmp.eq.s32.totalorder %s2775_s7, 7 }
  0x8d   : > { %p55_p1 = por %p3381_p7, %p53_p13  ;;  %p2962_p6 = por %p193_p5, %p59_p3 }
  0x8e   : > { %p2952_p4 = por %p3382_p11, %p59_p3  ;;  %p2958_p9 = por %p3384_p10, %p53_p13 }
  0x8f   : > { %s3386_s14 = scalar_select %p2962_p6, 1, 0 }
  0x90   : > { %s3385_s9 = scalar_select %p2958_p9, 1, 0 }
  0x91   : > { %s1905_s17 = sshll.u32 %s237_s8, 3  ;;  %s3387_s0 = sld [smem:[#allocation28_spill]] }
  0x92   : > { %s241_s28 = scalar_lea.vmem [#allocation2], %s1905_s17  ;;  %p3388_p0 = scmp.lt.s32.totalorder %s2653_s6, 8 }
  0x93   : > { %s250_s15 = sshll.u32 %s241_s28, 4  ;;  %s2980_s11 = scalar_lea.sflag [#allocation3], %s237_s8  ;;  %s2978_s15 = int_to_ptr.vmem [resolvable:$true] %s250_s15 }
  0x94   : > { %p2974_p2 = pnand %p3388_p0, %p55_p1 }
  0x96   : > { %p2436_p12 = pneg %p2974_p2 }
  0x97   : > { %s2970_s12 = scalar_lea.hbm %s3387_s0, %s2865_s19  ;;  %s2439_s28 = scalar_lea.hbm %s3387_s0, 1536 }
  0x98   : > { %s2434_s2 = scalar_lea.hbm %s2970_s12, 128  ;;  %p2440_p5 = scmp.lt.u32.totalorder %s2970_s12, %s3387_s0 }
  0x99   : > { %p2435_p8 = scmp.ne.s32.totalorder %s2970_s12, %s2434_s2  ;;  %p2441_p7 = scmp.lt.u32.totalorder %s2439_s28, %s2434_s2 }
  0x9a   : > { %p2443_p11 = scmp.lt.u32.totalorder %s2434_s2, %s2970_s12 }
  0x9b   : > { %p2437_p13 = pnand %p2436_p12, %p2435_p8  ;;  %p2442_p1 = por %p2441_p7, %p2440_p5 }
  0x9d   : > { %p2438_p3 = pneg %p2437_p13  ;;  %p2444_p10 = por %p2443_p11, %p2442_p1 }
  0x9f   : > { %p2445_p0 = pnand %p2444_p10, %p2438_p3 }
  0xa1   : > { %2448 = shalt.err (!%p2445_p0)
}
  0xa2   : > { %s2449_s8 = scalar_lea.vmem %s2978_s15, 128  ;;  %s2660_s17 = smov [#allocation2]  }
  0xa3   : > { %p2450_p8 = scmp.ne.s32.totalorder %s2978_s15, %s2449_s8  ;;  %s2454_s18 = sshll.u32 %s2660_s17, 4  ;;  %s2455_s18 = int_to_ptr.vmem [resolvable:$false] %s2454_s18 }
  0xa4   : > { %s2456_s1 = scalar_lea.vmem %s2455_s18, 256  ;;  %p2457_p9 = scmp.lt.s32.totalorder %s2978_s15, %s2455_s18 }
  0xa5   : > { %p2452_p13 = pnand %p2450_p8, %p2436_p12  ;;  %p2458_p5 = scmp.lt.s32.totalorder %s2456_s1, %s2449_s8 }
  0xa7   : > { %p2453_p6 = pneg %p2452_p13  ;;  %p2459_p7 = por %p2458_p5, %p2457_p9 }
  0xa9   : > { %p2460_p1 = pnand %p2459_p7, %p2453_p6 }
  0xab   : > { %2463 = shalt.err (!%p2460_p1)
}
  0xac   : > { %s3390_s4 = sld [smem:[#allocation18_spill]]  ;;  %s3391_s2 = sld [smem:[#allocation17_spill]] }
  0xad   : > { %2199 = dma.hbm_to_vmem [thread:$0]  (!%p2974_p2), %s2970_s12, 128, %s2978_s15, %s2980_s11, %s3376_s3, %s3376_s3, %s3375_s27  }
  0xae   : > { %s106_s13 = sadd.s32 1, %s2609_s20  ;;  %p3392_p6 = scmp.ne.s32.totalorder %s3372_s16, 0 }
  0xaf   : > { %p3393_p12 = scmp.eq.s32.totalorder %s2653_s6, 0  ;;  %s286_s8 = sand.u32 1, %s2609_s20  }
  0xb0   : > { %s3017_s28 = scalar_select %p3392_p6, %s2609_s20, %s106_s13  }
  0xb1   : > { %s3394_s1 = sld [smem:[#allocation30_spill]]  ;;  %p3395_p10 = scmp.eq.s32.totalorder %s2775_s7, 0 }
  0xb2   : > { %p113_p9 = scmp.ne.s32.totalorder %s2609_s20, %s3390_s4  ;;  %p119_p11 = scmp.ne.s32.totalorder %s3390_s4, %s3391_s2 }
  0xb3   : > { %s1911_s29 = sshll.u32 %s286_s8, 3  ;;  %p3397_p2 = scmp.lt.s32.totalorder %s2653_s6, 8 }
  0xb4   : > { %p115_p3 = por %p113_p9, %p3393_p12  ;;  %p3030_p0 = por %p119_p11, %p3395_p10 }
  0xb5   : > { %s288_s16 = scalar_lea.vmem [#allocation7], %s1911_s29 }
  0xb6   : > { %s3396_s30 = scalar_select %p3030_p0, 1, 0 }
  0xb7   : > { %s1795_s0 = scalar_lea.hbm %s3394_s1, %s2865_s19  ;;  %s298_s15 = sshll.u32 %s288_s16, 4  ;;  %s3042_s15 = int_to_ptr.vmem [resolvable:$true] %s298_s15 }
  0xb8   : > { %s3034_s12 = scalar_lea.hbm %s1795_s0, 256  ;;  %p3038_p8 = pnand %p3397_p2, %p115_p3 }
  0xb9   : > { %s2494_s19 = scalar_lea.hbm %s1795_s0, 384  ;;  %s2469_s2 = scalar_lea.hbm %s3394_s1, 1536 }
  0xba   : > { %p2465_p13 = scmp.ne.s32.totalorder %s3034_s12, %s2494_s19  ;;  %p2466_p5 = pneg %p3038_p8 }
  0xbb   : > { %p2470_p9 = scmp.lt.u32.totalorder %s3034_s12, %s3394_s1  ;;  %p2471_p6 = scmp.lt.u32.totalorder %s2469_s2, %s2494_s19 }
  0xbc   : > { %p2467_p7 = pnand %p2466_p5, %p2465_p13  ;;  %p2473_p3 = scmp.lt.u32.totalorder %s2494_s19, %s3034_s12 }
  0xbd   : > { %p2472_p12 = por %p2471_p6, %p2470_p9 }
  0xbe   : > { %p2468_p1 = pneg %p2467_p7 }
  0xbf   : > { %p2474_p11 = por %p2473_p3, %p2472_p12 }
  0xc1   : > { %p2475_p10 = pnand %p2474_p11, %p2468_p1 }
  0xc3   : > { %2478 = shalt.err (!%p2475_p10)
}
  0xc4   : > { %s2479_s0 = scalar_lea.vmem %s3042_s15, 128  ;;  %s2661_s17 = smov [#allocation7]  }
  0xc5   : > { %p2480_p2 = scmp.ne.s32.totalorder %s3042_s15, %s2479_s0  ;;  %s2484_s18 = sshll.u32 %s2661_s17, 4  ;;  %s2485_s18 = int_to_ptr.vmem [resolvable:$false] %s2484_s18 }
  0xc6   : > { %s2486_s16 = scalar_lea.vmem %s2485_s18, 256  ;;  %p2487_p0 = scmp.lt.s32.totalorder %s3042_s15, %s2485_s18 }
  0xc7   : > { %p2482_p13 = pnand %p2480_p2, %p2466_p5  ;;  %p2488_p9 = scmp.lt.s32.totalorder %s2486_s16, %s2479_s0 }
  0xc9   : > { %p2483_p7 = pneg %p2482_p13  ;;  %p2489_p6 = por %p2488_p9, %p2487_p0 }
  0xcb   : > { %p2490_p12 = pnand %p2489_p6, %p2483_p7 }
  0xcd   : > { %2493 = shalt.err (!%p2490_p12)
}
  0xce   : > { %2205 = dma.hbm_to_vmem [thread:$0]  (!%p3038_p8), %s3034_s12, 128, %s3042_s15, %s2885_s21, %s3376_s3, %s3376_s3, %s3375_s27  }
  0xcf   : > { %s3399_s19 = sld [smem:[#allocation24_spill]] }
  0xd5   : > { %p3400_p5 = scmp.ne.s32.totalorder %s3399_s19, 0 }
  0xd6   : > { %s3075_s4 = sand.u32 (!%p3400_p5), 1, %s2629_s25  }
  0xd7   : > { %310 = sbr.rel (%p3400_p5) target bundleno = 701 (0x2bd), region = 40  ;;  %s1915_s29 = sshll.u32 (!%p3400_p5), %s3075_s4, 3 }
  0xd8   : > { %s313_s2 = scalar_lea.sflag (!%p3400_p5), [#allocation3], %s3075_s4  ;;  %s316_s11 = scalar_lea.vmem (!%p3400_p5), [#allocation2], %s1915_s29 }
  0xde   : > { %2580 = dma.done.wait (%p2952_p4), %s313_s2, 128  }
  0xdf   : > { %2582 = vsyncadd (%p2952_p4), %s313_s2, 4294967168  ;;  %s3401_s21 = sld [smem:[#allocation19_spill]]  ;;  %s3402_s27 = sld [smem:[#allocation27_spill]] }
  0xe0   : > { %s321_s3 = sand.u32 1, %s2775_s7  }
  0xe1   : > { %s322_s13 = scalar_lea.sflag [#allocation6], %s321_s3 }
  0xe5   : > { %s323_s12 = sand.u32 1, %s3401_s21   ;;  %p3403_p0 = scmp.ne.s32.totalorder %s3402_s27, 0 }
  0xe6   : > { %s3087_s15 = sshll.u32 %s323_s12, 3 }
  0xe7   : > { %s325_s8 = scalar_lea.vmem [#allocation5], %s3087_s15 }
  0xe8   : > { %2584 = dma.done.wait (%p3403_p0), %s322_s13, 128  }
  0xe9   : > { %2586 = vsyncadd (%p3403_p0), %s322_s13, 4294967168  ;;  %s3404_s0 = sld [smem:[#allocation18_spill]]  ;;  %p3405_p4 = scmp.ne.s32.totalorder %s3396_s30, 0 }
  0xef   : > { %s332_s17 = sand.u32 1, %s3404_s0  }
  0xf0   : > { %s3095_s5 = sshll.u32 %s332_s17, 3 }
  0xf1   : > { %s334_s18 = scalar_lea.vmem [#allocation7], %s3095_s5 }
  0xf2   : > { %2588 = dma.done.wait (%p3405_p4), %s322_s13, 128  }
  0xf3   : > { %2590 = vsyncadd (%p3405_p4), %s322_s13, 4294967168  ;;  %p3406_p8 = scmp.eq.s32.totalorder %s2775_s7, 0 }
  0xf5   : > { %2592 = dma.done.wait (%p3406_p8), [#allocation9], 1856   ;;  %p3407_p1 = pmov %p3406_p8 }
  0xf6   : > { %v2662_v0 = vmov 0.0   ;;  %vm2663_vm0 = vmmov 0   ;;  %v2344_v1 = vld [vmem:[%s316_s11] sm:$0xff]   ;;  %s2664_s30 = smov 127   ;;  %s2665_s16 = smov 121   ;;  %vm399_vm1 = vcmask 130048  }
  0xf7   : > { %2594 = vsyncadd (%p3407_p1), [#allocation9], 4294965440  ;;  %2010 = vmatprep.subr.bf16.mxu0 %v2662_v0  ;;  %2016 = vmatprep.subr.bf16.mxu1 %v2662_v0  ;;  %v388_v2 = vld [vmem:[#allocation8] sm:$0xf]  ;;  %s2666_s7 = smov 126   ;;  %s2667_s19 = smov 120  }
  0xf8   : > { %2012 = vmatprep.mubr.msk.bf16.mxu0 %vm2663_vm0, %v2662_v0  ;;  %2018 = vmatprep.mubr.msk.bf16.mxu1 %vm2663_vm0, %v2662_v0  ;;  %s2668_s2 = smov 119   ;;  %s2669_s11 = smov 114   ;;  %v2345_v3 = vld [vmem:[%s325_s8] sm:$0xff]   ;;  %v3124_v4 = vld [vmem:[%s334_s18] sm:$0xff]   ;;  %v2672_v6 = vmov 0   ;;  %vm1725_vm2 = vcmask 228352  }
  0xf9   : > { %396 = vrot.lane.b32.xlu0 %v2344_v1, %s2664_s30  ;;  %538 = vrot.lane.b32.xlu1 %v2344_v1, %s2665_s16  ;;  %s2670_s21 = smov 113   ;;  %s2671_s27 = smov 112   ;;  %v1718_v5 = vld [vmem:[#allocation10] sm:$0xff]  ;;  %v390_v9 = vld [vmem:[#allocation8 + $0x4] sm:$0xf] }
  0xfa   : > { %2017 = vmatpush3.bf16.msra.mxu1 %v2344_v1  ;;  %2343 = vset.pattern.permute.xlu0 %v2672_v6  ;;  %v537_v10 = vld [vmem:[#allocation8 + $0xc] sm:$0xf]  ;;  %v488_v13 = vld [vmem:[#allocation8 + $0x8] sm:$0xf]  ;;  %v635_v14 = vld [vmem:[#allocation8 + $0x14] sm:$0xf] }
  0xfb   : > { %2028 = vmatprep.subr.bf16.mxu1 %v2662_v0  ;;  %v586_v17 = vld [vmem:[#allocation8 + $0x10] sm:$0xf]  ;;  %v733_v18 = vld [vmem:[#allocation8 + $0x1c] sm:$0xf]  ;;  %v684_v21 = vld [vmem:[#allocation8 + $0x18] sm:$0xf] }
  0xfc   : > { %v831_v22 = vld [vmem:[#allocation8 + $0x24] sm:$0xf]  ;;  %v782_v24 = vld [vmem:[#allocation8 + $0x20] sm:$0xf]  ;;  %v932_v25 = vld [vmem:[#allocation8 + $0x2c] sm:$0xf] }
  0xfd   : > { %489 = vrot.lane.b32.xlu0 %v2344_v1, %s2666_s7  ;;  %587 = vrot.lane.b32.xlu1 %v2344_v1, %s2667_s19  ;;  %v883_v28 = vld [vmem:[#allocation8 + $0x28] sm:$0xf]  ;;  %v1030_v29 = vld [vmem:[#allocation8 + $0x34] sm:$0xf]  ;;  %v981_v32 = vld [vmem:[#allocation8 + $0x30] sm:$0xf] }
  0xfe   : > { %2019 = vmatmul.mubr.msk.bf16.vlgmr.msra.gmra.mrb[0].mxu1 %vm399_vm1, %v388_v2  ;;  %v1128_v33 = vld [vmem:[#allocation8 + $0x3c] sm:$0xf]  ;;  %v1079_v37 = vld [vmem:[#allocation8 + $0x38] sm:$0xf]  ;;  %v1226_v38 = vld [vmem:[#allocation8 + $0x44] sm:$0xf] }
  0xff   : > { %2030 = vmatprep.mubr.msk.bf16.mxu1 %vm2663_vm0, %v2662_v0  ;;  %v1177_v40 = vld [vmem:[#allocation8 + $0x40] sm:$0xf]  ;;  %v1327_v41 = vld [vmem:[#allocation8 + $0x4c] sm:$0xf]  ;;  %v1275_v43 = vld [vmem:[#allocation8 + $0x48] sm:$0xf] }
 0x100   : > { %v1425_v44 = vld [vmem:[#allocation8 + $0x54] sm:$0xf]  ;;  %v1376_v47 = vld [vmem:[#allocation8 + $0x50] sm:$0xf]  ;;  %v1523_v48 = vld [vmem:[#allocation8 + $0x5c] sm:$0xf] }
 0x101   : > { %636 = vrot.lane.b32.xlu0 %v2344_v1, %s2668_s2  ;;  %685 = vrot.lane.b32.xlu1 %v2344_v1, %s2669_s11  ;;  %v1474_v51 = vld [vmem:[#allocation8 + $0x58] sm:$0xf]  ;;  %v1621_v52 = vld [vmem:[#allocation8 + $0x64] sm:$0xf]  ;;  %v1572_v54 = vld [vmem:[#allocation8 + $0x60] sm:$0xf] }
 0x102   : > { %v1670_v59 = vld [vmem:[#allocation8 + $0x68] sm:$0xf]  ;;  %s3408_s3 = sld [smem:[#allocation21_spill]]  ;;  %s3409_s12 = sld [smem:[#allocation20_spill]] }
 0x103   : > { %s378_s0 = scalar_lea.vmem [#allocation11], %s1915_s29  ;;  %p3412_p11 = scmp.ne.s32.totalorder %s3385_s9, 0 }
 0x104   : > { %s1743_s17 = sshll.u32 %s378_s0, 4  ;;  %s3244_s17 = int_to_ptr.vmem [resolvable:$true] %s1743_s17 }
 0x105   : > { %734 = vrot.lane.b32.xlu0 %v2344_v1, %s2670_s21  ;;  %783 = vrot.lane.b32.xlu1 %v2344_v1, %s2671_s27  ;;  %s2495_s29 = scalar_lea.vmem %s3244_s17, 128 }
 0x106   : > { %p2496_p3 = scmp.ne.s32.totalorder %s3244_s17, %s2495_s29 }
 0x108   : > { %s1952_s15 = sshll.u32 %s3408_s3, 2  ;;  %p2497_p10 = pnand %p2496_p3, %p3412_p11 }
 0x109   : > { %884 = vrot.lane.b32.xlu0 %v2345_v3, %s2664_s30  ;;  %933 = vrot.lane.b32.xlu1 %v2345_v3, %s2666_s7  ;;  %s1739_s13 = sadd.s32 %s3409_s12, %s1952_s15 }
 0x10a   : > { %s1953_s8 = sshll.u32 %s1739_s13, 7  ;;  %p2498_p2 = pneg %p2497_p10 }
 0x10d   : > { %982 = vrot.lane.b32.xlu0 %v2345_v3, %s2665_s16  ;;  %1031 = vrot.lane.b32.xlu1 %v2345_v3, %s2667_s19 }
 0x111   : > { %1080 = vrot.lane.b32.xlu0 %v2345_v3, %s2668_s2  ;;  %1129 = vrot.lane.b32.xlu1 %v2345_v3, %s2669_s11 }
 0x115   : > { %1178 = vrot.lane.b32.xlu0 %v2345_v3, %s2670_s21  ;;  %1227 = vrot.lane.b32.xlu1 %v2345_v3, %s2671_s27 }
 0x119   : > { %1328 = vrot.lane.b32.xlu0 %v3124_v4, %s2664_s30  ;;  %1377 = vrot.lane.b32.xlu1 %v3124_v4, %s2666_s7  ;;  %s3410_s30 = sld [smem:[#allocation33_spill]] }
 0x11d   : > { %1426 = vrot.lane.b32.xlu0 %v3124_v4, %s2665_s16  ;;  %1475 = vrot.lane.b32.xlu1 %v3124_v4, %s2667_s19  ;;  %s1728_s19 = scalar_lea.sflag [#allocation4], %s3075_s4 }
 0x11f   : > { %s3411_s16 = smov %s3410_s30  ;;  %s3242_s7 = scalar_lea.hbm %s3410_s30, %s1953_s8 }
 0x121   : > { %1524 = vrot.lane.b32.xlu0 %v3124_v4, %s2668_s2  ;;  %1573 = vrot.lane.b32.xlu1 %v3124_v4, %s2669_s11  ;;  %s2673_s2 = smov [#allocation11]  }
 0x122   : > { %s2499_s11 = sshll.u32 %s2673_s2, 4  ;;  %s2500_s11 = int_to_ptr.vmem [resolvable:$false] %s2499_s11 }
 0x123   : > { %p2502_p13 = scmp.lt.s32.totalorder %s3244_s17, %s2500_s11 }
 0x125   : > { %1622 = vrot.lane.b32.xlu0 %v3124_v4, %s2670_s21  ;;  %1671 = vrot.lane.b32.xlu1 %v3124_v4, %s2671_s27  ;;  %s2501_s21 = scalar_lea.vmem %s2500_s11, 256 }
 0x126   : > { %p2503_p7 = scmp.lt.s32.totalorder %s2501_s21, %s2495_s29 }
 0x128   : > { %p2504_p9 = por %p2503_p7, %p2502_p13 }
 0x129   : > { %1721 = vperm.xlu0 %2343, %v1718_v5  }
 0x12a   : > { %p2505_p6 = pnand %p2504_p9, %p2498_p2 }
 0x16b   : > { %v397_v7 = vpop.permute.xlu0 %396  ;;  %v539_v8 = vpop.permute.xlu1 %538 }
 0x16c   : > { %2011 = vmatpush3.bf16.msra.mxu0 %v397_v7  ;;  %2029 = vmatpush3.bf16.msra.mxu1 %v539_v8 }
 0x16d   : > { %2022 = vmatprep.subr.bf16.mxu0 %v2662_v0  ;;  %2040 = vmatprep.subr.bf16.mxu1 %v2662_v0 }
 0x16f   : > { %2013 = vmatmul.mubr.msk.bf16.vlgmr.msra.gmra.mrb[0].mxu0 %vm399_vm1, %v390_v9  ;;  %v490_v11 = vpop.permute.xlu0 %489  ;;  %2031 = vmatmul.mubr.msk.bf16.vlgmr.msra.gmra.mrb[4].mxu1 %vm399_vm1, %v537_v10  ;;  %v588_v15 = vpop.permute.xlu1 %587 }
 0x170   : > { %2023 = vmatpush3.bf16.msra.mxu0 %v490_v11  ;;  %2024 = vmatprep.mubr.msk.bf16.mxu0 %vm2663_vm0, %v2662_v0 }
 0x171   : > { %2034 = vmatprep.subr.bf16.mxu0 %v2662_v0  ;;  %2042 = vmatprep.mubr.msk.bf16.mxu1 %vm2663_vm0, %v2662_v0 }
 0x173   : > { %v637_v12 = vpop.permute.xlu0 %636  ;;  %v686_v19 = vpop.permute.xlu1 %685 }
 0x174   : > { %2041 = vmatpush3.bf16.msra.mxu1 %v637_v12 }
 0x175   : > { %2052 = vmatprep.subr.bf16.mxu1 %v2662_v0 }
 0x177   : > { %2025 = vmatmul.mubr.msk.bf16.vlgmr.msra.gmra.mrb[4].mxu0 %vm399_vm1, %v488_v13  ;;  %2043 = vmatmul.mubr.msk.bf16.vlgmr.msra.gmra.mrb[8].mxu1 %vm399_vm1, %v635_v14  ;;  %v735_v16 = vpop.permute.xlu0 %734  ;;  %v784_v20 = vpop.permute.xlu1 %783 }
 0x178   : > { %2035 = vmatpush3.bf16.msra.mxu0 %v588_v15  ;;  %2036 = vmatprep.mubr.msk.bf16.mxu0 %vm2663_vm0, %v2662_v0 }
 0x179   : > { %2046 = vmatprep.subr.bf16.mxu0 %v2662_v0  ;;  %2053 = vmatpush3.bf16.msra.mxu1 %v735_v16 }
 0x17a   : > { %2054 = vmatprep.mubr.msk.bf16.mxu1 %vm2663_vm0, %v2662_v0  ;;  %2064 = vmatprep.subr.bf16.mxu1 %v2662_v0 }
 0x17b   : > { %v934_v23 = vpop.permute.xlu1 %933  ;;  %v885_v26 = vpop.permute.xlu0 %884 }
 0x17f   : > { %2037 = vmatmul.mubr.msk.bf16.vlgmr.msra.gmra.mrb[8].mxu0 %vm399_vm1, %v586_v17  ;;  %2055 = vmatmul.mubr.msk.bf16.vlgmr.msra.gmra.mrb[12].mxu1 %vm399_vm1, %v733_v18  ;;  %v1032_v27 = vpop.permute.xlu1 %1031  ;;  %v983_v30 = vpop.permute.xlu0 %982 }
 0x180   : > { %2047 = vmatpush3.bf16.msra.mxu0 %v686_v19  ;;  %2048 = vmatprep.mubr.msk.bf16.mxu0 %vm2663_vm0, %v2662_v0 }
 0x181   : > { %2058 = vmatprep.subr.bf16.mxu0 %v2662_v0  ;;  %2065 = vmatpush3.bf16.msra.mxu1 %v2345_v3 }
 0x182   : > { %2066 = vmatprep.mubr.msk.bf16.mxu1 %vm2663_vm0, %v2662_v0  ;;  %2076 = vmatprep.subr.bf16.mxu1 %v2662_v0 }
 0x183   : > { %v1130_v31 = vpop.permute.xlu1 %1129  ;;  %v1081_v34 = vpop.permute.xlu0 %1080 }
 0x187   : > { %2049 = vmatmul.mubr.msk.bf16.vlgmr.msra.gmra.mrb[12].mxu0 %vm399_vm1, %v684_v21  ;;  %2067 = vmatmul.mubr.msk.bf16.vlgmr.msra.gmra.mrb[16].mxu1 %vm399_vm1, %v831_v22  ;;  %v1228_v35 = vpop.permute.xlu1 %1227  ;;  %v1179_v36 = vpop.permute.xlu0 %1178 }
 0x188   : > { %2059 = vmatpush3.bf16.msra.mxu0 %v784_v20  ;;  %2060 = vmatprep.mubr.msk.bf16.mxu0 %vm2663_vm0, %v2662_v0 }
 0x189   : > { %2070 = vmatprep.subr.bf16.mxu0 %v2662_v0  ;;  %2077 = vmatpush3.bf16.msra.mxu1 %v934_v23 }
 0x18a   : > { %2078 = vmatprep.mubr.msk.bf16.mxu1 %vm2663_vm0, %v2662_v0  ;;  %2088 = vmatprep.subr.bf16.mxu1 %v2662_v0 }
 0x18b   : > { %v1329_v39 = vpop.permute.xlu0 %1328  ;;  %v1378_v45 = vpop.permute.xlu1 %1377 }
 0x18f   : > { %2061 = vmatmul.mubr.msk.bf16.vlgmr.msra.gmra.mrb[16].mxu0 %vm399_vm1, %v782_v24  ;;  %2079 = vmatmul.mubr.msk.bf16.vlgmr.msra.gmra.mrb[20].mxu1 %vm399_vm1, %v932_v25  ;;  %v1427_v42 = vpop.permute.xlu0 %1426  ;;  %v1476_v49 = vpop.permute.xlu1 %1475 }
 0x190   : > { %2071 = vmatpush3.bf16.msra.mxu0 %v885_v26  ;;  %2072 = vmatprep.mubr.msk.bf16.mxu0 %vm2663_vm0, %v2662_v0 }
 0x191   : > { %2082 = vmatprep.subr.bf16.mxu0 %v2662_v0  ;;  %2089 = vmatpush3.bf16.msra.mxu1 %v1032_v27 }
 0x192   : > { %2090 = vmatprep.mubr.msk.bf16.mxu1 %vm2663_vm0, %v2662_v0  ;;  %2100 = vmatprep.subr.bf16.mxu1 %v2662_v0 }
 0x193   : > { %v1525_v46 = vpop.permute.xlu0 %1524  ;;  %v1574_v53 = vpop.permute.xlu1 %1573 }
 0x197   : > { %2073 = vmatmul.mubr.msk.bf16.vlgmr.msra.gmra.mrb[20].mxu0 %vm399_vm1, %v883_v28  ;;  %2091 = vmatmul.mubr.msk.bf16.vlgmr.msra.gmra.mrb[24].mxu1 %vm399_vm1, %v1030_v29  ;;  %v1623_v50 = vpop.permute.xlu0 %1622  ;;  %v1672_v55 = vpop.permute.xlu1 %1671 }
 0x198   : > { %2083 = vmatpush3.bf16.msra.mxu0 %v983_v30  ;;  %2084 = vmatprep.mubr.msk.bf16.mxu0 %vm2663_vm0, %v2662_v0 }
 0x199   : > { %2094 = vmatprep.subr.bf16.mxu0 %v2662_v0  ;;  %2101 = vmatpush3.bf16.msra.mxu1 %v1130_v31 }
 0x19a   : > { %2102 = vmatprep.mubr.msk.bf16.mxu1 %vm2663_vm0, %v2662_v0  ;;  %2112 = vmatprep.subr.bf16.mxu1 %v2662_v0 }
 0x19f   : > { %2085 = vmatmul.mubr.msk.bf16.vlgmr.msra.gmra.mrb[24].mxu0 %vm399_vm1, %v981_v32  ;;  %2103 = vmatmul.mubr.msk.bf16.vlgmr.msra.gmra.mrb[28].mxu1 %vm399_vm1, %v1128_v33 }
 0x1a0   : > { %2095 = vmatpush3.bf16.msra.mxu0 %v1081_v34  ;;  %2096 = vmatprep.mubr.msk.bf16.mxu0 %vm2663_vm0, %v2662_v0 }
 0x1a1   : > { %2106 = vmatprep.subr.bf16.mxu0 %v2662_v0  ;;  %2113 = vmatpush3.bf16.msra.mxu1 %v1228_v35 }
 0x1a2   : > { %2114 = vmatprep.mubr.msk.bf16.mxu1 %vm2663_vm0, %v2662_v0  ;;  %2124 = vmatprep.subr.bf16.mxu1 %v2662_v0 }
 0x1a7   : > { %2097 = vmatmul.mubr.msk.bf16.vlgmr.msra.gmra.mrb[28].mxu0 %vm399_vm1, %v1079_v37  ;;  %2115 = vmatmul.mubr.msk.bf16.vlgmr.msra.gmra.mrb[32].mxu1 %vm399_vm1, %v1226_v38 }
 0x1a8   : > { %2107 = vmatpush3.bf16.msra.mxu0 %v1179_v36  ;;  %2108 = vmatprep.mubr.msk.bf16.mxu0 %vm2663_vm0, %v2662_v0 }
 0x1a9   : > { %2118 = vmatprep.subr.bf16.mxu0 %v2662_v0  ;;  %2125 = vmatpush3.bf16.msra.mxu1 %v1329_v39 }
 0x1aa   : > { %2126 = vmatprep.mubr.msk.bf16.mxu1 %vm2663_vm0, %v2662_v0  ;;  %2136 = vmatprep.subr.bf16.mxu1 %v2662_v0 }
 0x1af   : > { %2109 = vmatmul.mubr.msk.bf16.vlgmr.msra.gmra.mrb[32].mxu0 %vm399_vm1, %v1177_v40  ;;  %2127 = vmatmul.mubr.msk.bf16.vlgmr.msra.gmra.mrb[36].mxu1 %vm399_vm1, %v1327_v41 }
 0x1b0   : > { %2119 = vmatpush3.bf16.msra.mxu0 %v3124_v4  ;;  %2120 = vmatprep.mubr.msk.bf16.mxu0 %vm2663_vm0, %v2662_v0 }
 0x1b1   : > { %2130 = vmatprep.subr.bf16.mxu0 %v2662_v0  ;;  %2137 = vmatpush3.bf16.msra.mxu1 %v1427_v42 }
 0x1b2   : > { %2138 = vmatprep.mubr.msk.bf16.mxu1 %vm2663_vm0, %v2662_v0  ;;  %2148 = vmatprep.subr.bf16.mxu1 %v2662_v0 }
 0x1b7   : > { %2121 = vmatmul.mubr.msk.bf16.vlgmr.msra.gmra.mrb[36].mxu0 %vm399_vm1, %v1275_v43  ;;  %2139 = vmatmul.mubr.msk.bf16.vlgmr.msra.gmra.mrb[40].mxu1 %vm399_vm1, %v1425_v44 }
 0x1b8   : > { %2131 = vmatpush3.bf16.msra.mxu0 %v1378_v45  ;;  %2132 = vmatprep.mubr.msk.bf16.mxu0 %vm2663_vm0, %v2662_v0 }
 0x1b9   : > { %2142 = vmatprep.subr.bf16.mxu0 %v2662_v0  ;;  %2149 = vmatpush3.bf16.msra.mxu1 %v1525_v46 }
 0x1ba   : > { %2150 = vmatprep.mubr.msk.bf16.mxu1 %vm2663_vm0, %v2662_v0  ;;  %2160 = vmatprep.subr.bf16.mxu1 %v2662_v0 }
 0x1bf   : > { %2133 = vmatmul.mubr.msk.bf16.vlgmr.msra.gmra.mrb[40].mxu0 %vm399_vm1, %v1376_v47  ;;  %2151 = vmatmul.mubr.msk.bf16.vlgmr.msra.gmra.mrb[44].mxu1 %vm399_vm1, %v1523_v48 }
 0x1c0   : > { %2143 = vmatpush3.bf16.msra.mxu0 %v1476_v49  ;;  %2144 = vmatprep.mubr.msk.bf16.mxu0 %vm2663_vm0, %v2662_v0 }
 0x1c1   : > { %2154 = vmatprep.subr.bf16.mxu0 %v2662_v0  ;;  %2161 = vmatpush3.bf16.msra.mxu1 %v1623_v50 }
 0x1c2   : > { %2162 = vmatprep.mubr.msk.bf16.mxu1 %vm2663_vm0, %v2662_v0 }
 0x1c7   : > { %2145 = vmatmul.mubr.msk.bf16.vlgmr.msra.gmra.mrb[44].mxu0 %vm399_vm1, %v1474_v51  ;;  %2163 = vmatmul.mubr.msk.bf16.vlgmr.msra.gmra.mrb[48].mxu1 %vm399_vm1, %v1621_v52 }
 0x1c8   : > { %2155 = vmatpush3.bf16.msra.mxu0 %v1574_v53  ;;  %2156 = vmatprep.mubr.msk.bf16.mxu0 %vm2663_vm0, %v2662_v0 }
 0x1c9   : > { %2166 = vmatprep.subr.bf16.mxu0 %v2662_v0 }
 0x1cf   : > { %2157 = vmatmul.mubr.msk.bf16.vlgmr.msra.gmra.mrb[48].mxu0 %vm399_vm1, %v1572_v54 }
 0x1d0   : > { %2167 = vmatpush3.bf16.msra.mxu0 %v1672_v55  ;;  %2168 = vmatprep.mubr.msk.bf16.mxu0 %vm2663_vm0, %v2662_v0 }
 0x1d1   : > { %v481_v56 = vpop.f32.mrb[0].mxu1 }
 0x1d2   : > { %v2020_v57 = vpop.f32.mrb[1].mxu1 }
 0x1d3   : > { %v484_v58 = vpop.f32.mrb[2].mxu1 }
 0x1d4   : > { %v2021_v60 = vpop.f32.mrb[3].mxu1 }
 0x1d7   : > { %2169 = vmatmul.mubr.msk.bf16.vlgmr.msra.gmra.mrb[52].mxu0 %vm399_vm1, %v1670_v59 }
 0x242   : > { %v437_v61 = vpop.f32.mrb[0].mxu0  ;;  %v578_v62 = vpop.f32.mrb[4].mxu1 }
 0x243   : > { %v2014_v63 = vpop.f32.mrb[1].mxu0  ;;  %v482_v1 = vadd.f32 %v481_v56, %v437_v61  ;;  %v2032_v2 = vpop.f32.mrb[5].mxu1 }
 0x244   : > { %v440_v3 = vpop.f32.mrb[2].mxu0  ;;  %v581_v4 = vpop.f32.mrb[6].mxu1 }
 0x245   : > { %v2015_v5 = vpop.f32.mrb[3].mxu0  ;;  %v2033_v6 = vpop.f32.mrb[7].mxu1 }
 0x24a   : > { %v529_v7 = vpop.f32.mrb[4].mxu0  ;;  %v676_v8 = vpop.f32.mrb[8].mxu1 }
 0x24b   : > { %v535_v9 = vadd.f32 %v529_v7, %v482_v1  ;;  %v2026_v0 = vpop.f32.mrb[5].mxu0  ;;  %v2044_v10 = vpop.f32.mrb[9].mxu1 }
 0x24c   : > { %v532_v11 = vpop.f32.mrb[6].mxu0  ;;  %v679_v12 = vpop.f32.mrb[10].mxu1 }
 0x24d   : > { %v584_v13 = vadd.f32 %v578_v62, %v535_v9  ;;  %v2027_v14 = vpop.f32.mrb[7].mxu0  ;;  %v2045_v15 = vpop.f32.mrb[11].mxu1 }
 0x252   : > { %v627_v16 = vpop.f32.mrb[8].mxu0  ;;  %v774_v17 = vpop.f32.mrb[12].mxu1 }
 0x253   : > { %v633_v18 = vadd.f32 %v627_v16, %v584_v13  ;;  %v2038_v19 = vpop.f32.mrb[9].mxu0  ;;  %v2056_v20 = vpop.f32.mrb[13].mxu1 }
 0x254   : > { %v630_v21 = vpop.f32.mrb[10].mxu0  ;;  %v777_v22 = vpop.f32.mrb[14].mxu1 }
 0x255   : > { %v682_v23 = vadd.f32 %v676_v8, %v633_v18  ;;  %v2039_v24 = vpop.f32.mrb[11].mxu0  ;;  %v2057_v25 = vpop.f32.mrb[15].mxu1 }
 0x25a   : > { %v725_v26 = vpop.f32.mrb[12].mxu0  ;;  %v875_v27 = vpop.f32.mrb[16].mxu1 }
 0x25b   : > { %v731_v28 = vadd.f32 %v725_v26, %v682_v23  ;;  %v2050_v29 = vpop.f32.mrb[13].mxu0  ;;  %v2068_v30 = vpop.f32.mrb[17].mxu1 }
 0x25c   : > { %v728_v31 = vpop.f32.mrb[14].mxu0  ;;  %v878_v32 = vpop.f32.mrb[18].mxu1 }
 0x25d   : > { %v780_v33 = vadd.f32 %v774_v17, %v731_v28  ;;  %v2051_v34 = vpop.f32.mrb[15].mxu0  ;;  %v2069_v35 = vpop.f32.mrb[19].mxu1 }
 0x262   : > { %v823_v36 = vpop.f32.mrb[16].mxu0  ;;  %v973_v37 = vpop.f32.mrb[20].mxu1 }
 0x263   : > { %v829_v38 = vadd.f32 %v823_v36, %v780_v33  ;;  %v2062_v39 = vpop.f32.mrb[17].mxu0  ;;  %v2080_v40 = vpop.f32.mrb[21].mxu1 }
 0x264   : > { %v826_v41 = vpop.f32.mrb[18].mxu0  ;;  %v976_v42 = vpop.f32.mrb[22].mxu1 }
 0x265   : > { %v881_v43 = vadd.f32 %v875_v27, %v829_v38  ;;  %v2063_v44 = vpop.f32.mrb[19].mxu0  ;;  %v2081_v45 = vpop.f32.mrb[23].mxu1 }
 0x26a   : > { %v924_v46 = vpop.f32.mrb[20].mxu0  ;;  %v1071_v47 = vpop.f32.mrb[24].mxu1 }
 0x26b   : > { %v930_v48 = vadd.f32 %v924_v46, %v881_v43  ;;  %v2074_v49 = vpop.f32.mrb[21].mxu0  ;;  %v2092_v50 = vpop.f32.mrb[25].mxu1 }
 0x26c   : > { %v927_v51 = vpop.f32.mrb[22].mxu0  ;;  %v1074_v52 = vpop.f32.mrb[26].mxu1 }
 0x26d   : > { %v979_v53 = vadd.f32 %v973_v37, %v930_v48  ;;  %v2075_v54 = vpop.f32.mrb[23].mxu0  ;;  %v2093_v55 = vpop.f32.mrb[27].mxu1 }
 0x272   : > { %v1022_v56 = vpop.f32.mrb[24].mxu0  ;;  %v1169_v57 = vpop.f32.mrb[28].mxu1 }
 0x273   : > { %v1028_v58 = vadd.f32 %v1022_v56, %v979_v53  ;;  %v2086_v59 = vpop.f32.mrb[25].mxu0  ;;  %v2104_v60 = vpop.f32.mrb[29].mxu1 }
 0x274   : > { %v1025_v61 = vpop.f32.mrb[26].mxu0  ;;  %v1172_v62 = vpop.f32.mrb[30].mxu1 }
 0x275   : > { %v1077_v63 = vadd.f32 %v1071_v47, %v1028_v58  ;;  %v2087_v1 = vpop.f32.mrb[27].mxu0  ;;  %v2105_v2 = vpop.f32.mrb[31].mxu1 }
 0x276   : > { %v1722_v59 = vpop.permute.xlu0 %1721 }
 0x27a   : > { %v1120_v3 = vpop.f32.mrb[28].mxu0  ;;  %v1267_v4 = vpop.f32.mrb[32].mxu1 }
 0x27b   : > { %v1126_v5 = vadd.f32 %v1120_v3, %v1077_v63  ;;  %v2098_v6 = vpop.f32.mrb[29].mxu0  ;;  %v2116_v7 = vpop.f32.mrb[33].mxu1 }
 0x27c   : > { %v1123_v8 = vpop.f32.mrb[30].mxu0  ;;  %v1270_v9 = vpop.f32.mrb[34].mxu1 }
 0x27d   : > { %v1175_v0 = vadd.f32 %v1169_v57, %v1126_v5  ;;  %v2099_v10 = vpop.f32.mrb[31].mxu0  ;;  %v2117_v11 = vpop.f32.mrb[35].mxu1 }
 0x282   : > { %v1218_v12 = vpop.f32.mrb[32].mxu0  ;;  %v1368_v13 = vpop.f32.mrb[36].mxu1 }
 0x283   : > { %v1224_v14 = vadd.f32 %v1218_v12, %v1175_v0  ;;  %v2110_v15 = vpop.f32.mrb[33].mxu0  ;;  %v2128_v16 = vpop.f32.mrb[37].mxu1 }
 0x284   : > { %v1221_v17 = vpop.f32.mrb[34].mxu0  ;;  %v1371_v18 = vpop.f32.mrb[38].mxu1 }
 0x285   : > { %v1273_v19 = vadd.f32 %v1267_v4, %v1224_v14  ;;  %v2111_v20 = vpop.f32.mrb[35].mxu0  ;;  %v2129_v21 = vpop.f32.mrb[39].mxu1 }
 0x28a   : > { %v1319_v22 = vpop.f32.mrb[36].mxu0  ;;  %v1466_v23 = vpop.f32.mrb[40].mxu1 }
 0x28b   : > { %v1325_v24 = vadd.f32 %v1319_v22, %v1273_v19  ;;  %v2122_v25 = vpop.f32.mrb[37].mxu0  ;;  %v2140_v26 = vpop.f32.mrb[41].mxu1 }
 0x28c   : > { %v1322_v27 = vpop.f32.mrb[38].mxu0  ;;  %v1469_v28 = vpop.f32.mrb[42].mxu1 }
 0x28d   : > { %v1374_v29 = vadd.f32 %v1368_v13, %v1325_v24  ;;  %v2123_v30 = vpop.f32.mrb[39].mxu0  ;;  %v2141_v31 = vpop.f32.mrb[43].mxu1 }
 0x292   : > { %v1417_v32 = vpop.f32.mrb[40].mxu0  ;;  %v1564_v33 = vpop.f32.mrb[44].mxu1 }
 0x293   : > { %v1423_v34 = vadd.f32 %v1417_v32, %v1374_v29  ;;  %v2134_v35 = vpop.f32.mrb[41].mxu0  ;;  %v2152_v36 = vpop.f32.mrb[45].mxu1 }
 0x294   : > { %v1420_v37 = vpop.f32.mrb[42].mxu0  ;;  %v1567_v38 = vpop.f32.mrb[46].mxu1 }
 0x295   : > { %v1472_v39 = vadd.f32 %v1466_v23, %v1423_v34  ;;  %v2135_v40 = vpop.f32.mrb[43].mxu0  ;;  %v2153_v41 = vpop.f32.mrb[47].mxu1 }
 0x29a   : > { %v1515_v42 = vpop.f32.mrb[44].mxu0  ;;  %v1662_v43 = vpop.f32.mrb[48].mxu1 }
 0x29b   : > { %v1521_v44 = vadd.f32 %v1515_v42, %v1472_v39  ;;  %v2146_v45 = vpop.f32.mrb[45].mxu0  ;;  %v2164_v46 = vpop.f32.mrb[49].mxu1 }
 0x29c   : > { %v1518_v47 = vpop.f32.mrb[46].mxu0  ;;  %v1665_v48 = vpop.f32.mrb[50].mxu1 }
 0x29d   : > { %v1570_v49 = vadd.f32 %v1564_v33, %v1521_v44  ;;  %v2147_v50 = vpop.f32.mrb[47].mxu0  ;;  %v2165_v51 = vpop.f32.mrb[51].mxu1 }
 0x2a2   : > { %v1613_v52 = vpop.f32.mrb[48].mxu0 }
 0x2a3   : > { %v1619_v53 = vadd.f32 %v1613_v52, %v1570_v49  ;;  %v2158_v54 = vpop.f32.mrb[49].mxu0 }
 0x2a4   : > { %v1616_v55 = vpop.f32.mrb[50].mxu0 }
 0x2a5   : > { %v1668_v56 = vadd.f32 %v1662_v43, %v1619_v53  ;;  %v2159_v57 = vpop.f32.mrb[51].mxu0 }
 0x2aa   : > { %v1711_v58 = vpop.f32.mrb[52].mxu0 }
 0x2ab   : > { %v1717_v60 = vadd.f32 %v1711_v58, %v1668_v56  ;;  %v2170_v61 = vpop.f32.mrb[53].mxu0 }
 0x2ac   : > { %v1714_v62 = vpop.f32.mrb[54].mxu0 }
 0x2ad   : > { %v1724_v63 = vadd.f32 %v1722_v59, %v1717_v60  ;;  %v2171_v1 = vpop.f32.mrb[55].mxu0 }
 0x2af   : > { %1726 = vst.msk [vmem:[%s378_s0] sm:$0xff] %vm1725_vm2, %v1724_v63 }
 0x2b0   : > { %2508 = shalt.err (!%p2505_p6)
}
 0x2b1   : > { %s2509_s4 = scalar_lea.hbm %s3242_s7, 128  ;;  %s2513_s12 = scalar_lea.hbm %s3411_s16, 1024 }
 0x2b2   : > { %p2510_p12 = scmp.ne.s32.totalorder %s3242_s7, %s2509_s4  ;;  %p2514_p4 = scmp.lt.u32.totalorder %s3242_s7, %s3411_s16 }
 0x2b3   : > { %p2515_p8 = scmp.lt.u32.totalorder %s2513_s12, %s2509_s4  ;;  %p2517_p3 = scmp.lt.u32.totalorder %s2509_s4, %s3242_s7 }
 0x2b4   : > { %p2511_p5 = pnand %p2510_p12, %p3412_p11 }
 0x2b5   : > { %p2516_p1 = por %p2515_p8, %p2514_p4 }
 0x2b6   : > { %p2512_p0 = pneg %p2511_p5 }
 0x2b7   : > { %p2518_p10 = por %p2517_p3, %p2516_p1 }
 0x2b9   : > { %p2519_p2 = pnand %p2518_p10, %p2512_p0 }
 0x2bb   : > { %2522 = shalt.err (!%p2519_p2)
}
 0x2bc   : > { %2187 = dma.vmem_to_hbm [thread:$0]  (%p3412_p11), %s3244_s17, 128, %s3242_s7, %s1728_s19  }
 0x2bd PF: > { %p2215_p13 = scmp.ge.s32.totalorder %s2653_s6, 2  ;;  %s1755_s8 = sand.u32 1, %s2625_s24  }
 0x2be   : > { %p3413_p7 = scmp.ne.s32.totalorder %s3386_s14, 0  ;;  %s1756_s0 = scalar_lea.sflag [#allocation4], %s1755_s8 }
 0x2c0   : > { %p2207_p9 = pnand %p2215_p13, %p3413_p7 }
 0x2c2   : > { %2596 = dma.done.wait (!%p2207_p9), %s1756_s0, 128  }
 0x2c3   : > { %2598 = vsyncadd (!%p2207_p9), %s1756_s0, 4294967168  ;;  %s25_s6 = sadd.s32 1, %s2653_s6   ;;  %s3415_s18 = sld [smem:[#allocation18_spill]] }
 0x2c4   : > { %p3273_p6 = scmp.ge.s32.totalorder %s25_s6, 10   ;;  %s3416_s21 = sld [smem:[#allocation19_spill]] }
 0x2c5   : > { %s3417_s9 = smov %s2855_s22  ;;  %s3418_s27 = sld [smem:[#allocation22_spill]] }
 0x2c6   : > { %s3419_s14 = sld [smem:[#allocation23_spill]]  ;;  %s3420_s29 = sld [smem:[#allocation25_spill]] }
 0x2c7   : > { %s3421_s30 = sld [smem:[#allocation26_spill]]  ;;  %s3422_s19 = smov %s2609_s20 }
 0x2c8   : > { %s3423_s20 = smov %s3017_s28  ;;  %s3424_s22 = smov %s2621_s23 }
 0x2c9   : > { %s3425_s23 = smov %s3417_s9  ;;  %s3426_s24 = smov %s2629_s25 }
 0x2ca   : > { %s3427_s25 = smov %s2633_s26  ;;  %s3428_s26 = smov %s2941_s10 }
 0x2cb   :  { %24 = sbr.rel (!%p3273_p6) target bundleno = 20 (0x14), region = 143 }
 0x2cc   : > { %s3429_s28 = smov %s3419_s14 }
 0x2d2   :  { %1761 = vsyncpa [#allocation3], 1 }
 0x2d3   :  { %1763 = vsyncpa [#allocation3 + $0x1], 1 }
 0x2d4   :  { %1764 = vsyncpa [#allocation6], 1 }
 0x2d5   :  { %1766 = vsyncpa [#allocation6 + $0x1], 1 }
 0x2d6   :  { %1767 = vsyncpa [#allocation9], 1 }
 0x2d7   :  { %1768 = vsyncpa [#allocation4], 1 }
 0x2d8   :  { %1770 = vsyncpa [#allocation4 + $0x1], 1 }

</bundles_post_ra>
